<compile_context>
chip_gen: v7x
topology: tpu7x:2x2x1
jax: 0.10.0
libtpu: 0.0.40
codegen_flags: <defaults>
</compile_context>

<pallas_src>
import functools
import math

import jax
import jax.numpy as jnp
from jax import lax
from jax.experimental import pallas as pl
from jax.experimental.pallas import tpu as pltpu


_LANE = 128


def _round_up(n, m):
    return ((n + m - 1) // m) * m


def _pad2d(x, rows, cols):
    r, c = x.shape
    return jnp.pad(x, ((0, rows - r), (0, cols - c)))


def _spec(block_shape, index_map, nbuf=None, enable_buffered=True):
    """BlockSpec, optionally with an explicit buffer count (fallback safe)."""
    if nbuf is not None and enable_buffered and hasattr(pl, "Buffered"):
        try:
            return pl.BlockSpec(block_shape, index_map,
                                pipeline_mode=pl.Buffered(nbuf))
        except TypeError:
            pass
    return pl.BlockSpec(block_shape, index_map)


def _try_buffered(run):
    """Run with Buffered(1) residents; fall back to default double-buffering."""
    if hasattr(pl, "Buffered"):
        try:
            return run(True)
        except Exception:
            pass
    return run(False)


def _vmem_limit(plan_bytes):
    """Scoped-VMEM request: buffer plan + headroom, clamped per generation."""
    headroom = 4 << 20
    cap = 128 << 20
    try:
        cap = int(getattr(pltpu.get_tpu_info(), "vmem_capacity_bytes", cap))
    except Exception:
        pass
    want = int(plan_bytes) + headroom
    return int(max(min(want, cap - (8 << 20)), 16 << 20))


# ---------------------------------------------------------------------------
# Fused view/layer stack kernel.
# grid = (nviews, nlayers), both "arbitrary".
# ---------------------------------------------------------------------------

def _stack_kernel(alpha, residual,
                  thetas_ref, w_ref, x_ref, fcw_ref, fcb_ref, adj_ref,
                  convw_ref, sum_ref, h0_ref, inner_ref, prev_ref):
    k = pl.program_id(0)   # view
    i = pl.program_id(1)   # layer

    @pl.when((k == 0) & (i == 0))
    def _():
        # Zero the prev-view scratch so view 0's discarded mix term is clean.
        prev_ref[...] = jnp.zeros_like(prev_ref)

    @pl.when(i == 0)
    def _():
        # Fused input projection for view k: h0 = relu(x @ W_fc + b).
        h0 = jnp.dot(x_ref[...], fcw_ref[...],
                     preferred_element_type=jnp.float32)
        h0 = jnp.maximum(h0 + fcb_ref[...], 0.0)
        h0_ref[...] = h0
        inner_ref[...] = h0
        sum_ref[...] = jnp.zeros_like(sum_ref)

    x = inner_ref[...]
    # Cross-view mixing with the previous view's layer-i output (view k >= 1).
    w0 = w_ref[0]
    mixed = w0 * x + (1.0 - w0) * prev_ref[i]
    xm = jnp.where(k >= 1, mixed, x)

    # GraphConvolution (variant=False):
    #   hi      = adj @ xm
    #   support = (1 - alpha) * hi + alpha * h0
    #   out     = theta * (support @ W_ortho) + (1 - theta) * support
    #   (+ xm if residual)   ->   relu(tanh(out))
    hi = jnp.dot(adj_ref[...], xm, preferred_element_type=jnp.float32)
    support = (1.0 - alpha) * hi + alpha * h0_ref[...]
    theta = thetas_ref[i]
    mm = jnp.dot(support, convw_ref[i], preferred_element_type=jnp.float32)
    out = theta * mm + (1.0 - theta) * support
    if residual:
        out = out + xm
    act = jnp.maximum(jnp.tanh(out), 0.0)

    inner_ref[...] = act
    prev_ref[i] = act                     # consumed once by view k+1, layer i
    sum_ref[...] = sum_ref[...] + act


def view_stack_pallas(thetas, w_scalar, x, fc_w, fc_b, adj, conv_w,
                      *, alpha, residual):
    """All views, all layers, per-view layer-sum. Returns (nviews, N, H)."""
    nviews, np_, fp = x.shape
    nlayers, hp, _ = conv_w.shape

    def run(buffered):
        smem = pl.BlockSpec(memory_space=pltpu.MemorySpace.SMEM)
        in_specs = [
            smem,                                                     # thetas
            smem,                                                     # w (mix)
            pl.BlockSpec((None, np_, fp), lambda k, i: (k, 0, 0)),    # x[k]
            pl.BlockSpec((None, fp, hp), lambda k, i: (k, 0, 0)),     # fc_w[k]
            pl.BlockSpec((None, 1, hp), lambda k, i: (k, 0, 0)),      # fc_b[k]
            _spec((None, np_, np_), lambda k, i: (k, 0, 0),
                  1, buffered),                                       # adj[k]
            _spec((nlayers, hp, hp), lambda k, i: (0, 0, 0),
                  1, buffered),                                       # conv_w
        ]
        out_specs = pl.BlockSpec((None, np_, hp), lambda k, i: (k, 0, 0))
        out_shape = jax.ShapeDtypeStruct((nviews, np_, hp), jnp.float32)

        adj_bufs = 1 if buffered else 2
        cw_bufs = 1 if buffered else 2
        plan = 4 * (2 * (np_ * fp + fp * hp + hp)     # x, fc_w, fc_b streams
                    + adj_bufs * np_ * np_            # adj
                    + cw_bufs * nlayers * hp * hp     # conv weights (all layers)
                    + 2 * np_ * hp                    # resident output blocks
                    + (2 + nlayers) * np_ * hp)       # h0 + inner + prev scratch

        kernel = functools.partial(_stack_kernel, float(alpha), bool(residual))
        return pl.pallas_call(
            kernel,
            grid=(nviews, nlayers),
            in_specs=in_specs,
            out_specs=out_specs,
            out_shape=out_shape,
            scratch_shapes=[pltpu.VMEM((np_, hp), jnp.float32),        # h0
                            pltpu.VMEM((np_, hp), jnp.float32),        # inner
                            pltpu.VMEM((nlayers, np_, hp), jnp.float32)],  # prev
            compiler_params=pltpu.CompilerParams(
                dimension_semantics=("arbitrary", "arbitrary"),
                vmem_limit_bytes=_vmem_limit(plan)),
        )(thetas, w_scalar, x, fc_w, fc_b, adj, conv_w)

    return _try_buffered(run)


# ---------------------------------------------------------------------------
# Output head: row-tiled ("parallel") projection for all views, per-view
# log_softmax, summed-logits log_softmax, mean of per-view log_softmax.
# ---------------------------------------------------------------------------

def _head_kernel(nclass, vs_ref, w_ref, b_ref, pv_ref, sum_ref, mean_ref):
    nviews, tile, hp = vs_ref.shape
    cp = w_ref.shape[1]

    # Single batched matmul for all views of this row tile.
    vs = vs_ref[...].reshape(nviews * tile, hp)
    logits = jnp.dot(vs, w_ref[...], preferred_element_type=jnp.float32)
    logits = (logits + b_ref[...]).reshape(nviews, tile, cp)

    lane = lax.broadcasted_iota(jnp.int32, (1, 1, cp), 2)
    mask = lane < nclass                       # real (unpadded) logit lanes

    def masked_log_softmax(z, m):
        zm = jnp.where(m, z, jnp.float32(-1e30))
        mx = jnp.max(zm, axis=-1, keepdims=True)
        e = jnp.where(m, jnp.exp(z - mx), 0.0)
        lse = jnp.log(jnp.sum(e, axis=-1, keepdims=True))
        return z - mx - lse

    ls = masked_log_softmax(logits, mask)                  # (nviews, tile, cp)
    pv_ref[...] = ls
    sum_ref[...] = masked_log_softmax(jnp.sum(logits, axis=0), mask[0])
    mean_ref[...] = jnp.sum(ls, axis=0) * (1.0 / nviews)


def output_head_pallas(view_sums, w_out, b_out, *, nclass):
    nviews, np_, hp = view_sums.shape
    cp = w_out.shape[1]

    tile = _LANE
    for cand in (1024, 512, 256):
        if np_ % cand == 0:
            tile = cand
            break

    def run(buffered):
        in_specs = [
            pl.BlockSpec((nviews, tile, hp), lambda r: (0, r, 0)),
            _spec((hp, cp), lambda r: (0, 0), 1, buffered),
            _spec((1, cp), lambda r: (0, 0), 1, buffered),
        ]
        out_specs = (
            pl.BlockSpec((nviews, tile, cp), lambda r: (0, r, 0)),
            pl.BlockSpec((tile, cp), lambda r: (r, 0)),
            pl.BlockSpec((tile, cp), lambda r: (r, 0)),
        )
        out_shape = (jax.ShapeDtypeStruct((nviews, np_, cp), jnp.float32),
                     jax.ShapeDtypeStruct((np_, cp), jnp.float32),
                     jax.ShapeDtypeStruct((np_, cp), jnp.float32))
        w_bufs = 1 if buffered else 2
        plan = 4 * (2 * nviews * tile * hp
                    + w_bufs * (hp * cp + cp)
                    + 2 * (nviews * tile * cp + 2 * tile * cp))
        kernel = functools.partial(_head_kernel, int(nclass))
        return pl.pallas_call(
            kernel,
            grid=(np_ // tile,),
            in_specs=in_specs,
            out_specs=out_specs,
            out_shape=out_shape,
            compiler_params=pltpu.CompilerParams(
                dimension_semantics=("parallel",),
                vmem_limit_bytes=_vmem_limit(plan)),
        )(view_sums, w_out, b_out)

    return _try_buffered(run)


# ------------------------------- glue / model -------------------------------

def ortho_norm(weight):
    # W_ortho = W @ inv(cholesky(W^T W + 1e-4 I))^T   (plain JAX param prep).
    h = weight.shape[1]
    wtw = weight.T @ weight + 1e-4 * jnp.eye(h, dtype=weight.dtype)
    L = jnp.linalg.cholesky(wtw)
    return weight @ jnp.linalg.inv(L).T


def maugcn_forward(xs, adjs, params, *, nlayers, lamda, alpha, residual):
    """Returns (log_softmax(sum), mean_of_log_softmax, per-view log_softmax, w)."""
    nviews = len(adjs)
    n = xs[0].shape[0]
    nhidden = params["conv_w"][0].shape[0]
    nclass = params["fc_out_w"].shape[1]

    hp = _round_up(nhidden, _LANE)
    cp = _round_up(nclass, _LANE)
    np_ = _round_up(n, _LANE)      # lane-dense adj rows / MXU-native K
    fp = _round_up(max(x.shape[1] for x in xs), _LANE)

    thetas = jnp.array([math.log(lamda / (i + 1) + 1.0) for i in range(nlayers)],
                       dtype=jnp.float32)
    w_scalar = params["w"].astype(jnp.float32).reshape(1)

    # Ortho-normalize conv weights once per forward (matches reference), pad.
    conv_w = jnp.stack([_pad2d(ortho_norm(w), hp, hp) for w in params["conv_w"]])

    x_stk = jnp.stack([_pad2d(x, np_, fp) for x in xs])
    adj_stk = jnp.stack([_pad2d(a, np_, np_) for a in adjs])
    fcw_stk = jnp.stack([_pad2d(w, fp, hp) for w in params["fc_w"]])
    fcb_stk = jnp.stack([jnp.pad(b, (0, hp - nhidden)).reshape(1, hp)
                         for b in params["fc_b"]])

    view_sums = view_stack_pallas(thetas, w_scalar, x_stk, fcw_stk, fcb_stk,
                                  adj_stk, conv_w,
                                  alpha=alpha, residual=residual)

    fc_out_w = _pad2d(params["fc_out_w"], hp, cp)
    fc_out_b = jnp.pad(params["fc_out_b"], (0, cp - nclass)).reshape(1, cp)

    pv_ls, sum_ls, mean_ls = output_head_pallas(
        view_sums, fc_out_w, fc_out_b, nclass=nclass)

    per_view = [pv_ls[v, :n, :nclass] for v in range(nviews)]
    return (sum_ls[:n, :nclass], mean_ls[:n, :nclass], per_view, w_scalar)


# ----------------------- pure-JAX reference (for checks) --------------------

def reference_forward(xs, adjs, params, *, nlayers, lamda, alpha, residual):
    dot = functools.partial(jnp.dot, precision=jax.lax.Precision.HIGHEST)
    nviews = len(adjs)
    w = params["w"][0]
    layer_fcs, output_allcons, outputs = [], [], []
    for k in range(nviews):
        h = jax.nn.relu(dot(xs[k], params["fc_w"][k]) + params["fc_b"][k])
        layer_fcs.append(h)
        inner = h
        cons = []
        for i in range(nlayers):
            if k >= 1:
                inner = w * inner + (1.0 - w) * output_allcons[nlayers * (k - 1) + i]
            ow = ortho_norm(params["conv_w"][i])
            theta = math.log(lamda / (i + 1) + 1.0)
            hi = dot(adjs[k], inner)
            support = (1.0 - alpha) * hi + alpha * layer_fcs[k]
            out = theta * dot(support, ow) + (1.0 - theta) * support
            if residual:
                out = out + inner
            inner = jax.nn.relu(jnp.tanh(out))
            cons.append(inner)
            output_allcons.append(inner)
        ssum = cons[0]
        for c in cons[1:]:
            ssum = ssum + c
        outputs.append(ssum)
    per_view, total = [], None
    for k in range(nviews):
        lo = dot(outputs[k], params["fc_out_w"]) + params["fc_out_b"]
        total = lo if total is None else total + lo
        per_view.append(jax.nn.log_softmax(lo, axis=1))
    mean = jnp.mean(jnp.stack(per_view), axis=0)
    return jax.nn.log_softmax(total, axis=1), mean, per_view


def init_params(key, nfeat, nhidden, nclass):
    keys = jax.random.split(key, 2 * len(nfeat) + 3)
    fc_w, fc_b = [], []
    for j, nf in enumerate(nfeat):
        bound = 1.0 / math.sqrt(nf)
        fc_w.append(jax.random.uniform(keys[2 * j], (nf, nhidden),
                                       minval=-bound, maxval=bound,
                                       dtype=jnp.float32))
        fc_b.append(jax.random.uniform(keys[2 * j + 1], (nhidden,),
                                       minval=-bound, maxval=bound,
                                       dtype=jnp.float32))
    bound = 1.0 / math.sqrt(nhidden)
    fc_out_w = jax.random.uniform(keys[-3], (nhidden, nclass),
                                  minval=-bound, maxval=bound,
                                  dtype=jnp.float32)
    fc_out_b = jax.random.uniform(keys[-2], (nclass,),
                                  minval=-bound, maxval=bound,
                                  dtype=jnp.float32)
    return fc_w, fc_b, fc_out_w, fc_out_b, keys[-1]


if __name__ == "__main__":
    # Small, forward-consistent shapes.
    num_views = 2
    n_nodes = 16
    nfeat = [12, 10]           # per-view input feature dims
    nlayers = 2
    nhidden = 32
    nclass = 4
    lamda = 0.5
    alpha = 0.1
    variant = False            # -> residual=False in GraphConvolution
    m = 0.5

    key = jax.random.PRNGKey(0)
    kx, kadj, kparam = jax.random.split(key, 3)

    # Inputs: list of per-view feature matrices and adjacency matrices.
    x_keys = jax.random.split(kx, num_views)
    xs = [jax.random.normal(x_keys[i], (n_nodes, nfeat[i]), dtype=jnp.float32)
          for i in range(num_views)]
    a_keys = jax.random.split(kadj, num_views)
    adjs = []
    for i in range(num_views):
        a = jax.random.uniform(a_keys[i], (n_nodes, n_nodes), dtype=jnp.float32)
        a = 0.5 * (a + a.T) + jnp.eye(n_nodes, dtype=jnp.float32)
        a = a / jnp.sum(a, axis=1, keepdims=True)   # row-normalized dense adj
        adjs.append(a)

    fc_w, fc_b, fc_out_w, fc_out_b, kconv = init_params(
        kparam, nfeat, nhidden, nclass)

    # glorot_init for each GraphConvolution weight [nhidden, nhidden].
    conv_keys = jax.random.split(kconv, nlayers)
    init_range = math.sqrt(6.0 / (nhidden + nhidden))
    conv_w = [jax.random.uniform(conv_keys[i], (nhidden, nhidden),
                                 minval=-init_range, maxval=init_range,
                                 dtype=jnp.float32)
              for i in range(nlayers)]

    params = {
        "fc_w": fc_w,
        "fc_b": fc_b,
        "fc_out_w": fc_out_w,
        "fc_out_b": fc_out_b,
        "conv_w": conv_w,
        "w": jnp.array([m], dtype=jnp.float32),
    }

    out_sum_ls, out_mean, out_per_view, w_param = maugcn_forward(
        xs, adjs, params, nlayers=nlayers, lamda=lamda, alpha=alpha,
        residual=variant)

    jax.block_until_ready(out_sum_ls)
    jax.block_until_ready(out_mean)
    for o in out_per_view:
        jax.block_until_ready(o)
    jax.block_until_ready(w_param)

    assert out_sum_ls.shape == (n_nodes, nclass)
    assert out_mean.shape == (n_nodes, nclass)
    assert len(out_per_view) == num_views
    assert all(o.shape == (n_nodes, nclass) for o in out_per_view)
    assert bool(jnp.all(jnp.isfinite(out_sum_ls)))
    assert bool(jnp.all(jnp.isfinite(out_mean)))

    # Correctness check against a pure-JAX reference of the PyTorch forward.
    ref_sum, ref_mean, ref_pv = reference_forward(
        xs, adjs, params, nlayers=nlayers, lamda=lamda, alpha=alpha,
        residual=variant)
    tol = dict(rtol=5e-4, atol=5e-4)
    assert bool(jnp.allclose(out_sum_ls, ref_sum, **tol)), "sum log_softmax mismatch"
    assert bool(jnp.allclose(out_mean, ref_mean, **tol)), "mean log_softmax mismatch"
    for v in range(num_views):
        assert bool(jnp.allclose(out_per_view[v], ref_pv[v], **tol)), (
            f"per-view log_softmax mismatch (view {v})")

    print("KERNEL_OK")
</pallas_src>

<mosaic_0001>
module attributes {stable_mosaic.version = 11 : i64} {
  func.func @_stack_kernel(%arg0: i32, %arg1: i32, %arg2: memref<2xf32, #tpu.memory_space<smem>>, %arg3: memref<1xf32, #tpu.memory_space<smem>>, %arg4: memref<1x128x128xf32, #tpu.memory_space<vmem>>, %arg5: memref<1x128x128xf32, #tpu.memory_space<vmem>>, %arg6: memref<1x1x128xf32, #tpu.memory_space<vmem>>, %arg7: memref<1x128x128xf32, #tpu.memory_space<vmem>>, %arg8: memref<2x128x128xf32, #tpu.memory_space<vmem>>, %arg9: memref<1x128x128xf32, #tpu.memory_space<vmem>>, %arg10: memref<128x128xf32, #tpu.memory_space<vmem>>, %arg11: memref<128x128xf32, #tpu.memory_space<vmem>>, %arg12: memref<2x128x128xf32, #tpu.memory_space<vmem>>) attributes {dimension_semantics = [#tpu.dimension_semantics<arbitrary>, #tpu.dimension_semantics<arbitrary>], iteration_bounds = array<i64: 2, 2>, scalar_prefetch = 0 : i64, scratch_operands = 3 : i64, tpu.core_type = #tpu.core_type<tc>, window_params = [{transform_indices = @transform_0, window_bounds = array<i64: 2>}, {transform_indices = @transform_1, window_bounds = array<i64: 1>}, {transform_indices = @transform_2, window_bounds = array<i64: 1, 128, 128>}, {transform_indices = @transform_3, window_bounds = array<i64: 1, 128, 128>}, {transform_indices = @transform_4, window_bounds = array<i64: 1, 1, 128>}, {pipeline_mode = #tpu.pipeline_mode<synchronous>, transform_indices = @transform_5, window_bounds = array<i64: 1, 128, 128>}, {pipeline_mode = #tpu.pipeline_mode<synchronous>, transform_indices = @transform_6, window_bounds = array<i64: 2, 128, 128>}, {transform_indices = @transform_7, window_bounds = array<i64: 1, 128, 128>}]} {
    %c0_i32 = arith.constant 0 : i32
    %0 = arith.cmpi eq, %arg0, %c0_i32 : i32
    %c0_i32_0 = arith.constant 0 : i32
    %1 = arith.cmpi eq, %arg1, %c0_i32_0 : i32
    %2 = arith.andi %0, %1 : i1
    %3 = arith.extui %2 : i1 to i32
    %c0_i32_1 = arith.constant 0 : i32
    %4 = arith.cmpi ne, %3, %c0_i32_1 : i32
    scf.if %4 {
      %cst_31 = arith.constant 0.000000e+00 : f32
      %56 = vector.broadcast %cst_31 : f32 to vector<2x128x128xf32>
      %c0_32 = arith.constant 0 : index
      %c0_33 = arith.constant 0 : index
      %c0_34 = arith.constant 0 : index
      %57 = vector.load %arg12[%c0_32, %c0_33, %c0_34] : memref<2x128x128xf32, #tpu.memory_space<vmem>>, vector<2x128x128xf32>
      tpu.vector_store %arg12[%c0_32, %c0_33, %c0_34], %56 {strides = array<i32>} : memref<2x128x128xf32, #tpu.memory_space<vmem>>, vector<2x128x128xf32>,
    } else {
    }
    %c0_i32_2 = arith.constant 0 : i32
    %5 = arith.cmpi eq, %arg1, %c0_i32_2 : i32
    %6 = arith.extui %5 : i1 to i32
    %c0_i32_3 = arith.constant 0 : i32
    %7 = arith.cmpi ne, %6, %c0_i32_3 : i32
    scf.if %7 {
      %c0_31 = arith.constant 0 : index
      %c0_32 = arith.constant 0 : index
      %c0_33 = arith.constant 0 : index
      %56 = vector.load %arg4[%c0_31, %c0_32, %c0_33] : memref<1x128x128xf32, #tpu.memory_space<vmem>>, vector<1x128x128xf32>
      %57 = vector.shape_cast %56 : vector<1x128x128xf32> to vector<128x128xf32>
      %c0_34 = arith.constant 0 : index
      %c0_35 = arith.constant 0 : index
      %c0_36 = arith.constant 0 : index
      %58 = vector.load %arg5[%c0_34, %c0_35, %c0_36] : memref<1x128x128xf32, #tpu.memory_space<vmem>>, vector<1x128x128xf32>
      %59 = vector.shape_cast %58 : vector<1x128x128xf32> to vector<128x128xf32>
      %cst_37 = arith.constant dense<0.000000e+00> : vector<128x128xf32>
      %60 = tpu.matmul %57, %59, %cst_37 {dimension_numbers = #tpu.dot_dimension_numbers<[1], [0], [0], [1], [0, 0, 1, 1], [], []>} : vector<128x128xf32>, vector<128x128xf32>, vector<128x128xf32> -> vector<128x128xf32>
      %c0_38 = arith.constant 0 : index
      %c0_39 = arith.constant 0 : index
      %c0_40 = arith.constant 0 : index
      %61 = vector.load %arg6[%c0_38, %c0_39, %c0_40] : memref<1x1x128xf32, #tpu.memory_space<vmem>>, vector<1x1x128xf32>
      %62 = vector.shape_cast %61 : vector<1x1x128xf32> to vector<1x128xf32>
      %63 = vector.broadcast %62 : vector<1x128xf32> to vector<128x128xf32>
      %64 = arith.addf %60, %63 : vector<128x128xf32>
      %cst_41 = arith.constant 0.000000e+00 : f32
      %65 = vector.broadcast %cst_41 : f32 to vector<128x128xf32>
      %66 = arith.maximumf %64, %65 : vector<128x128xf32>
      %c0_42 = arith.constant 0 : index
      %c0_43 = arith.constant 0 : index
      %67 = vector.load %arg10[%c0_42, %c0_43] : memref<128x128xf32, #tpu.memory_space<vmem>>, vector<128x128xf32>
      tpu.vector_store %arg10[%c0_42, %c0_43], %66 {strides = array<i32>} : memref<128x128xf32, #tpu.memory_space<vmem>>, vector<128x128xf32>,
      %c0_44 = arith.constant 0 : index
      %c0_45 = arith.constant 0 : index
      %68 = vector.load %arg11[%c0_44, %c0_45] : memref<128x128xf32, #tpu.memory_space<vmem>>, vector<128x128xf32>
      tpu.vector_store %arg11[%c0_44, %c0_45], %66 {strides = array<i32>} : memref<128x128xf32, #tpu.memory_space<vmem>>, vector<128x128xf32>,
      %cst_46 = arith.constant 0.000000e+00 : f32
      %69 = vector.broadcast %cst_46 : f32 to vector<128x128xf32>
      %c0_47 = arith.constant 0 : index
      %c0_48 = arith.constant 0 : index
      %c0_49 = arith.constant 0 : index
      %70 = vector.load %arg9[%c0_47, %c0_48, %c0_49] : memref<1x128x128xf32, #tpu.memory_space<vmem>>, vector<1x128x128xf32>
      %71 = vector.shape_cast %70 : vector<1x128x128xf32> to vector<128x128xf32>
      %72 = vector.shape_cast %69 : vector<128x128xf32> to vector<1x128x128xf32>
      tpu.vector_store %arg9[%c0_47, %c0_48, %c0_49], %72 {strides = array<i32>} : memref<1x128x128xf32, #tpu.memory_space<vmem>>, vector<1x128x128xf32>,
    } else {
    }
    %c0 = arith.constant 0 : index
    %c0_4 = arith.constant 0 : index
    %8 = vector.load %arg11[%c0, %c0_4] : memref<128x128xf32, #tpu.memory_space<vmem>>, vector<128x128xf32>
    %c0_5 = arith.constant 0 : index
    %9 = memref.load %arg3[%c0_5] : memref<1xf32, #tpu.memory_space<smem>>
    %10 = vector.broadcast %9 : f32 to vector<128x128xf32>
    %11 = arith.mulf %10, %8 : vector<128x128xf32>
    %cst = arith.constant 1.000000e+00 : f32
    %12 = arith.subf %cst, %9 : f32
    %13 = arith.index_cast %arg1 : i32 to index
    %c0_6 = arith.constant 0 : index
    %c0_7 = arith.constant 0 : index
    %14 = vector.load %arg12[%13, %c0_6, %c0_7] : memref<2x128x128xf32, #tpu.memory_space<vmem>>, vector<1x128x128xf32>
    %15 = vector.shape_cast %14 : vector<1x128x128xf32> to vector<128x128xf32>
    %16 = vector.broadcast %12 : f32 to vector<128x128xf32>
    %17 = arith.mulf %16, %15 : vector<128x128xf32>
    %18 = arith.addf %11, %17 : vector<128x128xf32>
    %c1_i32 = arith.constant 1 : i32
    %19 = arith.cmpi sge, %arg0, %c1_i32 : i32
    %20 = arith.select %19, %18, %8 : vector<128x128xf32>
    %c0_8 = arith.constant 0 : index
    %c0_9 = arith.constant 0 : index
    %c0_10 = arith.constant 0 : index
    %21 = vector.load %arg7[%c0_8, %c0_9, %c0_10] : memref<1x128x128xf32, #tpu.memory_space<vmem>>, vector<1x128x128xf32>
    %22 = vector.shape_cast %21 : vector<1x128x128xf32> to vector<128x128xf32>
    %cst_11 = arith.constant dense<0.000000e+00> : vector<128x128xf32>
    %23 = tpu.matmul %22, %20, %cst_11 {dimension_numbers = #tpu.dot_dimension_numbers<[1], [0], [0], [1], [0, 0, 1, 1], [], []>} : vector<128x128xf32>, vector<128x128xf32>, vector<128x128xf32> -> vector<128x128xf32>
    %cst_12 = arith.constant 0.899999976 : f32
    %24 = vector.broadcast %cst_12 : f32 to vector<128x128xf32>
    %25 = arith.mulf %24, %23 : vector<128x128xf32>
    %c0_13 = arith.constant 0 : index
    %c0_14 = arith.constant 0 : index
    %26 = vector.load %arg10[%c0_13, %c0_14] : memref<128x128xf32, #tpu.memory_space<vmem>>, vector<128x128xf32>
    %cst_15 = arith.constant 1.000000e-01 : f32
    %27 = vector.broadcast %cst_15 : f32 to vector<128x128xf32>
    %28 = arith.mulf %27, %26 : vector<128x128xf32>
    %29 = arith.addf %25, %28 : vector<128x128xf32>
    %30 = arith.index_cast %arg1 : i32 to index
    %31 = memref.load %arg2[%30] : memref<2xf32, #tpu.memory_space<smem>>
    %32 = arith.index_cast %arg1 : i32 to index
    %c0_16 = arith.constant 0 : index
    %c0_17 = arith.constant 0 : index
    %33 = vector.load %arg8[%32, %c0_16, %c0_17] : memref<2x128x128xf32, #tpu.memory_space<vmem>>, vector<1x128x128xf32>
    %34 = vector.shape_cast %33 : vector<1x128x128xf32> to vector<128x128xf32>
    %cst_18 = arith.constant dense<0.000000e+00> : vector<128x128xf32>
    %35 = tpu.matmul %29, %34, %cst_18 {dimension_numbers = #tpu.dot_dimension_numbers<[1], [0], [0], [1], [0, 0, 1, 1], [], []>} : vector<128x128xf32>, vector<128x128xf32>, vector<128x128xf32> -> vector<128x128xf32>
    %36 = vector.broadcast %31 : f32 to vector<128x128xf32>
    %37 = arith.mulf %36, %35 : vector<128x128xf32>
    %cst_19 = arith.constant 1.000000e+00 : f32
    %38 = arith.subf %cst_19, %31 : f32
    %39 = vector.broadcast %38 : f32 to vector<128x128xf32>
    %40 = arith.mulf %39, %29 : vector<128x128xf32>
    %41 = arith.addf %37, %40 : vector<128x128xf32>
    %42 = math.tanh %41 : vector<128x128xf32>
    %cst_20 = arith.constant 0.000000e+00 : f32
    %43 = vector.broadcast %cst_20 : f32 to vector<128x128xf32>
    %44 = arith.maximumf %42, %43 : vector<128x128xf32>
    %c0_21 = arith.constant 0 : index
    %c0_22 = arith.constant 0 : index
    %45 = vector.load %arg11[%c0_21, %c0_22] : memref<128x128xf32, #tpu.memory_space<vmem>>, vector<128x128xf32>
    tpu.vector_store %arg11[%c0_21, %c0_22], %44 {strides = array<i32>} : memref<128x128xf32, #tpu.memory_space<vmem>>, vector<128x128xf32>,
    %46 = arith.index_cast %arg1 : i32 to index
    %c0_23 = arith.constant 0 : index
    %c0_24 = arith.constant 0 : index
    %47 = vector.load %arg12[%46, %c0_23, %c0_24] : memref<2x128x128xf32, #tpu.memory_space<vmem>>, vector<1x128x128xf32>
    %48 = vector.shape_cast %47 : vector<1x128x128xf32> to vector<128x128xf32>
    %49 = vector.shape_cast %44 : vector<128x128xf32> to vector<1x128x128xf32>
    tpu.vector_store %arg12[%46, %c0_23, %c0_24], %49 {strides = array<i32>} : memref<2x128x128xf32, #tpu.memory_space<vmem>>, vector<1x128x128xf32>,
    %c0_25 = arith.constant 0 : index
    %c0_26 = arith.constant 0 : index
    %c0_27 = arith.constant 0 : index
    %50 = vector.load %arg9[%c0_25, %c0_26, %c0_27] : memref<1x128x128xf32, #tpu.memory_space<vmem>>, vector<1x128x128xf32>
    %51 = vector.shape_cast %50 : vector<1x128x128xf32> to vector<128x128xf32>
    %52 = arith.addf %51, %44 : vector<128x128xf32>
    %c0_28 = arith.constant 0 : index
    %c0_29 = arith.constant 0 : index
    %c0_30 = arith.constant 0 : index
    %53 = vector.load %arg9[%c0_28, %c0_29, %c0_30] : memref<1x128x128xf32, #tpu.memory_space<vmem>>, vector<1x128x128xf32>
    %54 = vector.shape_cast %53 : vector<1x128x128xf32> to vector<128x128xf32>
    %55 = vector.shape_cast %52 : vector<128x128xf32> to vector<1x128x128xf32>
    tpu.vector_store %arg9[%c0_28, %c0_29, %c0_30], %55 {strides = array<i32>} : memref<1x128x128xf32, #tpu.memory_space<vmem>>, vector<1x128x128xf32>,
    return
  }
  func.func @transform_0(%arg0: i32, %arg1: i32) -> i32 {
    %c0_i32 = arith.constant 0 : i32
    %c0_i32_0 = arith.constant 0 : i32
    return %c0_i32 : i32
  }
  func.func @transform_1(%arg0: i32, %arg1: i32) -> i32 {
    %c0_i32 = arith.constant 0 : i32
    %c0_i32_0 = arith.constant 0 : i32
    return %c0_i32 : i32
  }
  func.func @transform_2(%arg0: i32, %arg1: i32) -> (i32, i32, i32) {
    %c0_i32 = arith.constant 0 : i32
    %c0_i32_0 = arith.constant 0 : i32
    %c0_i32_1 = arith.constant 0 : i32
    return %arg0, %c0_i32, %c0_i32_0 : i32, i32, i32
  }
  func.func @transform_3(%arg0: i32, %arg1: i32) -> (i32, i32, i32) {
    %c0_i32 = arith.constant 0 : i32
    %c0_i32_0 = arith.constant 0 : i32
    %c0_i32_1 = arith.constant 0 : i32
    return %arg0, %c0_i32, %c0_i32_0 : i32, i32, i32
  }
  func.func @transform_4(%arg0: i32, %arg1: i32) -> (i32, i32, i32) {
    %c0_i32 = arith.constant 0 : i32
    %c0_i32_0 = arith.constant 0 : i32
    %c0_i32_1 = arith.constant 0 : i32
    return %arg0, %c0_i32, %c0_i32_0 : i32, i32, i32
  }
  func.func @transform_5(%arg0: i32, %arg1: i32) -> (i32, i32, i32) {
    %c0_i32 = arith.constant 0 : i32
    %c0_i32_0 = arith.constant 0 : i32
    %c0_i32_1 = arith.constant 0 : i32
    return %arg0, %c0_i32, %c0_i32_0 : i32, i32, i32
  }
  func.func @transform_6(%arg0: i32, %arg1: i32) -> (i32, i32, i32) {
    %c0_i32 = arith.constant 0 : i32
    %c0_i32_0 = arith.constant 0 : i32
    %c0_i32_1 = arith.constant 0 : i32
    %c0_i32_2 = arith.constant 0 : i32
    return %c0_i32, %c0_i32_0, %c0_i32_1 : i32, i32, i32
  }
  func.func @transform_7(%arg0: i32, %arg1: i32) -> (i32, i32, i32) {
    %c0_i32 = arith.constant 0 : i32
    %c0_i32_0 = arith.constant 0 : i32
    %c0_i32_1 = arith.constant 0 : i32
    return %arg0, %c0_i32, %c0_i32_0 : i32, i32, i32
  }
}

module attributes {stable_mosaic.version = 11 : i64} {
  func.func @_stack_kernel(%arg0: i32, %arg1: i32, %arg2: memref<2xf32, #tpu.memory_space<smem>>, %arg3: memref<1xf32, #tpu.memory_space<smem>>, %arg4: memref<1x128x128xf32, #tpu.memory_space<vmem>>, %arg5: memref<1x128x128xf32, #tpu.memory_space<vmem>>, %arg6: memref<1x1x128xf32, #tpu.memory_space<vmem>>, %arg7: memref<1x128x128xf32, #tpu.memory_space<vmem>>, %arg8: memref<2x128x128xf32, #tpu.memory_space<vmem>>, %arg9: memref<1x128x128xf32, #tpu.memory_space<vmem>>, %arg10: memref<128x128xf32, #tpu.memory_space<vmem>>, %arg11: memref<128x128xf32, #tpu.memory_space<vmem>>, %arg12: memref<2x128x128xf32, #tpu.memory_space<vmem>>) attributes {dimension_semantics = [#tpu.dimension_semantics<arbitrary>, #tpu.dimension_semantics<arbitrary>], iteration_bounds = array<i64: 2, 2>, scalar_prefetch = 0 : i64, scratch_operands = 3 : i64, tpu.core_type = #tpu.core_type<tc>, window_params = [{transform_indices = @transform_0, window_bounds = array<i64: 2>}, {transform_indices = @transform_1, window_bounds = array<i64: 1>}, {transform_indices = @transform_2, window_bounds = array<i64: 1, 128, 128>}, {transform_indices = @transform_3, window_bounds = array<i64: 1, 128, 128>}, {transform_indices = @transform_4, window_bounds = array<i64: 1, 1, 128>}, {transform_indices = @transform_5, window_bounds = array<i64: 1, 128, 128>}, {pipeline_mode = #tpu.pipeline_mode<synchronous>, transform_indices = @transform_6, window_bounds = array<i64: 2, 128, 128>}, {transform_indices = @transform_7, window_bounds = array<i64: 1, 128, 128>}]} {
    %c0_i32 = arith.constant 0 : i32
    %0 = arith.cmpi eq, %arg0, %c0_i32 : i32
    %c0_i32_0 = arith.constant 0 : i32
    %1 = arith.cmpi eq, %arg1, %c0_i32_0 : i32
    %2 = arith.andi %0, %1 : i1
    %3 = arith.extui %2 : i1 to i32
    %c0_i32_1 = arith.constant 0 : i32
    %4 = arith.cmpi ne, %3, %c0_i32_1 : i32
    scf.if %4 {
      %cst_31 = arith.constant 0.000000e+00 : f32
      %56 = vector.broadcast %cst_31 : f32 to vector<2x128x128xf32>
      %c0_32 = arith.constant 0 : index
      %c0_33 = arith.constant 0 : index
      %c0_34 = arith.constant 0 : index
      %57 = vector.load %arg12[%c0_32, %c0_33, %c0_34] : memref<2x128x128xf32, #tpu.memory_space<vmem>>, vector<2x128x128xf32>
      tpu.vector_store %arg12[%c0_32, %c0_33, %c0_34], %56 {strides = array<i32>} : memref<2x128x128xf32, #tpu.memory_space<vmem>>, vector<2x128x128xf32>,
    } else {
    }
    %c0_i32_2 = arith.constant 0 : i32
    %5 = arith.cmpi eq, %arg1, %c0_i32_2 : i32
    %6 = arith.extui %5 : i1 to i32
    %c0_i32_3 = arith.constant 0 : i32
    %7 = arith.cmpi ne, %6, %c0_i32_3 : i32
    scf.if %7 {
      %c0_31 = arith.constant 0 : index
      %c0_32 = arith.constant 0 : index
      %c0_33 = arith.constant 0 : index
      %56 = vector.load %arg4[%c0_31, %c0_32, %c0_33] : memref<1x128x128xf32, #tpu.memory_space<vmem>>, vector<1x128x128xf32>
      %57 = vector.shape_cast %56 : vector<1x128x128xf32> to vector<128x128xf32>
      %c0_34 = arith.constant 0 : index
      %c0_35 = arith.constant 0 : index
      %c0_36 = arith.constant 0 : index
      %58 = vector.load %arg5[%c0_34, %c0_35, %c0_36] : memref<1x128x128xf32, #tpu.memory_space<vmem>>, vector<1x128x128xf32>
      %59 = vector.shape_cast %58 : vector<1x128x128xf32> to vector<128x128xf32>
      %cst_37 = arith.constant dense<0.000000e+00> : vector<128x128xf32>
      %60 = tpu.matmul %57, %59, %cst_37 {dimension_numbers = #tpu.dot_dimension_numbers<[1], [0], [0], [1], [0, 0, 1, 1], [], []>} : vector<128x128xf32>, vector<128x128xf32>, vector<128x128xf32> -> vector<128x128xf32>
      %c0_38 = arith.constant 0 : index
      %c0_39 = arith.constant 0 : index
      %c0_40 = arith.constant 0 : index
      %61 = vector.load %arg6[%c0_38, %c0_39, %c0_40] : memref<1x1x128xf32, #tpu.memory_space<vmem>>, vector<1x1x128xf32>
      %62 = vector.shape_cast %61 : vector<1x1x128xf32> to vector<1x128xf32>
      %63 = vector.broadcast %62 : vector<1x128xf32> to vector<128x128xf32>
      %64 = arith.addf %60, %63 : vector<128x128xf32>
      %cst_41 = arith.constant 0.000000e+00 : f32
      %65 = vector.broadcast %cst_41 : f32 to vector<128x128xf32>
      %66 = arith.maximumf %64, %65 : vector<128x128xf32>
      %c0_42 = arith.constant 0 : index
      %c0_43 = arith.constant 0 : index
      %67 = vector.load %arg10[%c0_42, %c0_43] : memref<128x128xf32, #tpu.memory_space<vmem>>, vector<128x128xf32>
      tpu.vector_store %arg10[%c0_42, %c0_43], %66 {strides = array<i32>} : memref<128x128xf32, #tpu.memory_space<vmem>>, vector<128x128xf32>,
      %c0_44 = arith.constant 0 : index
      %c0_45 = arith.constant 0 : index
      %68 = vector.load %arg11[%c0_44, %c0_45] : memref<128x128xf32, #tpu.memory_space<vmem>>, vector<128x128xf32>
      tpu.vector_store %arg11[%c0_44, %c0_45], %66 {strides = array<i32>} : memref<128x128xf32, #tpu.memory_space<vmem>>, vector<128x128xf32>,
      %cst_46 = arith.constant 0.000000e+00 : f32
      %69 = vector.broadcast %cst_46 : f32 to vector<128x128xf32>
      %c0_47 = arith.constant 0 : index
      %c0_48 = arith.constant 0 : index
      %c0_49 = arith.constant 0 : index
      %70 = vector.load %arg9[%c0_47, %c0_48, %c0_49] : memref<1x128x128xf32, #tpu.memory_space<vmem>>, vector<1x128x128xf32>
      %71 = vector.shape_cast %70 : vector<1x128x128xf32> to vector<128x128xf32>
      %72 = vector.shape_cast %69 : vector<128x128xf32> to vector<1x128x128xf32>
      tpu.vector_store %arg9[%c0_47, %c0_48, %c0_49], %72 {strides = array<i32>} : memref<1x128x128xf32, #tpu.memory_space<vmem>>, vector<1x128x128xf32>,
    } else {
    }
    %c0 = arith.constant 0 : index
    %c0_4 = arith.constant 0 : index
    %8 = vector.load %arg11[%c0, %c0_4] : memref<128x128xf32, #tpu.memory_space<vmem>>, vector<128x128xf32>
    %c0_5 = arith.constant 0 : index
    %9 = memref.load %arg3[%c0_5] : memref<1xf32, #tpu.memory_space<smem>>
    %10 = vector.broadcast %9 : f32 to vector<128x128xf32>
    %11 = arith.mulf %10, %8 : vector<128x128xf32>
    %cst = arith.constant 1.000000e+00 : f32
    %12 = arith.subf %cst, %9 : f32
    %13 = arith.index_cast %arg1 : i32 to index
    %c0_6 = arith.constant 0 : index
    %c0_7 = arith.constant 0 : index
    %14 = vector.load %arg12[%13, %c0_6, %c0_7] : memref<2x128x128xf32, #tpu.memory_space<vmem>>, vector<1x128x128xf32>
    %15 = vector.shape_cast %14 : vector<1x128x128xf32> to vector<128x128xf32>
    %16 = vector.broadcast %12 : f32 to vector<128x128xf32>
    %17 = arith.mulf %16, %15 : vector<128x128xf32>
    %18 = arith.addf %11, %17 : vector<128x128xf32>
    %c1_i32 = arith.constant 1 : i32
    %19 = arith.cmpi sge, %arg0, %c1_i32 : i32
    %20 = arith.select %19, %18, %8 : vector<128x128xf32>
    %c0_8 = arith.constant 0 : index
    %c0_9 = arith.constant 0 : index
    %c0_10 = arith.constant 0 : index
    %21 = vector.load %arg7[%c0_8, %c0_9, %c0_10] : memref<1x128x128xf32, #tpu.memory_space<vmem>>, vector<1x128x128xf32>
    %22 = vector.shape_cast %21 : vector<1x128x128xf32> to vector<128x128xf32>
    %cst_11 = arith.constant dense<0.000000e+00> : vector<128x128xf32>
    %23 = tpu.matmul %22, %20, %cst_11 {dimension_numbers = #tpu.dot_dimension_numbers<[1], [0], [0], [1], [0, 0, 1, 1], [], []>} : vector<128x128xf32>, vector<128x128xf32>, vector<128x128xf32> -> vector<128x128xf32>
    %cst_12 = arith.constant 0.899999976 : f32
    %24 = vector.broadcast %cst_12 : f32 to vector<128x128xf32>
    %25 = arith.mulf %24, %23 : vector<128x128xf32>
    %c0_13 = arith.constant 0 : index
    %c0_14 = arith.constant 0 : index
    %26 = vector.load %arg10[%c0_13, %c0_14] : memref<128x128xf32, #tpu.memory_space<vmem>>, vector<128x128xf32>
    %cst_15 = arith.constant 1.000000e-01 : f32
    %27 = vector.broadcast %cst_15 : f32 to vector<128x128xf32>
    %28 = arith.mulf %27, %26 : vector<128x128xf32>
    %29 = arith.addf %25, %28 : vector<128x128xf32>
    %30 = arith.index_cast %arg1 : i32 to index
    %31 = memref.load %arg2[%30] : memref<2xf32, #tpu.memory_space<smem>>
    %32 = arith.index_cast %arg1 : i32 to index
    %c0_16 = arith.constant 0 : index
    %c0_17 = arith.constant 0 : index
    %33 = vector.load %arg8[%32, %c0_16, %c0_17] : memref<2x128x128xf32, #tpu.memory_space<vmem>>, vector<1x128x128xf32>
    %34 = vector.shape_cast %33 : vector<1x128x128xf32> to vector<128x128xf32>
    %cst_18 = arith.constant dense<0.000000e+00> : vector<128x128xf32>
    %35 = tpu.matmul %29, %34, %cst_18 {dimension_numbers = #tpu.dot_dimension_numbers<[1], [0], [0], [1], [0, 0, 1, 1], [], []>} : vector<128x128xf32>, vector<128x128xf32>, vector<128x128xf32> -> vector<128x128xf32>
    %36 = vector.broadcast %31 : f32 to vector<128x128xf32>
    %37 = arith.mulf %36, %35 : vector<128x128xf32>
    %cst_19 = arith.constant 1.000000e+00 : f32
    %38 = arith.subf %cst_19, %31 : f32
    %39 = vector.broadcast %38 : f32 to vector<128x128xf32>
    %40 = arith.mulf %39, %29 : vector<128x128xf32>
    %41 = arith.addf %37, %40 : vector<128x128xf32>
    %42 = math.tanh %41 : vector<128x128xf32>
    %cst_20 = arith.constant 0.000000e+00 : f32
    %43 = vector.broadcast %cst_20 : f32 to vector<128x128xf32>
    %44 = arith.maximumf %42, %43 : vector<128x128xf32>
    %c0_21 = arith.constant 0 : index
    %c0_22 = arith.constant 0 : index
    %45 = vector.load %arg11[%c0_21, %c0_22] : memref<128x128xf32, #tpu.memory_space<vmem>>, vector<128x128xf32>
    tpu.vector_store %arg11[%c0_21, %c0_22], %44 {strides = array<i32>} : memref<128x128xf32, #tpu.memory_space<vmem>>, vector<128x128xf32>,
    %46 = arith.index_cast %arg1 : i32 to index
    %c0_23 = arith.constant 0 : index
    %c0_24 = arith.constant 0 : index
    %47 = vector.load %arg12[%46, %c0_23, %c0_24] : memref<2x128x128xf32, #tpu.memory_space<vmem>>, vector<1x128x128xf32>
    %48 = vector.shape_cast %47 : vector<1x128x128xf32> to vector<128x128xf32>
    %49 = vector.shape_cast %44 : vector<128x128xf32> to vector<1x128x128xf32>
    tpu.vector_store %arg12[%46, %c0_23, %c0_24], %49 {strides = array<i32>} : memref<2x128x128xf32, #tpu.memory_space<vmem>>, vector<1x128x128xf32>,
    %c0_25 = arith.constant 0 : index
    %c0_26 = arith.constant 0 : index
    %c0_27 = arith.constant 0 : index
    %50 = vector.load %arg9[%c0_25, %c0_26, %c0_27] : memref<1x128x128xf32, #tpu.memory_space<vmem>>, vector<1x128x128xf32>
    %51 = vector.shape_cast %50 : vector<1x128x128xf32> to vector<128x128xf32>
    %52 = arith.addf %51, %44 : vector<128x128xf32>
    %c0_28 = arith.constant 0 : index
    %c0_29 = arith.constant 0 : index
    %c0_30 = arith.constant 0 : index
    %53 = vector.load %arg9[%c0_28, %c0_29, %c0_30] : memref<1x128x128xf32, #tpu.memory_space<vmem>>, vector<1x128x128xf32>
    %54 = vector.shape_cast %53 : vector<1x128x128xf32> to vector<128x128xf32>
    %55 = vector.shape_cast %52 : vector<128x128xf32> to vector<1x128x128xf32>
    tpu.vector_store %arg9[%c0_28, %c0_29, %c0_30], %55 {strides = array<i32>} : memref<1x128x128xf32, #tpu.memory_space<vmem>>, vector<1x128x128xf32>,
    return
  }
  func.func @transform_0(%arg0: i32, %arg1: i32) -> i32 {
    %c0_i32 = arith.constant 0 : i32
    %c0_i32_0 = arith.constant 0 : i32
    return %c0_i32 : i32
  }
  func.func @transform_1(%arg0: i32, %arg1: i32) -> i32 {
    %c0_i32 = arith.constant 0 : i32
    %c0_i32_0 = arith.constant 0 : i32
    return %c0_i32 : i32
  }
  func.func @transform_2(%arg0: i32, %arg1: i32) -> (i32, i32, i32) {
    %c0_i32 = arith.constant 0 : i32
    %c0_i32_0 = arith.constant 0 : i32
    %c0_i32_1 = arith.constant 0 : i32
    return %arg0, %c0_i32, %c0_i32_0 : i32, i32, i32
  }
  func.func @transform_3(%arg0: i32, %arg1: i32) -> (i32, i32, i32) {
    %c0_i32 = arith.constant 0 : i32
    %c0_i32_0 = arith.constant 0 : i32
    %c0_i32_1 = arith.constant 0 : i32
    return %arg0, %c0_i32, %c0_i32_0 : i32, i32, i32
  }
  func.func @transform_4(%arg0: i32, %arg1: i32) -> (i32, i32, i32) {
    %c0_i32 = arith.constant 0 : i32
    %c0_i32_0 = arith.constant 0 : i32
    %c0_i32_1 = arith.constant 0 : i32
    return %arg0, %c0_i32, %c0_i32_0 : i32, i32, i32
  }
  func.func @transform_5(%arg0: i32, %arg1: i32) -> (i32, i32, i32) {
    %c0_i32 = arith.constant 0 : i32
    %c0_i32_0 = arith.constant 0 : i32
    %c0_i32_1 = arith.constant 0 : i32
    return %arg0, %c0_i32, %c0_i32_0 : i32, i32, i32
  }
  func.func @transform_6(%arg0: i32, %arg1: i32) -> (i32, i32, i32) {
    %c0_i32 = arith.constant 0 : i32
    %c0_i32_0 = arith.constant 0 : i32
    %c0_i32_1 = arith.constant 0 : i32
    %c0_i32_2 = arith.constant 0 : i32
    return %c0_i32, %c0_i32_0, %c0_i32_1 : i32, i32, i32
  }
  func.func @transform_7(%arg0: i32, %arg1: i32) -> (i32, i32, i32) {
    %c0_i32 = arith.constant 0 : i32
    %c0_i32_0 = arith.constant 0 : i32
    %c0_i32_1 = arith.constant 0 : i32
    return %arg0, %c0_i32, %c0_i32_0 : i32, i32, i32
  }
}

</mosaic_0001>

<bundles_post_ra>
// kernel: tpu_custom_call.1
= control target key start
LH: loop header
LB: loop body
LE: loop exit
PB: predicated region body
PF: predicated region fallthrough
CT: control target
= control target key end

     0   :  { %s3126_s0 = inlined_call_operand.vmem [shape: f32[2], index: 0, kind: input, shape index: {}]   ;;  %s3127_s1 = inlined_call_operand.<no memory space> [shape: f32[1], index: 1, kind: input, shape index: {}]   ;;  %s3128_s2 = inlined_call_operand.hbm [shape: f32[2,128,128], index: 2, kind: input, shape index: {}]   ;;  %s3129_s3 = inlined_call_operand.hbm [shape: f32[2,128,128], index: 3, kind: input, shape index: {}]   ;;  %s3130_s4 = inlined_call_operand.vmem [shape: f32[2,1,128], index: 4, kind: input, shape index: {}]   ;;  %s3131_s5 = inlined_call_operand.hbm [shape: f32[2,128,128], index: 5, kind: input, shape index: {}]   ;;  %s3132_s6 = inlined_call_operand.hbm [shape: f32[2,128,128], index: 6, kind: input, shape index: {}]   ;;  %s3133_s7 = inlined_call_operand.hbm [shape: f32[2,128,128], index: 7, kind: output, shape index: {}]  }
   0x1   :  { %3148 = sst [smem:[#allocation28_spill]] %s3126_s0 }
   0x2   :  { %3149 = sst [smem:[#allocation29_spill]] %s3131_s5 }
   0x3   :  { %3150 = sst [smem:[#allocation30_spill]] %s3132_s6 }
   0x4   :  { %12 = sst [smem:[#allocation5]] %s3127_s1 }
   0x5   :  { %13 = vsyncpa [#allocation9], 0 }
   0x6   :  { %14 = vsyncpa [#allocation7], 0 }
   0x7   :  { %16 = vsyncpa [#allocation7 + $0x1], 0 }
   0x8   :  { %17 = vsyncpa [#allocation12], 0 }
   0x9   :  { %19 = vsyncpa [#allocation12 + $0x1], 0 }
   0xa   :  { %20 = vsyncpa [#allocation15], 0 }
   0xb   :  { %21 = vsyncpa [#allocation8], 0 }
   0xc   :  { %23 = vsyncpa [#allocation8 + $0x1], 0  ;;  %s2388_s26 = smov 0   ;;  %s2390_s27 = smov 0  }
   0xd   :  { %s2392_s28 = smov 0   ;;  %s2394_s29 = smov 0  }
   0xe   :  { %s2396_s30 = smov 0   ;;  %s2398_s8 = smov 0  }
   0xf   :  { %s2400_s1 = smov 0   ;;  %s2402_s9 = smov 0  }
  0x10 LB: > { %3151 = sst [smem:[#allocation23_spill]] %s2323_s8  ;;  %s2429_s10 = sadd.s32 4294967295, %s2331_s9   ;;  %s2331_s9 = sphi %s2402_s9, %s29_s9   ;;  %s2327_s1 = sphi %s2400_s1, %s3190_s1   ;;  %s2323_s8 = sphi %s2398_s8, %s3185_s8   ;;  %s2319_s30 = sphi %s2396_s30, %s3184_s30   ;;  %s2315_s29 = sphi %s2394_s29, %s3183_s29   ;;  %s2311_s28 = sphi %s2392_s28, %s3189_s28   ;;  %s2307_s27 = sphi %s2390_s27, %s3188_s27   ;;  %s2303_s26 = sphi %s2388_s26, %s3187_s26  }
  0x11   : > { %3152 = sst [smem:[#allocation24_spill]] %s2327_s1  ;;  %s1529_s11 = sadd.s32 4294967294, %s2331_s9  }
  0x12   : > { %p103_p0 = scmp.ne.s32.totalorder %s2307_s27, %s2303_s26  ;;  %p3136_p1 = scmp.eq.s32.totalorder %s2429_s10, 0 }
  0x13   : > { %p232_p3 = scmp.eq.s32.totalorder %s1529_s11, 3  ;;  %p1530_p5 = scmp.ge.s32.totalorder %s2331_s9, 1 }
  0x14   : > { %p2438_p4 = por %p3136_p1, %p103_p0  ;;  %p239_p7 = scmp.lt.s32.totalorder %s2331_s9, 5 }
  0x15   : > { %p2443_p6 = por %p232_p3, %p103_p0  ;;  %s3134_s14 = sshll.u32 %s2319_s30, 11 }
  0x16   : > { %s3153_s12 = scalar_select %p2438_p4, 1, 0 }
  0x17   : > { %s3154_s13 = scalar_select %p2443_p6, 1, 0 }
  0x18   : > { %p2449_p8 = pnand %p1530_p5, %p239_p7  ;;  %s3156_s5 = sld [smem:[#allocation29_spill]] }
  0x19   : > { %s2333_s19 = smov [#allocation13]   ;;  %s3158_s0 = sld [smem:[#allocation28_spill]] }
  0x1a   : > { %s3155_s15 = scalar_select %p2449_p8, 1, 0 }
  0x1b   : > { %p3135_p9 = pneg %p2449_p8  ;;  %s268_s20 = sshll.u32 %s2333_s19, 4  ;;  %s2462_s20 = int_to_ptr.vmem [resolvable:$true] %s268_s20 }
  0x1d   : > { %p2469_p10 = pnand %p3135_p9, %p2438_p4 }
  0x1e   : > { %s2458_s18 = scalar_lea.hbm %s3156_s5, %s3134_s14  ;;  %s2089_s17 = scalar_lea.hbm %s3156_s5, 4096 }
  0x1f   : > { %s252_s24 = sshll.u32 %s3158_s0, 4  ;;  %s2084_s25 = scalar_lea.hbm %s2458_s18, 2048  ;;  %s253_s24 = int_to_ptr.vmem [resolvable:$true] %s252_s24 }
  0x20   : > { %p2085_p11 = scmp.ne.s32.totalorder %s2458_s18, %s2084_s25  ;;  %p2086_p12 = pneg %p2469_p10 }
  0x21   : > { %p2090_p3 = scmp.lt.u32.totalorder %s2458_s18, %s3156_s5  ;;  %p2091_p5 = scmp.lt.u32.totalorder %s2089_s17, %s2084_s25 }
  0x22   : > { %p2087_p13 = pnand %p2086_p12, %p2085_p11  ;;  %p2093_p2 = scmp.lt.u32.totalorder %s2084_s25, %s2458_s18 }
  0x23   : > { %p2092_p7 = por %p2091_p5, %p2090_p3 }
  0x24   : > { %p2088_p0 = pneg %p2087_p13 }
  0x25   : > { %p2094_p9 = por %p2093_p2, %p2092_p7 }
  0x27   : > { %p2095_p1 = pnand %p2094_p9, %p2088_p0 }
  0x29   : > { %2098 = shalt.err (!%p2095_p1)
}
  0x2a   : > { %s2099_s22 = scalar_lea.vmem %s2462_s20, 2048  ;;  %p2107_p4 = scmp.lt.s32.totalorder %s2462_s20, %s2462_s20 }
  0x2b   : > { %p2100_p11 = scmp.ne.s32.totalorder %s2462_s20, %s2099_s22  ;;  %p2108_p8 = scmp.lt.s32.totalorder %s2099_s22, %s2099_s22 }
  0x2d   : > { %p2102_p13 = pnand %p2100_p11, %p2086_p12  ;;  %p2109_p3 = por %p2108_p8, %p2107_p4 }
  0x2f   : > { %p2103_p6 = pneg %p2102_p13 }
  0x31   : > { %p2110_p5 = pnand %p2109_p3, %p2103_p6 }
  0x33   : > { %2113 = shalt.err (!%p2110_p5)
}
  0x34   : > { %s3141_s14 = smov 128   ;;  %s3143_s23 = smov 8  }
  0x35   : > { %1958 = dma.hbm_to_vmem [thread:$0]  (!%p2469_p10), %s2458_s18, 2048, %s2462_s20, [#allocation12], %s3141_s14, %s3141_s14, %s3143_s23  }
  0x36   : > { %p3159_p1 = scmp.eq.s32.totalorder %s2429_s10, 0  ;;  %p3160_p2 = scmp.ne.s32.totalorder %s3155_s15, 0 }
  0x37   : > { %s2336_s17 = smov [#allocation14]   ;;  %s2114_s19 = scalar_lea.vmem %s253_s24, 16 }
  0x38   : > { %p3161_p4 = pneg %p3160_p2  ;;  %s281_s21 = sshll.u32 %s2336_s17, 4  ;;  %s282_s21 = int_to_ptr.vmem [resolvable:$true] %s281_s21 }
  0x39   : > { %p2115_p8 = scmp.ne.s32.totalorder %s253_s24, %s2114_s19  ;;  %p2122_p0 = scmp.lt.s32.totalorder %s253_s24, %s253_s24 }
  0x3a   : > { %p2514_p6 = pnand %p3161_p4, %p3159_p1  ;;  %p2123_p7 = scmp.lt.s32.totalorder %s2114_s19, %s2114_s19 }
  0x3c   : > { %p2116_p9 = pneg %p2514_p6  ;;  %p2124_p11 = por %p2123_p7, %p2122_p0 }
  0x3e   : > { %p2117_p10 = pnand %p2116_p9, %p2115_p8 }
  0x40   : > { %p2118_p12 = pneg %p2117_p10 }
  0x42   : > { %p2125_p13 = pnand %p2124_p11, %p2118_p12 }
  0x44   : > { %2128 = shalt.err (!%p2125_p13)
}
  0x45   : > { %s2337_s18 = smov [#allocation6]   ;;  %s3163_s6 = sld [smem:[#allocation30_spill]] }
  0x46   : > { %1955 = dma.vmem_to_smem (!%p2514_p6), %s253_s24, 16, %s2337_s18, [#allocation9]  }
  0x4b   : > { %s2129_s25 = scalar_lea.hbm %s3163_s6, 4096 }
  0x4c   : > { %p2130_p3 = scmp.ne.s32.totalorder %s3163_s6, %s2129_s25  ;;  %p2136_p4 = scmp.lt.u32.totalorder %s2129_s25, %s3163_s6 }
  0x4e   : > { %p2132_p5 = pnand %p2130_p3, %p2116_p9 }
  0x50   : > { %p2133_p1 = pneg %p2132_p5 }
  0x52   : > { %p2138_p8 = pnand %p2136_p4, %p2133_p1 }
  0x54   : > { %2141 = shalt.err (!%p2138_p8)
}
  0x55   : > { %s2142_s24 = scalar_lea.vmem %s282_s21, 4096  ;;  %p2150_p7 = scmp.lt.s32.totalorder %s282_s21, %s282_s21 }
  0x56   : > { %p2143_p10 = scmp.ne.s32.totalorder %s282_s21, %s2142_s24  ;;  %p2151_p11 = scmp.lt.s32.totalorder %s2142_s24, %s2142_s24 }
  0x58   : > { %p2145_p12 = pnand %p2143_p10, %p2116_p9  ;;  %p2152_p13 = por %p2151_p11, %p2150_p7 }
  0x5a   : > { %p2146_p0 = pneg %p2145_p12 }
  0x5c   : > { %p2153_p2 = pnand %p2152_p13, %p2146_p0 }
  0x5e   : > { %2156 = shalt.err (!%p2153_p2)
}
  0x5f   : > { %s3164_s18 = smov 128   ;;  %s38_s22 = sadd.s32 1, %s2323_s8 }
  0x60   : > { %1961 = dma.hbm_to_vmem [thread:$0]  (!%p2514_p6), %s3163_s6, 4096, %s282_s21, [#allocation15], %s3164_s18, %s3164_s18, %s3143_s23  }
  0x61   : > { %p39_p2 = scmp.ge.s32.totalorder %s38_s22, 2  ;;  %s41_s16 = sadd.s32 1, %s2327_s1 }
  0x62   : > { %s90_s25 = sadd.s32 1, %s2311_s28  ;;  %p97_p9 = scmp.ne.s32.totalorder %s2311_s28, %s2307_s27 }
  0x63   : > { %s3192_s22 = smov (%p39_p2, %s38_s22), 0  ;;  %s3194_s16 = smov (!%p39_p2, %s41_s16), %s2327_s1 }
  0x64   : > { %3165 = sst [smem:[#allocation25_spill]] %s3192_s22  ;;  %p98_p3 = scmp.eq.s32.totalorder %s2331_s9, 0 }
  0x65   : > { %p3166_p5 = scmp.eq.s32.totalorder %s2429_s10, 3  ;;  %p43_p4 = scmp.ge.s32.totalorder %s3194_s16, 2 }
  0x66   : > { %p1975_p6 = scmp.lt.s32.totalorder %s2331_s9, 4  ;;  %p99_p8 = por %p98_p3, %p97_p9 }
  0x67   : > { %p2559_p1 = por %p3166_p5, %p97_p9  ;;  %s295_s21 = sand.u32 1, %s2311_s28  }
  0x68   : > { %s3196_s16 = smov (%p43_p4, %s3194_s16), 0  ;;  %s1536_s17 = sshll.u32 %s295_s21, 7 }
  0x69   : > { %3168 = sst [smem:[#allocation26_spill]] %s3196_s16  ;;  %s87_s19 = ssub.s32 %s2327_s1, %s3196_s16 }
  0x6a   : > { %p88_p10 = scmp.eq.s32.totalorder %s87_s19, 0  ;;  %s1557_s24 = sshll.u32 %s2327_s1, 11 }
  0x6b   : > { %s2573_s23 = scalar_lea.hbm %s3128_s2, %s1557_s24  ;;  %s299_s0 = scalar_lea.vmem [#allocation10], %s1536_s17 }
  0x6c   : > { %s306_s5 = sshll.u32 %s299_s0, 4  ;;  %p2582_p12 = pnand %p1975_p6, %p99_p8  ;;  %s2578_s5 = int_to_ptr.vmem [resolvable:$true] %s306_s5 }
  0x6d   : > { %s2576_s6 = scalar_select %p88_p10, %s2311_s28, %s90_s25  }
  0x6e   : > { %s2589_s14 = scalar_lea.hbm %s3129_s3, %s1557_s24  ;;  %s320_s20 = scalar_lea.vmem [#allocation11], %s1536_s17 }
  0x6f   : > { %3169 = sst [smem:[#allocation27_spill]] %s2576_s6  ;;  %s2591_s1 = sshll.u32 %s320_s20, 4  ;;  %s2625_s1 = int_to_ptr.vmem [resolvable:$true] %s2591_s1 }
  0x70   : > { %s2593_s0 = scalar_lea.sflag [#allocation7], %s295_s21  ;;  %s2157_s25 = scalar_lea.hbm %s2573_s23, 2048 }
  0x71   : > { %p2158_p0 = scmp.ne.s32.totalorder %s2573_s23, %s2157_s25  ;;  %p2159_p7 = pneg %p2582_p12 }
  0x72   : > { %s2162_s22 = scalar_lea.hbm %s3128_s2, 4096  ;;  %p2163_p2 = scmp.lt.u32.totalorder %s2573_s23, %s3128_s2 }
  0x73   : > { %p2160_p11 = pnand %p2159_p7, %p2158_p0  ;;  %p2164_p9 = scmp.lt.u32.totalorder %s2162_s22, %s2157_s25 }
  0x74   : > { %p2166_p5 = scmp.lt.u32.totalorder %s2157_s25, %s2573_s23 }
  0x75   : > { %p2161_p13 = pneg %p2160_p11  ;;  %p2165_p3 = por %p2164_p9, %p2163_p2 }
  0x77   : > { %p2167_p4 = por %p2166_p5, %p2165_p3 }
  0x79   : > { %p2168_p6 = pnand %p2167_p4, %p2161_p13 }
  0x7b   : > { %2171 = shalt.err (!%p2168_p6)
}
  0x7c   : > { %s2172_s21 = scalar_lea.vmem %s2578_s5, 2048  ;;  %s2338_s6 = smov [#allocation10]  }
  0x7d   : > { %p2173_p8 = scmp.ne.s32.totalorder %s2578_s5, %s2172_s21  ;;  %s2177_s8 = sshll.u32 %s2338_s6, 4  ;;  %s2178_s8 = int_to_ptr.vmem [resolvable:$false] %s2177_s8 }
  0x7e   : > { %s2179_s17 = scalar_lea.vmem %s2178_s8, 4096  ;;  %p2180_p11 = scmp.lt.s32.totalorder %s2578_s5, %s2178_s8 }
  0x7f   : > { %p2175_p10 = pnand %p2173_p8, %p2159_p7  ;;  %p2181_p2 = scmp.lt.s32.totalorder %s2179_s17, %s2172_s21 }
  0x81   : > { %p2176_p0 = pneg %p2175_p10  ;;  %p2182_p9 = por %p2181_p2, %p2180_p11 }
  0x83   : > { %p2183_p3 = pnand %p2182_p9, %p2176_p0 }
  0x85   : > { %2186 = shalt.err (!%p2183_p3)
}
  0x86   : > { %s3171_s20 = smov 8   ;;  %s316_s25 = sand.u32 1, %s2331_s9  }
  0x87   : > { %1965 = dma.hbm_to_vmem [thread:$0]  (!%p2582_p12), %s2573_s23, 2048, %s2578_s5, %s2593_s0, %s3164_s18, %s3164_s18, %s3171_s20  }
  0x88   : > { %s2628_s22 = scalar_lea.sflag [#allocation12], %s316_s25  ;;  %s2187_s19 = scalar_lea.hbm %s2589_s14, 2048 }
  0x89   : > { %p2188_p13 = scmp.ne.s32.totalorder %s2589_s14, %s2187_s19  ;;  %s2192_s6 = scalar_lea.hbm %s3129_s3, 4096 }
  0x8a   : > { %p2193_p6 = scmp.lt.u32.totalorder %s2589_s14, %s3129_s3  ;;  %p2194_p8 = scmp.lt.u32.totalorder %s2192_s6, %s2187_s19 }
  0x8b   : > { %p2190_p5 = pnand %p2188_p13, %p2159_p7  ;;  %p2196_p0 = scmp.lt.u32.totalorder %s2187_s19, %s2589_s14 }
  0x8c   : > { %p2195_p10 = por %p2194_p8, %p2193_p6 }
  0x8d   : > { %p2191_p4 = pneg %p2190_p5 }
  0x8e   : > { %p2197_p11 = por %p2196_p0, %p2195_p10 }
  0x90   : > { %p2198_p2 = pnand %p2197_p11, %p2191_p4 }
  0x92   : > { %2201 = shalt.err (!%p2198_p2)
}
  0x93   : > { %s2202_s5 = scalar_lea.vmem %s2625_s1, 2048  ;;  %s2339_s23 = smov [#allocation11]  }
  0x94   : > { %p2203_p9 = scmp.ne.s32.totalorder %s2625_s1, %s2202_s5  ;;  %s2207_s0 = sshll.u32 %s2339_s23, 4  ;;  %s2208_s0 = int_to_ptr.vmem [resolvable:$false] %s2207_s0 }
  0x95   : > { %s2209_s25 = scalar_lea.vmem %s2208_s0, 4096  ;;  %p2210_p5 = scmp.lt.s32.totalorder %s2625_s1, %s2208_s0 }
  0x96   : > { %p2205_p3 = pnand %p2203_p9, %p2159_p7  ;;  %p2211_p6 = scmp.lt.s32.totalorder %s2209_s25, %s2202_s5 }
  0x98   : > { %p2206_p13 = pneg %p2205_p3  ;;  %p2212_p8 = por %p2211_p6, %p2210_p5 }
  0x9a   : > { %p2213_p10 = pnand %p2212_p8, %p2206_p13 }
  0x9c   : > { %2216 = shalt.err (!%p2213_p10)
}
  0x9d   : > { %1968 = dma.hbm_to_vmem [thread:$0]  (!%p2582_p12), %s2589_s14, 2048, %s2625_s1, %s2628_s22, %s3164_s18, %s3164_s18, %s3171_s20  }
  0x9e   : > { %p3172_p7 = scmp.ne.s32.totalorder %s3155_s15, 0 }
  0x9f   : > { %p3173_p4 = scmp.eq.s32.totalorder (!%p3172_p7), %s2429_s10, 0 }
  0xa0   : > { %345 = sbr.rel (%p3172_p7) target bundleno = 1012 (0x3f4), region = 48 }
  0xa7   : > { %2278 = dma.done.wait (%p3173_p4), [#allocation9], 16   ;;  %p3174_p0 = pmov %p3173_p4 }
  0xa8   : > { %s2664_s19 = sand.u32 1, %s2307_s27   ;;  %p3175_p12 = scmp.ne.s32.totalorder %s3153_s12, 0 }
  0xa9   : > { %2280 = vsyncadd (%p3174_p0), [#allocation9], 4294967280  ;;  %s1544_s16 = sshll.u32 %s2664_s19, 7  ;;  %s352_s24 = scalar_lea.sflag [#allocation7], %s2664_s19 }
  0xaa   : > { %s2668_s21 = scalar_lea.vmem [#allocation10], %s1544_s16 }
  0xab   : > { %2282 = dma.done.wait (%p3175_p12), %s352_s24, 2048  }
  0xac   : > { %2284 = vsyncadd (%p3175_p12), %s352_s24, 4294965248  ;;  %s360_s1 = sand.u32 1, %s2429_s10   ;;  %s2675_s18 = scalar_lea.vmem [#allocation11], %s1544_s16 }
  0xad   : > { %s361_s15 = scalar_lea.sflag [#allocation12], %s360_s1 }
  0xae   : > { %2286 = dma.done.wait (%p3175_p12), %s361_s15, 2048  }
  0xaf   : > { %2288 = vsyncadd (%p3175_p12), %s361_s15, 4294965248 }
  0xb0   : > { %2290 = dma.done.wait (%p3175_p12), [#allocation12], 2048  }
  0xb1   : > { %2292 = vsyncadd (%p3175_p12), [#allocation12], 4294965248  ;;  %p3176_p11 = pmov %p3174_p0 }
  0xb2   : > { %p3177_p2 = pmov %p3174_p0 }
  0xb3   : > { %2294 = dma.done.wait (%p3176_p11), [#allocation15], 4096  }
  0xb4   : > { %2296 = vsyncadd (%p3177_p2), [#allocation15], 4294963200 }
  0xb5   : > { %377 = sfence }
  0xb6   : > { %p412_p9 = scmp.lt.s32.totalorder %s2319_s30, 1  ;;  %p415_p3 = scmp.eq.s32.totalorder %s2319_s30, 0 }
  0xb7   : > { %p416_p13 = scmp.eq.s32.totalorder %s2315_s29, 0  ;;  %s2699_s6 = scalar_lea.vmem [#allocation16], %s1544_s16 }
  0xb8   : > { %s2693_s14 = scalar_select %p412_p9, %s2319_s30, 1 }
  0xb9   : > { %p417_p5 = pnand %p416_p13, %p415_p3 }
  0xba   : > { %s414_s22 = scalar_lea.vmem %s3130_s4, %s2693_s14  ;;  %v2340_v0 = vmov (!%p417_p5), 0.0  }
  0xbb   : > { %420 = sbr.rel (%p417_p5) target bundleno = 203 (0xcb), region = 72  ;;  %421 = vst [vmem:[#allocation4] sm:$0xff] (!%p417_p5), %v2340_v0  ;;  %422 = vst [vmem:[#allocation4 + $0x8] sm:$0xff] (!%p417_p5), %v2340_v0 }
  0xbc   : > { %423 = vst [vmem:[#allocation4 + $0x10] sm:$0xff] (!%p417_p5), %v2340_v0  ;;  %424 = vst [vmem:[#allocation4 + $0x18] sm:$0xff] (!%p417_p5), %v2340_v0 }
  0xbd   : > { %425 = vst [vmem:[#allocation4 + $0x20] sm:$0xff] (!%p417_p5), %v2340_v0  ;;  %426 = vst [vmem:[#allocation4 + $0x28] sm:$0xff] (!%p417_p5), %v2340_v0 }
  0xbe   : > { %427 = vst [vmem:[#allocation4 + $0x30] sm:$0xff] (!%p417_p5), %v2340_v0  ;;  %428 = vst [vmem:[#allocation4 + $0x38] sm:$0xff] (!%p417_p5), %v2340_v0 }
  0xbf   : > { %429 = vst [vmem:[#allocation4 + $0x40] sm:$0xff] (!%p417_p5), %v2340_v0  ;;  %430 = vst [vmem:[#allocation4 + $0x48] sm:$0xff] (!%p417_p5), %v2340_v0 }
  0xc0   : > { %431 = vst [vmem:[#allocation4 + $0x50] sm:$0xff] (!%p417_p5), %v2340_v0  ;;  %432 = vst [vmem:[#allocation4 + $0x58] sm:$0xff] (!%p417_p5), %v2340_v0 }
  0xc1   : > { %433 = vst [vmem:[#allocation4 + $0x60] sm:$0xff] (!%p417_p5), %v2340_v0  ;;  %434 = vst [vmem:[#allocation4 + $0x68] sm:$0xff] (!%p417_p5), %v2340_v0 }
  0xc2   : > { %435 = vst [vmem:[#allocation4 + $0x70] sm:$0xff] %v2340_v0  ;;  %436 = vst [vmem:[#allocation4 + $0x78] sm:$0xff] %v2340_v0 }
  0xc3   : > { %437 = vst [vmem:[#allocation4 + $0x80] sm:$0xff] %v2340_v0  ;;  %438 = vst [vmem:[#allocation4 + $0x88] sm:$0xff] %v2340_v0 }
  0xc4   : > { %439 = vst [vmem:[#allocation4 + $0x90] sm:$0xff] %v2340_v0  ;;  %440 = vst [vmem:[#allocation4 + $0x98] sm:$0xff] %v2340_v0 }
  0xc5   : > { %441 = vst [vmem:[#allocation4 + $0xa0] sm:$0xff] %v2340_v0  ;;  %442 = vst [vmem:[#allocation4 + $0xa8] sm:$0xff] %v2340_v0 }
  0xc6   : > { %443 = vst [vmem:[#allocation4 + $0xb0] sm:$0xff] %v2340_v0  ;;  %444 = vst [vmem:[#allocation4 + $0xb8] sm:$0xff] %v2340_v0 }
  0xc7   : > { %445 = vst [vmem:[#allocation4 + $0xc0] sm:$0xff] %v2340_v0  ;;  %446 = vst [vmem:[#allocation4 + $0xc8] sm:$0xff] %v2340_v0 }
  0xc8   : > { %447 = vst [vmem:[#allocation4 + $0xd0] sm:$0xff] %v2340_v0  ;;  %448 = vst [vmem:[#allocation4 + $0xd8] sm:$0xff] %v2340_v0 }
  0xc9   : > { %449 = vst [vmem:[#allocation4 + $0xe0] sm:$0xff] %v2340_v0  ;;  %450 = vst [vmem:[#allocation4 + $0xe8] sm:$0xff] %v2340_v0 }
  0xca   : > { %451 = vst [vmem:[#allocation4 + $0xf0] sm:$0xff] %v2340_v0  ;;  %452 = vst [vmem:[#allocation4 + $0xf8] sm:$0xff] %v2340_v0 }
  0xcb PF: > { %p1548_p6 = scmp.ne.s32.totalorder %s2315_s29, 0 }
  0xcc   : > { %v472_v1 = vld [vmem:[%s2675_s18] sm:$0xff] (!%p1548_p6)  ;;  %v473_v2 = vld [vmem:[%s2675_s18 + $0x8] sm:$0xff] (!%p1548_p6)  ;;  %v474_v3 = vld [vmem:[%s2675_s18 + $0x10] sm:$0xff] (!%p1548_p6)  ;;  %v2341_v41 = vmov (!%p1548_p6), 0.0  }
  0xcd   : > { %455 = sbr.rel (%p1548_p6) target bundleno = 471 (0x1d7), region = 76  ;;  %v1824_v4 = vpack.c.bf16 (!%p1548_p6), %v473_v2, %v472_v1  ;;  %v475_v5 = vld [vmem:[%s2675_s18 + $0x18] sm:$0xff] (!%p1548_p6)  ;;  %v476_v7 = vld [vmem:[%s2675_s18 + $0x20] sm:$0xff] (!%p1548_p6)  ;;  %v477_v8 = vld [vmem:[%s2675_s18 + $0x28] sm:$0xff] (!%p1548_p6)  ;;  %688 = vst [vmem:[%s2699_s6] sm:$0xff] (!%p1548_p6), %v2341_v41 }
  0xce   : > { %v1828_v6 = vpack.c.bf16 (!%p1548_p6), %v475_v5, %v474_v3  ;;  %v1832_v9 = vpack.c.bf16 (!%p1548_p6), %v477_v8, %v476_v7  ;;  %v456_v10 = vld [vmem:[%s2668_s21] sm:$0xff] (!%p1548_p6)  ;;  %v478_v12 = vld [vmem:[%s2675_s18 + $0x30] sm:$0xff] (!%p1548_p6)  ;;  %v479_v13 = vld [vmem:[%s2675_s18 + $0x38] sm:$0xff] (!%p1548_p6)  ;;  %689 = vst [vmem:[%s2699_s6 + $0x8] sm:$0xff] (!%p1548_p6), %v2341_v41 }
  0xcf   : > { %1825 = vmatprep.subr.bf16.mxu0 (!%p1548_p6), %v1824_v4  ;;  %1920 = vmatprep.subr.bf16.mxu1 (!%p1548_p6), %v1824_v4  ;;  %v464_v11 = vld [vmem:[%s2668_s21 + $0x40] sm:$0xff] (!%p1548_p6)  ;;  %v1836_v14 = vpack.c.bf16 (!%p1548_p6), %v479_v13, %v478_v12  ;;  %v481_v16 = vld [vmem:[%s2675_s18 + $0x48] sm:$0xff] (!%p1548_p6)  ;;  %v482_v18 = vld [vmem:[%s2675_s18 + $0x50] sm:$0xff] (!%p1548_p6)  ;;  %690 = vst [vmem:[%s2699_s6 + $0x10] sm:$0xff] (!%p1548_p6), %v2341_v41 }
  0xd0   : > { %1827 = vmatpush3.bf16.msra.mxu0 (!%p1548_p6), %v1824_v4  ;;  %1928 = vmatpush3.bf16.msra.mxu1 (!%p1548_p6), %v1824_v4  ;;  %v480_v15 = vld [vmem:[%s2675_s18 + $0x40] sm:$0xff] (!%p1548_p6)  ;;  %v483_v19 = vld [vmem:[%s2675_s18 + $0x58] sm:$0xff] (!%p1548_p6)  ;;  %v485_v22 = vld [vmem:[%s2675_s18 + $0x68] sm:$0xff] (!%p1548_p6)  ;;  %691 = vst [vmem:[%s2699_s6 + $0x18] sm:$0xff] (!%p1548_p6), %v2341_v41 }
  0xd1   : > { %1829 = vmatprep.subr.bf16.mxu0 (!%p1548_p6), %v1828_v6  ;;  %1921 = vmatprep.subr.bf16.mxu1 (!%p1548_p6), %v1828_v6  ;;  %v1840_v17 = vpack.c.bf16 (!%p1548_p6), %v481_v16, %v480_v15  ;;  %v1844_v20 = vpack.c.bf16 (!%p1548_p6), %v483_v19, %v482_v18  ;;  %v484_v21 = vld [vmem:[%s2675_s18 + $0x60] sm:$0xff] (!%p1548_p6)  ;;  %v486_v24 = vld [vmem:[%s2675_s18 + $0x70] sm:$0xff] (!%p1548_p6)  ;;  %v487_v25 = vld [vmem:[%s2675_s18 + $0x78] sm:$0xff] (!%p1548_p6)  ;;  %692 = vst [vmem:[%s2699_s6 + $0x20] sm:$0xff] (!%p1548_p6), %v2341_v41 }
  0xd2   : > { %1688 = vmatprep.mubr.f32.mxu0 (!%p1548_p6), %v456_v10  ;;  %1700 = vmatprep.mubr.f32.mxu1 (!%p1548_p6), %v464_v11  ;;  %v1848_v23 = vpack.c.bf16 (!%p1548_p6), %v485_v22, %v484_v21  ;;  %v1852_v26 = vpack.c.bf16 (!%p1548_p6), %v487_v25, %v486_v24  ;;  %v457_v27 = vld [vmem:[%s2668_s21 + $0x8] sm:$0xff] (!%p1548_p6)  ;;  %v458_v29 = vld [vmem:[%s2668_s21 + $0x10] sm:$0xff] (!%p1548_p6)  ;;  %v459_v31 = vld [vmem:[%s2668_s21 + $0x18] sm:$0xff] (!%p1548_p6)  ;;  %693 = vst [vmem:[%s2699_s6 + $0x28] sm:$0xff] (!%p1548_p6), %v2341_v41 }
  0xd3   : > { %v465_v28 = vld [vmem:[%s2668_s21 + $0x48] sm:$0xff] (!%p1548_p6)  ;;  %v466_v30 = vld [vmem:[%s2668_s21 + $0x50] sm:$0xff] (!%p1548_p6)  ;;  %v467_v32 = vld [vmem:[%s2668_s21 + $0x58] sm:$0xff] (!%p1548_p6)  ;;  %694 = vst [vmem:[%s2699_s6 + $0x30] sm:$0xff] (!%p1548_p6), %v2341_v41 }
  0xd4   : > { %1831 = vmatpush3.bf16.msra.mxu0 %v1828_v6  ;;  %1929 = vmatpush3.bf16.msra.mxu1 %v1828_v6  ;;  %v460_v33 = vld [vmem:[%s2668_s21 + $0x20] sm:$0xff]  ;;  %v461_v35 = vld [vmem:[%s2668_s21 + $0x28] sm:$0xff]  ;;  %v462_v37 = vld [vmem:[%s2668_s21 + $0x30] sm:$0xff]  ;;  %695 = vst [vmem:[%s2699_s6 + $0x38] sm:$0xff] %v2341_v41 }
  0xd5   : > { %1833 = vmatprep.subr.bf16.mxu0 %v1832_v9  ;;  %1922 = vmatprep.subr.bf16.mxu1 %v1832_v9  ;;  %v468_v34 = vld [vmem:[%s2668_s21 + $0x60] sm:$0xff]  ;;  %v469_v36 = vld [vmem:[%s2668_s21 + $0x68] sm:$0xff]  ;;  %v470_v38 = vld [vmem:[%s2668_s21 + $0x70] sm:$0xff]  ;;  %696 = vst [vmem:[%s2699_s6 + $0x40] sm:$0xff] %v2341_v41 }
  0xd6   : > { %v463_v39 = vld [vmem:[%s2668_s21 + $0x38] sm:$0xff]  ;;  %697 = vst [vmem:[%s2699_s6 + $0x48] sm:$0xff] %v2341_v41  ;;  %698 = vst [vmem:[%s2699_s6 + $0x50] sm:$0xff] %v2341_v41  ;;  %v2755_v42 = vld [vmem:[%s414_s22] ss:$0 sm:$0xff] }
  0xd7   : > { %v471_v40 = vld [vmem:[%s2668_s21 + $0x78] sm:$0xff]  ;;  %699 = vst [vmem:[%s2699_s6 + $0x58] sm:$0xff] %v2341_v41  ;;  %700 = vst [vmem:[%s2699_s6 + $0x60] sm:$0xff] %v2341_v41 }
  0xd8   : > { %1835 = vmatpush3.bf16.msra.mxu0 %v1832_v9  ;;  %1930 = vmatpush3.bf16.msra.mxu1 %v1832_v9  ;;  %701 = vst [vmem:[%s2699_s6 + $0x68] sm:$0xff] %v2341_v41  ;;  %702 = vst [vmem:[%s2699_s6 + $0x70] sm:$0xff] %v2341_v41 }
  0xd9   : > { %1837 = vmatprep.subr.bf16.mxu0 %v1836_v14  ;;  %1923 = vmatprep.subr.bf16.mxu1 %v1836_v14  ;;  %703 = vst [vmem:[%s2699_s6 + $0x78] sm:$0xff] %v2341_v41 }
  0xdc   : > { %1839 = vmatpush3.bf16.msra.mxu0 %v1836_v14  ;;  %1931 = vmatpush3.bf16.msra.mxu1 %v1836_v14 }
  0xdd   : > { %1841 = vmatprep.subr.bf16.mxu0 %v1840_v17  ;;  %1924 = vmatprep.subr.bf16.mxu1 %v1840_v17 }
  0xe0   : > { %1843 = vmatpush3.bf16.msra.mxu0 %v1840_v17  ;;  %1932 = vmatpush3.bf16.msra.mxu1 %v1840_v17 }
  0xe1   : > { %1845 = vmatprep.subr.bf16.mxu0 %v1844_v20  ;;  %1925 = vmatprep.subr.bf16.mxu1 %v1844_v20 }
  0xe4   : > { %1847 = vmatpush3.bf16.msra.mxu0 %v1844_v20  ;;  %1933 = vmatpush3.bf16.msra.mxu1 %v1844_v20 }
  0xe5   : > { %1849 = vmatprep.subr.bf16.mxu0 %v1848_v23  ;;  %1926 = vmatprep.subr.bf16.mxu1 %v1848_v23 }
  0xe8   : > { %1851 = vmatpush3.bf16.msra.mxu0 %v1848_v23  ;;  %1934 = vmatpush3.bf16.msra.mxu1 %v1848_v23 }
  0xe9   : > { %1853 = vmatprep.subr.bf16.mxu0 %v1852_v26  ;;  %1927 = vmatprep.subr.bf16.mxu1 %v1852_v26 }
  0xec   : > { %1855 = vmatpush3.bf16.msra.mxu0 %v1852_v26  ;;  %1935 = vmatpush3.bf16.msra.mxu1 %v1852_v26 }
  0xef   : > { %1689 = vmatmul.mubr.f32.vlgmr.msra.gmra.mrb[0].mxu0 %v457_v27  ;;  %1701 = vmatmul.mubr.f32.vlgmr.msra.gmra.mrb[0].mxu1 %v465_v28 }
  0xf0   : > { %1691 = vmatprep.mubr.f32.mxu0 %v458_v29  ;;  %1703 = vmatprep.mubr.f32.mxu1 %v466_v30 }
  0xf3   : > { %1692 = vmatmul.mubr.f32.gmra.mrb[2].mxu0 %v459_v31  ;;  %1704 = vmatmul.mubr.f32.gmra.mrb[2].mxu1 %v467_v32 }
  0xf4   : > { %1694 = vmatprep.mubr.f32.mxu0 %v460_v33  ;;  %1706 = vmatprep.mubr.f32.mxu1 %v468_v34 }
  0xf7   : > { %1695 = vmatmul.mubr.f32.gmra.mrb[4].mxu0 %v461_v35  ;;  %1707 = vmatmul.mubr.f32.gmra.mrb[4].mxu1 %v469_v36 }
  0xf8   : > { %1697 = vmatprep.mubr.f32.mxu0 %v462_v37  ;;  %1709 = vmatprep.mubr.f32.mxu1 %v470_v38 }
  0xfb   : > { %1698 = vmatmul.mubr.f32.gmra.mrb[6].mxu0 %v463_v39  ;;  %1710 = vmatmul.mubr.f32.gmra.mrb[6].mxu1 %v471_v40 }
 0x1c2   : > { %v1690_v43 = vpop.f32.mrb[0].mxu0  ;;  %v1702_v44 = vpop.f32.mrb[0].mxu1 }
 0x1c3   : > { %v567_v45 = vadd.f32 %v1690_v43, %v2755_v42  ;;  %v607_v46 = vadd.f32 %v1702_v44, %v2755_v42  ;;  %v561_v47 = vpop.f32.mrb[1].mxu0  ;;  %v601_v48 = vpop.f32.mrb[1].mxu1 }
 0x1c4   : > { %v562_v49 = vadd.f32 %v2755_v42, %v561_v47  ;;  %v602_v50 = vadd.f32 %v2755_v42, %v601_v48 }
 0x1c5   : > { %v641_v51 = vmax.f32 %v567_v45, 0.0  ;;  %v649_v52 = vmax.f32 %v607_v46, 0.0 }
 0x1c6   : > { %v640_v53 = vmax.f32 %v562_v49, 0.0  ;;  %v648_v54 = vmax.f32 %v602_v50, 0.0  ;;  %v1693_v55 = vpop.f32.mrb[2].mxu0  ;;  %v1705_v56 = vpop.f32.mrb[2].mxu1 }
 0x1c7   : > { %657 = vst [vmem:[#allocation2 + $0x8] sm:$0xff] %v641_v51  ;;  %673 = vst [vmem:[#allocation3 + $0x8] sm:$0xff] %v641_v51  ;;  %v577_v57 = vadd.f32 %v1693_v55, %v2755_v42  ;;  %v617_v58 = vadd.f32 %v1705_v56, %v2755_v42  ;;  %v571_v59 = vpop.f32.mrb[3].mxu0  ;;  %v611_v60 = vpop.f32.mrb[3].mxu1 }
 0x1c8   : > { %665 = vst [vmem:[#allocation2 + $0x48] sm:$0xff] %v649_v52  ;;  %681 = vst [vmem:[#allocation3 + $0x48] sm:$0xff] %v649_v52  ;;  %v572_v61 = vadd.f32 %v2755_v42, %v571_v59  ;;  %v612_v62 = vadd.f32 %v2755_v42, %v611_v60 }
 0x1c9   : > { %656 = vst [vmem:[#allocation2] sm:$0xff] %v640_v53  ;;  %672 = vst [vmem:[#allocation3] sm:$0xff] %v640_v53  ;;  %v643_v63 = vmax.f32 %v577_v57, 0.0  ;;  %v651_v0 = vmax.f32 %v617_v58, 0.0 }
 0x1ca   : > { %664 = vst [vmem:[#allocation2 + $0x40] sm:$0xff] %v648_v54  ;;  %680 = vst [vmem:[#allocation3 + $0x40] sm:$0xff] %v648_v54  ;;  %v642_v1 = vmax.f32 %v572_v61, 0.0  ;;  %v650_v2 = vmax.f32 %v612_v62, 0.0  ;;  %v1696_v3 = vpop.f32.mrb[4].mxu0  ;;  %v1708_v4 = vpop.f32.mrb[4].mxu1 }
 0x1cb   : > { %659 = vst [vmem:[#allocation2 + $0x18] sm:$0xff] %v643_v63  ;;  %675 = vst [vmem:[#allocation3 + $0x18] sm:$0xff] %v643_v63  ;;  %v587_v5 = vadd.f32 %v1696_v3, %v2755_v42  ;;  %v627_v6 = vadd.f32 %v1708_v4, %v2755_v42  ;;  %v581_v7 = vpop.f32.mrb[5].mxu0  ;;  %v621_v8 = vpop.f32.mrb[5].mxu1 }
 0x1cc   : > { %667 = vst [vmem:[#allocation2 + $0x58] sm:$0xff] %v651_v0  ;;  %683 = vst [vmem:[#allocation3 + $0x58] sm:$0xff] %v651_v0  ;;  %v582_v9 = vadd.f32 %v2755_v42, %v581_v7  ;;  %v622_v10 = vadd.f32 %v2755_v42, %v621_v8 }
 0x1cd   : > { %658 = vst [vmem:[#allocation2 + $0x10] sm:$0xff] %v642_v1  ;;  %674 = vst [vmem:[#allocation3 + $0x10] sm:$0xff] %v642_v1  ;;  %v645_v11 = vmax.f32 %v587_v5, 0.0  ;;  %v653_v12 = vmax.f32 %v627_v6, 0.0 }
 0x1ce   : > { %666 = vst [vmem:[#allocation2 + $0x50] sm:$0xff] %v650_v2  ;;  %682 = vst [vmem:[#allocation3 + $0x50] sm:$0xff] %v650_v2  ;;  %v644_v13 = vmax.f32 %v582_v9, 0.0  ;;  %v652_v14 = vmax.f32 %v622_v10, 0.0  ;;  %v1699_v15 = vpop.f32.mrb[6].mxu0  ;;  %v1711_v16 = vpop.f32.mrb[6].mxu1 }
 0x1cf   : > { %661 = vst [vmem:[#allocation2 + $0x28] sm:$0xff] %v645_v11  ;;  %677 = vst [vmem:[#allocation3 + $0x28] sm:$0xff] %v645_v11  ;;  %v597_v17 = vadd.f32 %v1699_v15, %v2755_v42  ;;  %v637_v18 = vadd.f32 %v1711_v16, %v2755_v42  ;;  %v591_v19 = vpop.f32.mrb[7].mxu0  ;;  %v631_v20 = vpop.f32.mrb[7].mxu1 }
 0x1d0   : > { %669 = vst [vmem:[#allocation2 + $0x68] sm:$0xff] %v653_v12  ;;  %685 = vst [vmem:[#allocation3 + $0x68] sm:$0xff] %v653_v12  ;;  %v592_v21 = vadd.f32 %v2755_v42, %v591_v19  ;;  %v632_v22 = vadd.f32 %v2755_v42, %v631_v20 }
 0x1d1   : > { %660 = vst [vmem:[#allocation2 + $0x20] sm:$0xff] %v644_v13  ;;  %676 = vst [vmem:[#allocation3 + $0x20] sm:$0xff] %v644_v13  ;;  %v647_v23 = vmax.f32 %v597_v17, 0.0  ;;  %v655_v24 = vmax.f32 %v637_v18, 0.0 }
 0x1d2   : > { %668 = vst [vmem:[#allocation2 + $0x60] sm:$0xff] %v652_v14  ;;  %684 = vst [vmem:[#allocation3 + $0x60] sm:$0xff] %v652_v14  ;;  %v646_v25 = vmax.f32 %v592_v21, 0.0  ;;  %v654_v26 = vmax.f32 %v632_v22, 0.0 }
 0x1d3   : > { %663 = vst [vmem:[#allocation2 + $0x38] sm:$0xff] %v647_v23  ;;  %679 = vst [vmem:[#allocation3 + $0x38] sm:$0xff] %v647_v23 }
 0x1d4   : > { %671 = vst [vmem:[#allocation2 + $0x78] sm:$0xff] %v655_v24  ;;  %687 = vst [vmem:[#allocation3 + $0x78] sm:$0xff] %v655_v24 }
 0x1d5   : > { %662 = vst [vmem:[#allocation2 + $0x30] sm:$0xff] %v646_v25  ;;  %678 = vst [vmem:[#allocation3 + $0x30] sm:$0xff] %v646_v25 }
 0x1d6   : > { %670 = vst [vmem:[#allocation2 + $0x70] sm:$0xff] %v654_v26  ;;  %686 = vst [vmem:[#allocation3 + $0x70] sm:$0xff] %v654_v26 }
 0x1d7 PF: > { %s720_s17 = sld [smem:[#allocation5]]  ;;  %s1550_s5 = sshll.u32 %s2315_s29, 7  ;;  %v704_v27 = vld [vmem:[#allocation3] sm:$0xff]  ;;  %v705_v28 = vld [vmem:[#allocation3 + $0x8] sm:$0xff]  ;;  %v706_v29 = vld [vmem:[#allocation3 + $0x10] sm:$0xff] }
 0x1d8   : > { %p790_p8 = scmp.ge.s32.totalorder %s2319_s30, 1  ;;  %v707_v30 = vld [vmem:[#allocation3 + $0x18] sm:$0xff]  ;;  %v2775_v31 = vld [vmem:[#allocation3 + $0x20] sm:$0xff]  ;;  %v2777_v32 = vld [vmem:[#allocation3 + $0x28] sm:$0xff]  ;;  %s2781_s0 = scalar_lea.vmem [#allocation4], %s1550_s5 }
 0x1d9   : > { %v741_v33 = vld [vmem:[%s2781_s0] sm:$0xff]  ;;  %v742_v34 = vld [vmem:[%s2781_s0 + $0x8] sm:$0xff]  ;;  %v743_v39 = vld [vmem:[%s2781_s0 + $0x10] sm:$0xff]  ;;  %s2868_s16 = scalar_lea.vmem [#allocation14], %s1550_s5  ;;  %s1035_s24 = sld [smem:[#allocation6 + %s2315_s29]] }
 0x1da   : > { %s791_s23 = scalar_select %p790_p8, 1, 0  ;;  %v744_v40 = vld [vmem:[%s2781_s0 + $0x18] sm:$0xff]  ;;  %v745_v41 = vld [vmem:[%s2781_s0 + $0x20] sm:$0xff]  ;;  %v746_v46 = vld [vmem:[%s2781_s0 + $0x28] sm:$0xff] }
 0x1db   : > { %v2801_v47 = vld [vmem:[#allocation3 + $0x38] sm:$0xff]  ;;  %v747_v48 = vld [vmem:[%s2781_s0 + $0x30] sm:$0xff]  ;;  %v810_v62 = vld [vmem:[#allocation13] sm:$0xff]  ;;  %s1375_s29 = sshll.u32 %s2699_s6, 4  ;;  %s3180_s1 = sshll.u32 %s2319_s30, 11  ;;  %s3069_s29 = int_to_ptr.vmem [resolvable:$true] %s1375_s29 }
 0x1dc   : > { %v792_v35 = vstv %s791_s23  ;;  %v2785_v36 = vld [vmem:[#allocation3 + $0x30] sm:$0xff]  ;;  %v748_v57 = vld [vmem:[%s2781_s0 + $0x38] sm:$0xff]  ;;  %1744 = vmatprep.mubr.f32.mxu0 %v810_v62  ;;  %v2823_v7 = vld [vmem:[#allocation3 + $0x40] sm:$0xff]  ;;  %s3067_s14 = scalar_lea.hbm %s3133_s7, %s3180_s1  ;;  %s1362_s12 = scalar_lea.sflag [#allocation8], %s2664_s19 }
 0x1dd   : > { %v2787_v37 = vstv %s720_s17  ;;  %s738_s25 = ssub.f32 1.0, %s720_s17  ;;  %vm2789_vm0 = vcmp.eq.s32.totalorder %v792_v35, 1  ;;  %v713_v8 = vld [vmem:[#allocation3 + $0x48] sm:$0xff]  ;;  %v749_v13 = vld [vmem:[%s2781_s0 + $0x40] sm:$0xff]  ;;  %v2835_v15 = vld [vmem:[#allocation3 + $0x50] sm:$0xff]  ;;  %s2217_s20 = scalar_lea.vmem %s3069_s29, 2048 }
 0x1de   : > { %v722_v42 = vmul.f32 %v2787_v37, %v704_v27  ;;  %v723_v43 = vmul.f32 %v2787_v37, %v705_v28  ;;  %v724_v44 = vmul.f32 %v2787_v37, %v706_v29  ;;  %v725_v45 = vmul.f32 %v2787_v37, %v707_v30  ;;  %v750_v14 = vld [vmem:[%s2781_s0 + $0x48] sm:$0xff]  ;;  %v2840_v19 = vld [vmem:[#allocation3 + $0x58] sm:$0xff]  ;;  %v751_v20 = vld [vmem:[%s2781_s0 + $0x50] sm:$0xff]  ;;  %p2218_p10 = scmp.ne.s32.totalorder %s3069_s29, %s2217_s20  ;;  %s2342_s30 = smov [#allocation16]  }
 0x1df   : > { %v2804_v49 = vstv %s738_s25  ;;  %v726_v50 = vmul.f32 %v2787_v37, %v2775_v31  ;;  %v727_v51 = vmul.f32 %v2787_v37, %v2777_v32  ;;  %v728_v52 = vmul.f32 %v2787_v37, %v2785_v36  ;;  %v752_v21 = vld [vmem:[%s2781_s0 + $0x58] sm:$0xff]  ;;  %v811_v38 = vld [vmem:[#allocation13 + $0x8] sm:$0xff]  ;;  %s1215_s21 = ssub.f32 1.0, %s1035_s24  ;;  %s2221_s22 = sshll.u32 %s2342_s30, 4  ;;  %s2222_s22 = int_to_ptr.vmem [resolvable:$false] %s2221_s22 }
 0x1e0   : > { %v758_v53 = vmul.f32 %v2804_v49, %v741_v33  ;;  %v759_v54 = vmul.f32 %v2804_v49, %v742_v34  ;;  %v760_v55 = vmul.f32 %v2804_v49, %v743_v39  ;;  %v761_v56 = vmul.f32 %v2804_v49, %v744_v40  ;;  %v716_v39 = vld [vmem:[#allocation3 + $0x60] sm:$0xff]  ;;  %v717_v40 = vld [vmem:[#allocation3 + $0x68] sm:$0xff]  ;;  %v756_v62 = vld [vmem:[%s2781_s0 + $0x78] sm:$0xff]  ;;  %p2219_p7 = pnand %p2218_p10, %p2559_p1  ;;  %s2223_s10 = scalar_lea.vmem %s2222_s22, 4096 }
 0x1e1   : > { %v762_v58 = vmul.f32 %v2804_v49, %v745_v41  ;;  %v763_v59 = vmul.f32 %v2804_v49, %v746_v46  ;;  %v729_v60 = vmul.f32 %v2787_v37, %v2801_v47  ;;  %v764_v61 = vmul.f32 %v2804_v49, %v747_v48  ;;  %v753_v41 = vld [vmem:[%s2781_s0 + $0x60] sm:$0xff]  ;;  %v1039_v46 = vld [vmem:[%s2868_s16 + $0x10] sm:$0xff]  ;;  %p2224_p0 = scmp.lt.s32.totalorder %s3069_s29, %s2222_s22  ;;  %p2225_p12 = scmp.lt.s32.totalorder %s2223_s10, %s2217_s20 }
 0x1e2   : > { %v774_v63 = vadd.f32 %v758_v53, %v722_v42  ;;  %v775_v0 = vadd.f32 %v759_v54, %v723_v43  ;;  %v776_v1 = vadd.f32 %v760_v55, %v724_v44  ;;  %v777_v2 = vadd.f32 %v761_v56, %v725_v45  ;;  %v754_v42 = vld [vmem:[%s2781_s0 + $0x68] sm:$0xff]  ;;  %v1037_v43 = vld [vmem:[%s2868_s16] sm:$0xff]  ;;  %p2220_p4 = pneg %p2219_p7 }
 0x1e3   : > { %v778_v3 = vadd.f32 %v762_v58, %v726_v50  ;;  %v779_v4 = vadd.f32 %v763_v59, %v727_v51  ;;  %v765_v5 = vmul.f32 %v2804_v49, %v748_v57  ;;  %v780_v6 = vadd.f32 %v764_v61, %v728_v52  ;;  %v1038_v45 = vld [vmem:[%s2868_s16 + $0x8] sm:$0xff]  ;;  %v718_v57 = vld [vmem:[#allocation3 + $0x70] sm:$0xff]  ;;  %v719_v58 = vld [vmem:[#allocation3 + $0x78] sm:$0xff]  ;;  %p2226_p11 = por %p2225_p12, %p2224_p0 }
 0x1e4   : > { %v794_v9 = vsel %vm2789_vm0, %v774_v63, %v704_v27  ;;  %v795_v10 = vsel %vm2789_vm0, %v775_v0, %v705_v28  ;;  %v796_v11 = vsel %vm2789_vm0, %v776_v1, %v706_v29  ;;  %v797_v12 = vsel %vm2789_vm0, %v777_v2, %v707_v30  ;;  %v755_v59 = vld [vmem:[%s2781_s0 + $0x70] sm:$0xff]  ;;  %v1041_v63 = vld [vmem:[%s2868_s16 + $0x20] sm:$0xff]  ;;  %v1042_v0 = vld [vmem:[%s2868_s16 + $0x28] sm:$0xff] }
 0x1e5   : > { %v1856_v16 = vpack.c.bf16 %v795_v10, %v794_v9  ;;  %v1860_v17 = vpack.c.bf16 %v797_v12, %v796_v11  ;;  %v798_v18 = vsel %vm2789_vm0, %v778_v3, %v2775_v31  ;;  %v799_v22 = vsel %vm2789_vm0, %v779_v4, %v2777_v32  ;;  %v1043_v11 = vld [vmem:[%s2868_s16 + $0x30] sm:$0xff]  ;;  %v1044_v12 = vld [vmem:[%s2868_s16 + $0x38] sm:$0xff]  ;;  %p2227_p2 = pnand %p2226_p11, %p2220_p4 }
 0x1e6   : > { %v781_v23 = vadd.f32 %v765_v5, %v729_v60  ;;  %v800_v24 = vsel %vm2789_vm0, %v780_v6, %v2785_v36  ;;  %v730_v25 = vmul.f32 %v2787_v37, %v2823_v7  ;;  %v731_v26 = vmul.f32 %v2787_v37, %v713_v8 }
 0x1e7   : > { %1857 = vmatprep.subr.bf16.mxu0 %v1856_v16  ;;  %v766_v27 = vmul.f32 %v2804_v49, %v749_v13  ;;  %v767_v28 = vmul.f32 %v2804_v49, %v750_v14  ;;  %v732_v29 = vmul.f32 %v2787_v37, %v2835_v15  ;;  %v733_v31 = vmul.f32 %v2787_v37, %v2840_v19 }
 0x1e8   : > { %1859 = vmatpush3.bf16.msra.mxu0 %v1856_v16  ;;  %v801_v30 = vsel %vm2789_vm0, %v781_v23, %v2801_v47  ;;  %v768_v32 = vmul.f32 %v2804_v49, %v751_v20  ;;  %v769_v33 = vmul.f32 %v2804_v49, %v752_v21  ;;  %v1864_v34 = vpack.c.bf16 %v799_v22, %v798_v18  ;;  %v1040_v47 = vld [vmem:[%s2868_s16 + $0x18] sm:$0xff]  ;;  %v1046_v18 = vld [vmem:[%s2868_s16 + $0x48] sm:$0xff]  ;;  %v1047_v23 = vld [vmem:[%s2868_s16 + $0x50] sm:$0xff] }
 0x1e9   : > { %1861 = vmatprep.subr.bf16.mxu0 %v1860_v17  ;;  %v782_v35 = vadd.f32 %v766_v27, %v730_v25  ;;  %v783_v36 = vadd.f32 %v767_v28, %v731_v26  ;;  %v1868_v44 = vpack.c.bf16 %v801_v30, %v800_v24  ;;  %v734_v51 = vmul.f32 %v2787_v37, %v716_v39  ;;  %v1048_v24 = vld [vmem:[%s2868_s16 + $0x58] sm:$0xff]  ;;  %v1049_v27 = vld [vmem:[%s2868_s16 + $0x60] sm:$0xff]  ;;  %v1050_v28 = vld [vmem:[%s2868_s16 + $0x68] sm:$0xff] }
 0x1ea   : > { %v784_v48 = vadd.f32 %v768_v32, %v732_v29  ;;  %v785_v50 = vadd.f32 %v769_v33, %v733_v31  ;;  %v735_v52 = vmul.f32 %v2787_v37, %v717_v40  ;;  %v770_v55 = vmul.f32 %v2804_v49, %v753_v41  ;;  %v812_v30 = vld [vmem:[#allocation13 + $0x10] sm:$0xff]  ;;  %v813_v31 = vld [vmem:[#allocation13 + $0x18] sm:$0xff]  ;;  %v814_v32 = vld [vmem:[#allocation13 + $0x20] sm:$0xff] }
 0x1eb   : > { %v802_v53 = vsel %vm2789_vm0, %v782_v35, %v2823_v7  ;;  %v803_v54 = vsel %vm2789_vm0, %v783_v36, %v713_v8  ;;  %v771_v56 = vmul.f32 %v2804_v49, %v754_v42  ;;  %v1888_v60 = vpack.c.bf16 %v1038_v45, %v1037_v43  ;;  %v815_v33 = vld [vmem:[#allocation13 + $0x28] sm:$0xff]  ;;  %v817_v35 = vld [vmem:[#allocation13 + $0x38] sm:$0xff]  ;;  %v818_v36 = vld [vmem:[#allocation13 + $0x40] sm:$0xff] }
 0x1ec   : > { %1863 = vmatpush3.bf16.msra.mxu0 %v1860_v17  ;;  %v1892_v61 = vpack.c.bf16 %v1040_v47, %v1039_v46  ;;  %v1872_v1 = vpack.c.bf16 %v803_v54, %v802_v53  ;;  %v804_v2 = vsel %vm2789_vm0, %v784_v48, %v2835_v15  ;;  %v736_v3 = vmul.f32 %v2787_v37, %v718_v57  ;;  %v1045_v17 = vld [vmem:[%s2868_s16 + $0x40] sm:$0xff]  ;;  %v821_v41 = vld [vmem:[#allocation13 + $0x58] sm:$0xff]  ;;  %v823_v43 = vld [vmem:[#allocation13 + $0x68] sm:$0xff] }
 0x1ed   : > { %1865 = vmatprep.subr.bf16.mxu0 %v1864_v34  ;;  %1889 = vmatprep.subr.bf16.mxu1 %v1888_v60  ;;  %v805_v4 = vsel %vm2789_vm0, %v785_v50, %v2840_v19  ;;  %v786_v5 = vadd.f32 %v770_v55, %v734_v51  ;;  %v787_v6 = vadd.f32 %v771_v56, %v735_v52  ;;  %v822_v42 = vld [vmem:[#allocation13 + $0x60] sm:$0xff]  ;;  %v825_v45 = vld [vmem:[#allocation13 + $0x78] sm:$0xff]  ;;  %v1051_v46 = vld [vmem:[%s2868_s16 + $0x70] sm:$0xff] }
 0x1ee   : > { %1891 = vmatpush3.bf16.msra.mxu1 %v1888_v60  ;;  %v737_v7 = vmul.f32 %v2787_v37, %v719_v58  ;;  %v772_v8 = vmul.f32 %v2804_v49, %v755_v59  ;;  %v773_v9 = vmul.f32 %v2804_v49, %v756_v62  ;;  %v1896_v10 = vpack.c.bf16 %v1042_v0, %v1041_v63  ;;  %v1052_v47 = vld [vmem:[%s2868_s16 + $0x78] sm:$0xff]  ;;  %v987_v50 = vld [vmem:[#allocation2] sm:$0xff]  ;;  %v988_v51 = vld [vmem:[#allocation2 + $0x8] sm:$0xff] }
 0x1ef   : > { %1893 = vmatprep.subr.bf16.mxu1 %v1892_v61  ;;  %v1876_v13 = vpack.c.bf16 %v805_v4, %v804_v2  ;;  %v806_v14 = vsel %vm2789_vm0, %v786_v5, %v716_v39  ;;  %v807_v37 = vsel %vm2789_vm0, %v787_v6, %v717_v40  ;;  %v1900_v49 = vpack.c.bf16 %v1044_v12, %v1043_v11  ;;  %v819_v39 = vld [vmem:[#allocation13 + $0x48] sm:$0xff]  ;;  %v820_v40 = vld [vmem:[#allocation13 + $0x50] sm:$0xff]  ;;  %v990_v59 = vld [vmem:[#allocation2 + $0x18] sm:$0xff] }
 0x1f0   : > { %1867 = vmatpush3.bf16.msra.mxu0 %v1864_v34  ;;  %v788_v15 = vadd.f32 %v772_v8, %v736_v3  ;;  %v789_v16 = vadd.f32 %v773_v9, %v737_v7  ;;  %v1880_v19 = vpack.c.bf16 %v807_v37, %v806_v14  ;;  %v1904_v22 = vpack.c.bf16 %v1046_v18, %v1045_v17  ;;  %v816_v34 = vld [vmem:[#allocation13 + $0x30] sm:$0xff]  ;;  %v991_v3 = vld [vmem:[#allocation2 + $0x20] sm:$0xff]  ;;  %v992_v5 = vld [vmem:[#allocation2 + $0x28] sm:$0xff] }
 0x1f1   : > { %1869 = vmatprep.subr.bf16.mxu0 %v1868_v44  ;;  %v1908_v26 = vpack.c.bf16 %v1048_v24, %v1047_v23  ;;  %v1912_v29 = vpack.c.bf16 %v1050_v28, %v1049_v27  ;;  %v1916_v48 = vpack.c.bf16 %v1052_v47, %v1051_v46  ;;  %v1003_v53 = vmul.f32 0.1, %v987_v50  ;;  %v994_v37 = vld [vmem:[#allocation2 + $0x38] sm:$0xff]  ;;  %v996_v23 = vld [vmem:[#allocation2 + $0x48] sm:$0xff] }
 0x1f2   : > { %1895 = vmatpush3.bf16.msra.mxu1 %v1892_v61  ;;  %v808_v20 = vsel %vm2789_vm0, %v788_v15, %v718_v57  ;;  %v809_v21 = vsel %vm2789_vm0, %v789_v16, %v719_v58  ;;  %v1004_v55 = vmul.f32 0.1, %v988_v51  ;;  %v989_v57 = vld [vmem:[#allocation2 + $0x10] sm:$0xff]  ;;  %v1007_v8 = vmul.f32 0.1, %v991_v3 }
 0x1f3   : > { %1897 = vmatprep.subr.bf16.mxu1 %v1896_v10  ;;  %v1884_v25 = vpack.c.bf16 %v809_v21, %v808_v20  ;;  %v1005_v61 = vmul.f32 0.1, %v989_v57  ;;  %v1008_v11 = vmul.f32 0.1, %v992_v5  ;;  %v995_v21 = vld [vmem:[#allocation2 + $0x40] sm:$0xff]  ;;  %v2966_v5 = vstv %s1035_s24 }
 0x1f4   : > { %1871 = vmatpush3.bf16.msra.mxu0 %v1868_v44  ;;  %v824_v44 = vld [vmem:[#allocation13 + $0x70] sm:$0xff] }
 0x1f5   : > { %1873 = vmatprep.subr.bf16.mxu0 %v1872_v1 }
 0x1f6   : > { %1899 = vmatpush3.bf16.msra.mxu1 %v1896_v10 }
 0x1f7   : > { %1901 = vmatprep.subr.bf16.mxu1 %v1900_v49 }
 0x1f8   : > { %1875 = vmatpush3.bf16.msra.mxu0 %v1872_v1  ;;  %v1006_v1 = vmul.f32 0.1, %v990_v59 }
 0x1f9   : > { %1877 = vmatprep.subr.bf16.mxu0 %v1876_v13 }
 0x1fa   : > { %1903 = vmatpush3.bf16.msra.mxu1 %v1900_v49 }
 0x1fb   : > { %1905 = vmatprep.subr.bf16.mxu1 %v1904_v22 }
 0x1fc   : > { %1879 = vmatpush3.bf16.msra.mxu0 %v1876_v13  ;;  %v993_v13 = vld [vmem:[#allocation2 + $0x30] sm:$0xff] }
 0x1fd   : > { %1881 = vmatprep.subr.bf16.mxu0 %v1880_v19  ;;  %v1009_v49 = vmul.f32 0.1, %v993_v13 }
 0x1fe   : > { %1907 = vmatpush3.bf16.msra.mxu1 %v1904_v22 }
 0x1ff   : > { %1909 = vmatprep.subr.bf16.mxu1 %v1908_v26 }
 0x200   : > { %1883 = vmatpush3.bf16.msra.mxu0 %v1880_v19  ;;  %v1010_v19 = vmul.f32 0.1, %v994_v37 }
 0x201   : > { %1885 = vmatprep.subr.bf16.mxu0 %v1884_v25 }
 0x202   : > { %1911 = vmatpush3.bf16.msra.mxu1 %v1908_v26  ;;  %v1011_v26 = vmul.f32 0.1, %v995_v21 }
 0x203   : > { %1913 = vmatprep.subr.bf16.mxu1 %v1912_v29 }
 0x204   : > { %1887 = vmatpush3.bf16.msra.mxu0 %v1884_v25 }
 0x206   : > { %1915 = vmatpush3.bf16.msra.mxu1 %v1912_v29  ;;  %v1012_v29 = vmul.f32 0.1, %v996_v23 }
 0x207   : > { %1745 = vmatmul.mubr.f32.vlgmr.msra.gmra.mrb[0].mxu0 %v811_v38  ;;  %1917 = vmatprep.subr.bf16.mxu1 %v1916_v48 }
 0x208   : > { %1747 = vmatprep.mubr.f32.mxu0 %v812_v30  ;;  %v997_v30 = vld [vmem:[#allocation2 + $0x50] sm:$0xff] }
 0x20a   : > { %1919 = vmatpush3.bf16.msra.mxu1 %v1916_v48 }
 0x20b   : > { %1748 = vmatmul.mubr.f32.gmra.mrb[2].mxu0 %v813_v31 }
 0x20c   : > { %1750 = vmatprep.mubr.f32.mxu0 %v814_v32  ;;  %v998_v32 = vld [vmem:[#allocation2 + $0x58] sm:$0xff] }
 0x20f   : > { %1751 = vmatmul.mubr.f32.gmra.mrb[4].mxu0 %v815_v33 }
 0x210   : > { %1753 = vmatprep.mubr.f32.mxu0 %v816_v34 }
 0x213   : > { %1754 = vmatmul.mubr.f32.gmra.mrb[6].mxu0 %v817_v35  ;;  %v1013_v35 = vmul.f32 0.1, %v997_v30 }
 0x214   : > { %1756 = vmatprep.mubr.f32.mxu0 %v818_v36 }
 0x217   : > { %1757 = vmatmul.mubr.f32.gmra.mrb[8].mxu0 %v819_v39 }
 0x218   : > { %1759 = vmatprep.mubr.f32.mxu0 %v820_v40  ;;  %v1014_v40 = vmul.f32 0.1, %v998_v32 }
 0x21b   : > { %1760 = vmatmul.mubr.f32.gmra.mrb[10].mxu0 %v821_v41 }
 0x21c   : > { %1762 = vmatprep.mubr.f32.mxu0 %v822_v42  ;;  %v999_v42 = vld [vmem:[#allocation2 + $0x60] sm:$0xff] }
 0x21d   : > { %v1015_v47 = vmul.f32 0.1, %v999_v42  ;;  %v1313_v42 = vld [vmem:[%s2699_s6] sm:$0xff] }
 0x21f   : > { %1763 = vmatmul.mubr.f32.gmra.mrb[12].mxu0 %v823_v43 }
 0x220   : > { %1765 = vmatprep.mubr.f32.mxu0 %v824_v44  ;;  %v1000_v44 = vld [vmem:[#allocation2 + $0x68] sm:$0xff] }
 0x221   : > { %v1016_v51 = vmul.f32 0.1, %v1000_v44 }
 0x223   : > { %1766 = vmatmul.mubr.f32.gmra.mrb[14].mxu0 %v825_v45 }
 0x2da   : > { %v1746_v52 = vpop.f32.mrb[0].mxu0 }
 0x2db   : > { %v972_v54 = vmul.f32 0.9, %v1746_v52  ;;  %v892_v56 = vpop.f32.mrb[1].mxu0 }
 0x2dc   : > { %v971_v58 = vmul.f32 0.9, %v892_v56 }
 0x2dd   : > { %v2917_v63 = vadd.f32 %v1004_v55, %v972_v54  ;;  %v1002_v55 = vld [vmem:[#allocation2 + $0x78] sm:$0xff] }
 0x2de   : > { %v1749_v60 = vpop.f32.mrb[2].mxu0  ;;  %v2915_v62 = vadd.f32 %v1003_v53, %v971_v58  ;;  %v1001_v53 = vld [vmem:[#allocation2 + $0x70] sm:$0xff] }
 0x2df   : > { %v974_v0 = vmul.f32 0.9, %v1749_v60  ;;  %v902_v2 = vpop.f32.mrb[3].mxu0  ;;  %v1017_v58 = vmul.f32 0.1, %v1001_v53 }
 0x2e0   : > { %v973_v4 = vmul.f32 0.9, %v902_v2  ;;  %1800 = vmatprep.mubr.f32.mxu1 %v2915_v62 }
 0x2e1   : > { %1801 = vmatmul.mubr.f32.vlgmr.msra.gmra.mrb[0].mxu1 %v2917_v63  ;;  %v2923_v9 = vadd.f32 %v1006_v1, %v974_v0 }
 0x2e2   : > { %v2921_v6 = vadd.f32 %v1005_v61, %v973_v4  ;;  %v1752_v7 = vpop.f32.mrb[4].mxu0  ;;  %v1018_v61 = vmul.f32 0.1, %v1002_v55  ;;  %v2964_v4 = vstv %s1215_s21  ;;  %v1316_v55 = vld [vmem:[%s2699_s6 + $0x18] sm:$0xff] }
 0x2e3   : > { %v976_v10 = vmul.f32 0.9, %v1752_v7  ;;  %v912_v12 = vpop.f32.mrb[5].mxu0 }
 0x2e4   : > { %v975_v14 = vmul.f32 0.9, %v912_v12  ;;  %1803 = vmatprep.mubr.f32.mxu1 %v2921_v6  ;;  %v1217_v12 = vmul.f32 %v2964_v4, %v2915_v62 }
 0x2e5   : > { %1804 = vmatmul.mubr.f32.gmra.mrb[2].mxu1 %v2923_v9  ;;  %v2929_v17 = vadd.f32 %v1008_v11, %v976_v10  ;;  %v1218_v10 = vmul.f32 %v2964_v4, %v2917_v63  ;;  %v1219_v63 = vmul.f32 %v2964_v4, %v2921_v6 }
 0x2e6   : > { %v2927_v15 = vadd.f32 %v1007_v8, %v975_v14  ;;  %v1755_v16 = vpop.f32.mrb[6].mxu0 }
 0x2e7   : > { %v978_v18 = vmul.f32 0.9, %v1755_v16  ;;  %v922_v20 = vpop.f32.mrb[7].mxu0 }
 0x2e8   : > { %v977_v22 = vmul.f32 0.9, %v922_v20  ;;  %1806 = vmatprep.mubr.f32.mxu1 %v2927_v15 }
 0x2e9   : > { %1807 = vmatmul.mubr.f32.gmra.mrb[4].mxu1 %v2929_v17  ;;  %v2935_v27 = vadd.f32 %v1010_v19, %v978_v18  ;;  %v1220_v18 = vmul.f32 %v2964_v4, %v2923_v9 }
 0x2ea   : > { %v2933_v24 = vadd.f32 %v1009_v49, %v977_v22  ;;  %v1758_v25 = vpop.f32.mrb[8].mxu0 }
 0x2eb   : > { %v980_v28 = vmul.f32 0.9, %v1758_v25  ;;  %v932_v38 = vpop.f32.mrb[9].mxu0  ;;  %v1222_v25 = vmul.f32 %v2964_v4, %v2929_v17 }
 0x2ec   : > { %v979_v31 = vmul.f32 0.9, %v932_v38  ;;  %1809 = vmatprep.mubr.f32.mxu1 %v2933_v24 }
 0x2ed   : > { %1810 = vmatmul.mubr.f32.gmra.mrb[6].mxu1 %v2935_v27  ;;  %v2941_v36 = vadd.f32 %v1012_v29, %v980_v28  ;;  %v1221_v28 = vmul.f32 %v2964_v4, %v2927_v15  ;;  %v1314_v15 = vld [vmem:[%s2699_s6 + $0x8] sm:$0xff] }
 0x2ee   : > { %v2939_v33 = vadd.f32 %v1011_v26, %v979_v31  ;;  %v1761_v34 = vpop.f32.mrb[10].mxu0  ;;  %v1224_v31 = vmul.f32 %v2964_v4, %v2935_v27 }
 0x2ef   : > { %v982_v39 = vmul.f32 0.9, %v1761_v34  ;;  %v942_v41 = vpop.f32.mrb[11].mxu0  ;;  %v1223_v34 = vmul.f32 %v2964_v4, %v2933_v24 }
 0x2f0   : > { %v981_v43 = vmul.f32 0.9, %v942_v41  ;;  %1812 = vmatprep.mubr.f32.mxu1 %v2939_v33 }
 0x2f1   : > { %1813 = vmatmul.mubr.f32.gmra.mrb[8].mxu1 %v2941_v36  ;;  %v2947_v48 = vadd.f32 %v1014_v40, %v982_v39 }
 0x2f2   : > { %v2945_v45 = vadd.f32 %v1013_v35, %v981_v43  ;;  %v1764_v46 = vpop.f32.mrb[12].mxu0 }
 0x2f3   : > { %v984_v50 = vmul.f32 0.9, %v1764_v46  ;;  %v952_v52 = vpop.f32.mrb[13].mxu0 }
 0x2f4   : > { %v983_v54 = vmul.f32 0.9, %v952_v52  ;;  %1815 = vmatprep.mubr.f32.mxu1 %v2945_v45  ;;  %v1225_v52 = vmul.f32 %v2964_v4, %v2939_v33 }
 0x2f5   : > { %1816 = vmatmul.mubr.f32.gmra.mrb[10].mxu1 %v2947_v48  ;;  %v2953_v59 = vadd.f32 %v1016_v51, %v984_v50 }
 0x2f6   : > { %v2951_v56 = vadd.f32 %v1015_v47, %v983_v54  ;;  %v1767_v57 = vpop.f32.mrb[14].mxu0  ;;  %v1226_v47 = vmul.f32 %v2964_v4, %v2941_v36 }
 0x2f7   : > { %v986_v60 = vmul.f32 0.9, %v1767_v57  ;;  %v962_v0 = vpop.f32.mrb[15].mxu0 }
 0x2f8   : > { %v985_v1 = vmul.f32 0.9, %v962_v0  ;;  %1818 = vmatprep.mubr.f32.mxu1 %v2951_v56 }
 0x2f9   : > { %1819 = vmatmul.mubr.f32.gmra.mrb[12].mxu1 %v2953_v59  ;;  %v2959_v3 = vadd.f32 %v1018_v61, %v986_v60  ;;  %v1315_v60 = vld [vmem:[%s2699_s6 + $0x10] sm:$0xff] }
 0x2fa   : > { %v2957_v2 = vadd.f32 %v1017_v58, %v985_v1 }
 0x2fc   : > { %1821 = vmatprep.mubr.f32.mxu1 %v2957_v2 }
 0x2fd   : > { %1822 = vmatmul.mubr.f32.gmra.mrb[14].mxu1 %v2959_v3 }
 0x3b4   : > { %v1802_v7 = vpop.f32.mrb[0].mxu1 }
 0x3b5   : > { %v1200_v8 = vmul.f32 %v1802_v7, %v2966_v5  ;;  %v1119_v11 = vpop.f32.mrb[1].mxu1  ;;  %v1228_v7 = vmul.f32 %v2964_v4, %v2947_v48 }
 0x3b6   : > { %v1199_v13 = vmul.f32 %v2966_v5, %v1119_v11 }
 0x3b7   : > { %v1234_v14 = vadd.f32 %v1218_v10, %v1200_v8 }
 0x3b8   : > { %v1233_v37 = vadd.f32 %v1217_v12, %v1199_v13  ;;  %v1805_v16 = vpop.f32.mrb[2].mxu1  ;;  %v1227_v12 = vmul.f32 %v2964_v4, %v2945_v45 }
 0x3b9   : > { %2052 = vtanh.f32 %v1234_v14  ;;  %v1202_v49 = vmul.f32 %v1805_v16, %v2966_v5  ;;  %v1129_v19 = vpop.f32.mrb[3].mxu1 }
 0x3ba   : > { %2054 = vtanh.f32 %v1233_v37  ;;  %v1201_v20 = vmul.f32 %v2966_v5, %v1129_v19  ;;  %v1318_v37 = vld [vmem:[%s2699_s6 + $0x28] sm:$0xff] }
 0x3bb   : > { %v1236_v21 = vadd.f32 %v1220_v18, %v1202_v49  ;;  %v1317_v18 = vld [vmem:[%s2699_s6 + $0x20] sm:$0xff] }
 0x3bc   : > { %v1235_v62 = vadd.f32 %v1219_v63, %v1201_v20  ;;  %v1808_v22 = vpop.f32.mrb[4].mxu1 }
 0x3bd   : > { %2056 = vtanh.f32 %v1236_v21  ;;  %v1204_v23 = vmul.f32 %v1808_v22, %v2966_v5  ;;  %v1139_v26 = vpop.f32.mrb[5].mxu1  ;;  %v1230_v21 = vmul.f32 %v2964_v4, %v2953_v59 }
 0x3be   : > { %2058 = vtanh.f32 %v1235_v62  ;;  %v1203_v9 = vmul.f32 %v2966_v5, %v1139_v26 }
 0x3bf   : > { %v1238_v29 = vadd.f32 %v1222_v25, %v1204_v23  ;;  %v1229_v25 = vmul.f32 %v2964_v4, %v2951_v56 }
 0x3c0   : > { %v1237_v6 = vadd.f32 %v1221_v28, %v1203_v9  ;;  %v1811_v38 = vpop.f32.mrb[6].mxu1  ;;  %v1320_v28 = vld [vmem:[%s2699_s6 + $0x38] sm:$0xff] }
 0x3c1   : > { %2060 = vtanh.f32 %v1238_v29  ;;  %v1206_v30 = vmul.f32 %v1811_v38, %v2966_v5  ;;  %v1149_v32 = vpop.f32.mrb[7].mxu1  ;;  %v1319_v38 = vld [vmem:[%s2699_s6 + $0x30] sm:$0xff] }
 0x3c2   : > { %2062 = vtanh.f32 %v1237_v6  ;;  %v1205_v17 = vmul.f32 %v2966_v5, %v1149_v32 }
 0x3c3   : > { %v2053_v35 = vpop.eup %2052  ;;  %v1240_v39 = vadd.f32 %v1224_v31, %v1206_v30 }
 0x3c4   : > { %v2055_v40 = vpop.eup %2054  ;;  %v1266_v41 = vmax.f32 %v2053_v35, 0.0  ;;  %v1239_v43 = vadd.f32 %v1223_v34, %v1205_v17  ;;  %v1814_v44 = vpop.f32.mrb[8].mxu1  ;;  %v1232_v17 = vmul.f32 %v2964_v4, %v2959_v3  ;;  %v1231_v35 = vmul.f32 %v2964_v4, %v2957_v2  ;;  %v1321_v2 = vld [vmem:[%s2699_s6 + $0x40] sm:$0xff] }
 0x3c5   : > { %v1265_v46 = vmax.f32 %v2055_v40, 0.0  ;;  %2064 = vtanh.f32 %v1240_v39  ;;  %v1208_v27 = vmul.f32 %v1814_v44, %v2966_v5  ;;  %v1159_v50 = vpop.f32.mrb[9].mxu1 }
 0x3c6   : > { %1282 = vst [vmem:[#allocation3 + $0x8] sm:$0xff] %v1266_v41  ;;  %1298 = vst [vmem:[%s2781_s0 + $0x8] sm:$0xff] %v1266_v41  ;;  %v1330_v24 = vadd.f32 %v1314_v15, %v1266_v41  ;;  %2066 = vtanh.f32 %v1239_v43  ;;  %v1207_v51 = vmul.f32 %v2966_v5, %v1159_v50  ;;  %v1324_v50 = vld [vmem:[%s2699_s6 + $0x58] sm:$0xff] }
 0x3c7   : > { %v2057_v53 = vpop.eup %2056  ;;  %1281 = vst [vmem:[#allocation3] sm:$0xff] %v1265_v46  ;;  %1297 = vst [vmem:[%s2781_s0] sm:$0xff] %v1265_v46  ;;  %v1329_v54 = vadd.f32 %v1313_v42, %v1265_v46  ;;  %v1242_v57 = vadd.f32 %v1226_v47, %v1208_v27  ;;  %v1322_v42 = vld [vmem:[%s2699_s6 + $0x48] sm:$0xff] }
 0x3c8   : > { %v2059_v36 = vpop.eup %2058  ;;  %1346 = vst [vmem:[%s2699_s6 + $0x8] sm:$0xff] %v1330_v24  ;;  %v1268_v58 = vmax.f32 %v2057_v53, 0.0  ;;  %v1241_v61 = vadd.f32 %v1225_v52, %v1207_v51  ;;  %v1817_v0 = vpop.f32.mrb[10].mxu1  ;;  %v1323_v52 = vld [vmem:[%s2699_s6 + $0x50] sm:$0xff] }
 0x3c9   : > { %1345 = vst [vmem:[%s2699_s6] sm:$0xff] %v1329_v54  ;;  %v1267_v1 = vmax.f32 %v2059_v36, 0.0  ;;  %2068 = vtanh.f32 %v1242_v57  ;;  %v1210_v33 = vmul.f32 %v1817_v0, %v2966_v5  ;;  %v1169_v8 = vpop.f32.mrb[11].mxu1  ;;  %v1326_v36 = vld [vmem:[%s2699_s6 + $0x68] sm:$0xff] }
 0x3ca   : > { %1284 = vst [vmem:[#allocation3 + $0x18] sm:$0xff] %v1268_v58  ;;  %1300 = vst [vmem:[%s2781_s0 + $0x18] sm:$0xff] %v1268_v58  ;;  %v1332_v10 = vadd.f32 %v1316_v55, %v1268_v58  ;;  %2070 = vtanh.f32 %v1241_v61  ;;  %v1209_v11 = vmul.f32 %v2966_v5, %v1169_v8  ;;  %v1325_v61 = vld [vmem:[%s2699_s6 + $0x60] sm:$0xff]  ;;  %v1328_v8 = vld [vmem:[%s2699_s6 + $0x78] sm:$0xff] }
 0x3cb   : > { %v2061_v13 = vpop.eup %2060  ;;  %1283 = vst [vmem:[#allocation3 + $0x10] sm:$0xff] %v1267_v1  ;;  %1299 = vst [vmem:[%s2781_s0 + $0x10] sm:$0xff] %v1267_v1  ;;  %v1331_v14 = vadd.f32 %v1315_v60, %v1267_v1  ;;  %v1244_v16 = vadd.f32 %v1228_v7, %v1210_v33 }
 0x3cc   : > { %v2063_v48 = vpop.eup %2062  ;;  %1348 = vst [vmem:[%s2699_s6 + $0x18] sm:$0xff] %v1332_v10  ;;  %v1270_v49 = vmax.f32 %v2061_v13, 0.0  ;;  %v1243_v19 = vadd.f32 %v1227_v12, %v1209_v11  ;;  %v1820_v20 = vpop.f32.mrb[12].mxu1  ;;  %v1327_v12 = vld [vmem:[%s2699_s6 + $0x70] sm:$0xff] }
 0x3cd   : > { %1347 = vst [vmem:[%s2699_s6 + $0x10] sm:$0xff] %v1331_v14  ;;  %v1269_v63 = vmax.f32 %v2063_v48, 0.0  ;;  %2072 = vtanh.f32 %v1244_v16  ;;  %v1212_v45 = vmul.f32 %v1820_v20, %v2966_v5  ;;  %v1179_v62 = vpop.f32.mrb[13].mxu1 }
 0x3ce   : > { %1286 = vst [vmem:[#allocation3 + $0x28] sm:$0xff] %v1270_v49  ;;  %1302 = vst [vmem:[%s2781_s0 + $0x28] sm:$0xff] %v1270_v49  ;;  %v1334_v22 = vadd.f32 %v1318_v37, %v1270_v49  ;;  %2074 = vtanh.f32 %v1243_v19  ;;  %v1211_v23 = vmul.f32 %v2966_v5, %v1179_v62 }
 0x3cf   : > { %v2065_v26 = vpop.eup %2064  ;;  %1285 = vst [vmem:[#allocation3 + $0x20] sm:$0xff] %v1269_v63  ;;  %1301 = vst [vmem:[%s2781_s0 + $0x20] sm:$0xff] %v1269_v63  ;;  %v1333_v9 = vadd.f32 %v1317_v18, %v1269_v63  ;;  %v1246_v29 = vadd.f32 %v1230_v21, %v1212_v45 }
 0x3d0   : > { %v2067_v59 = vpop.eup %2066  ;;  %1350 = vst [vmem:[%s2699_s6 + $0x28] sm:$0xff] %v1334_v22  ;;  %v1272_v6 = vmax.f32 %v2065_v26, 0.0  ;;  %v1245_v30 = vadd.f32 %v1229_v25, %v1211_v23  ;;  %v1823_v31 = vpop.f32.mrb[14].mxu1 }
 0x3d1   : > { %1349 = vst [vmem:[%s2699_s6 + $0x20] sm:$0xff] %v1333_v9  ;;  %v1271_v32 = vmax.f32 %v2067_v59, 0.0  ;;  %2076 = vtanh.f32 %v1246_v29  ;;  %v1214_v56 = vmul.f32 %v1823_v31, %v2966_v5  ;;  %v1189_v34 = vpop.f32.mrb[15].mxu1 }
 0x3d2   : > { %1288 = vst [vmem:[#allocation3 + $0x38] sm:$0xff] %v1272_v6  ;;  %1304 = vst [vmem:[%s2781_s0 + $0x38] sm:$0xff] %v1272_v6  ;;  %v1336_v15 = vadd.f32 %v1320_v28, %v1272_v6  ;;  %2078 = vtanh.f32 %v1245_v30  ;;  %v1213_v39 = vmul.f32 %v2966_v5, %v1189_v34 }
 0x3d3   : > { %v2069_v40 = vpop.eup %2068  ;;  %1287 = vst [vmem:[#allocation3 + $0x30] sm:$0xff] %v1271_v32  ;;  %1303 = vst [vmem:[%s2781_s0 + $0x30] sm:$0xff] %v1271_v32  ;;  %v1335_v41 = vadd.f32 %v1319_v38, %v1271_v32  ;;  %v1248_v3 = vadd.f32 %v1232_v17, %v1214_v56 }
 0x3d4   : > { %v2071_v43 = vpop.eup %2070  ;;  %1352 = vst [vmem:[%s2699_s6 + $0x38] sm:$0xff] %v1336_v15  ;;  %v1274_v44 = vmax.f32 %v2069_v40, 0.0  ;;  %v1247_v4 = vadd.f32 %v1231_v35, %v1213_v39 }
 0x3d5   : > { %1351 = vst [vmem:[%s2699_s6 + $0x30] sm:$0xff] %v1335_v41  ;;  %v1273_v46 = vmax.f32 %v2071_v43, 0.0  ;;  %2080 = vtanh.f32 %v1248_v3 }
 0x3d6   : > { %1290 = vst [vmem:[#allocation3 + $0x48] sm:$0xff] %v1274_v44  ;;  %1306 = vst [vmem:[%s2781_s0 + $0x48] sm:$0xff] %v1274_v44  ;;  %v1338_v5 = vadd.f32 %v1322_v42, %v1274_v44  ;;  %2082 = vtanh.f32 %v1247_v4 }
 0x3d7   : > { %v2073_v27 = vpop.eup %2072  ;;  %1289 = vst [vmem:[#allocation3 + $0x40] sm:$0xff] %v1273_v46  ;;  %1305 = vst [vmem:[%s2781_s0 + $0x40] sm:$0xff] %v1273_v46  ;;  %v1337_v47 = vadd.f32 %v1321_v2, %v1273_v46 }
 0x3d8   : > { %v2075_v24 = vpop.eup %2074  ;;  %1354 = vst [vmem:[%s2699_s6 + $0x48] sm:$0xff] %v1338_v5  ;;  %v1276_v51 = vmax.f32 %v2073_v27, 0.0 }
 0x3d9   : > { %1353 = vst [vmem:[%s2699_s6 + $0x40] sm:$0xff] %v1337_v47  ;;  %v1275_v53 = vmax.f32 %v2075_v24, 0.0 }
 0x3da   : > { %1292 = vst [vmem:[#allocation3 + $0x58] sm:$0xff] %v1276_v51  ;;  %1308 = vst [vmem:[%s2781_s0 + $0x58] sm:$0xff] %v1276_v51  ;;  %v1340_v54 = vadd.f32 %v1324_v50, %v1276_v51 }
 0x3db   : > { %v2077_v55 = vpop.eup %2076  ;;  %1291 = vst [vmem:[#allocation3 + $0x50] sm:$0xff] %v1275_v53  ;;  %1307 = vst [vmem:[%s2781_s0 + $0x50] sm:$0xff] %v1275_v53  ;;  %v1339_v57 = vadd.f32 %v1323_v52, %v1275_v53 }
 0x3dc   : > { %v2079_v58 = vpop.eup %2078  ;;  %1356 = vst [vmem:[%s2699_s6 + $0x58] sm:$0xff] %v1340_v54  ;;  %v1278_v60 = vmax.f32 %v2077_v55, 0.0 }
 0x3dd   : > { %1355 = vst [vmem:[%s2699_s6 + $0x50] sm:$0xff] %v1339_v57  ;;  %v1277_v0 = vmax.f32 %v2079_v58, 0.0 }
 0x3de   : > { %1294 = vst [vmem:[#allocation3 + $0x68] sm:$0xff] %v1278_v60  ;;  %1310 = vst [vmem:[%s2781_s0 + $0x68] sm:$0xff] %v1278_v60  ;;  %v1342_v1 = vadd.f32 %v1326_v36, %v1278_v60 }
 0x3df   : > { %v2081_v33 = vpop.eup %2080  ;;  %1293 = vst [vmem:[#allocation3 + $0x60] sm:$0xff] %v1277_v0  ;;  %1309 = vst [vmem:[%s2781_s0 + $0x60] sm:$0xff] %v1277_v0  ;;  %v1341_v7 = vadd.f32 %v1325_v61, %v1277_v0 }
 0x3e0   : > { %v2083_v10 = vpop.eup %2082  ;;  %1358 = vst [vmem:[%s2699_s6 + $0x68] sm:$0xff] %v1342_v1  ;;  %v1280_v11 = vmax.f32 %v2081_v33, 0.0 }
 0x3e1   : > { %1357 = vst [vmem:[%s2699_s6 + $0x60] sm:$0xff] %v1341_v7  ;;  %v1279_v13 = vmax.f32 %v2083_v10, 0.0 }
 0x3e2   : > { %1296 = vst [vmem:[#allocation3 + $0x78] sm:$0xff] %v1280_v11  ;;  %1312 = vst [vmem:[%s2781_s0 + $0x78] sm:$0xff] %v1280_v11  ;;  %v1344_v14 = vadd.f32 %v1328_v8, %v1280_v11 }
 0x3e3   : > { %1295 = vst [vmem:[#allocation3 + $0x70] sm:$0xff] %v1279_v13  ;;  %1311 = vst [vmem:[%s2781_s0 + $0x70] sm:$0xff] %v1279_v13  ;;  %v1343_v37 = vadd.f32 %v1327_v12, %v1279_v13 }
 0x3e4   : > { %1360 = vst [vmem:[%s2699_s6 + $0x78] sm:$0xff] %v1344_v14 }
 0x3e5   : > { %1359 = vst [vmem:[%s2699_s6 + $0x70] sm:$0xff] %v1343_v37 }
 0x3e6   : > { %2230 = shalt.err (!%p2227_p2)
}
 0x3e7   : > { %s2231_s6 = scalar_lea.hbm %s3067_s14, 2048  ;;  %s2235_s5 = scalar_lea.hbm %s3133_s7, 4096 }
 0x3e8   : > { %p2232_p9 = scmp.ne.s32.totalorder %s3067_s14, %s2231_s6  ;;  %p2236_p5 = scmp.lt.u32.totalorder %s3067_s14, %s3133_s7 }
 0x3e9   : > { %p2237_p6 = scmp.lt.u32.totalorder %s2235_s5, %s2231_s6  ;;  %p2239_p10 = scmp.lt.u32.totalorder %s2231_s6, %s3067_s14 }
 0x3ea   : > { %p2233_p3 = pnand %p2232_p9, %p2559_p1 }
 0x3eb   : > { %p2238_p8 = por %p2237_p6, %p2236_p5 }
 0x3ec   : > { %p2234_p13 = pneg %p2233_p3 }
 0x3ed   : > { %p2240_p7 = por %p2239_p10, %p2238_p8 }
 0x3ef   : > { %p2241_p4 = pnand %p2240_p7, %p2234_p13 }
 0x3f1   : > { %2244 = shalt.err (!%p2241_p4)
}
 0x3f2   : > { %s2343_s25 = smov 128   ;;  %s2344_s16 = smov 8  }
 0x3f3   : > { %1950 = dma.vmem_to_hbm [thread:$0]  (%p2559_p1), %s3069_s29, 2048, %s3067_s14, %s1362_s12, %s2343_s25, %s2343_s25, %s2344_s16  }
 0x3f4 PF: > { %p1978_p0 = scmp.ge.s32.totalorder %s2331_s9, 2  ;;  %s1390_s24 = sand.u32 1, %s2303_s26  }
 0x3f5   : > { %p3181_p12 = scmp.ne.s32.totalorder %s3154_s13, 0  ;;  %s1391_s21 = scalar_lea.sflag [#allocation8], %s1390_s24 }
 0x3f7   : > { %p1970_p11 = pnand %p1978_p0, %p3181_p12 }
 0x3f9   : > { %2298 = dma.done.wait (!%p1970_p11), %s1391_s21, 2048  }
 0x3fa   : > { %2300 = vsyncadd (!%p1970_p11), %s1391_s21, 4294965248  ;;  %s29_s9 = sadd.s32 1, %s2331_s9   ;;  %s3182_s1 = sld [smem:[#allocation27_spill]] }
 0x3fb   : > { %p26_p2 = scmp.ge.s32.totalorder %s29_s9, 6   ;;  %s3183_s29 = sld [smem:[#allocation23_spill]] }
 0x3fc   : > { %s3184_s30 = sld [smem:[#allocation24_spill]]  ;;  %s3185_s8 = sld [smem:[#allocation25_spill]] }
 0x3fd   : > { %s3186_s11 = sld [smem:[#allocation26_spill]]  ;;  %s3187_s26 = smov %s2307_s27 }
 0x3fe   : > { %s3188_s27 = smov %s2311_s28  ;;  %28 = sbr.rel (!%p26_p2) target bundleno = 16 (0x10), region = 133 }
 0x400   : > { %s3189_s28 = smov %s3182_s1 }
 0x403   : > { %s3190_s1 = smov %s3186_s11 }
 0x405   :  { %1396 = vsyncpa [#allocation7], 1 }
 0x406   :  { %1398 = vsyncpa [#allocation7 + $0x1], 1 }
 0x407   :  { %1399 = vsyncpa [#allocation12], 1 }
 0x408   :  { %1401 = vsyncpa [#allocation12 + $0x1], 1 }
 0x409   :  { %1402 = vsyncpa [#allocation15], 1 }
 0x40a   :  { %1403 = vsyncpa [#allocation8], 1 }
 0x40b   :  { %1405 = vsyncpa [#allocation8 + $0x1], 1 }
 0x40c   :  { %1406 = vsyncpa [#allocation9], 1 }
 0x40d   :  { %1408 = vsyncpa [#allocation9 + $0x1], 1 }

// kernel: tpu_custom_call.1
= control target key start
LH: loop header
LB: loop body
LE: loop exit
PB: predicated region body
PF: predicated region fallthrough
CT: control target
= control target key end

     0   :  { %s3157_s0 = inlined_call_operand.vmem [shape: f32[2], index: 0, kind: input, shape index: {}]   ;;  %s3158_s1 = inlined_call_operand.<no memory space> [shape: f32[1], index: 1, kind: input, shape index: {}]   ;;  %s3159_s2 = inlined_call_operand.hbm [shape: f32[2,128,128], index: 2, kind: input, shape index: {}]   ;;  %s3160_s3 = inlined_call_operand.hbm [shape: f32[2,128,128], index: 3, kind: input, shape index: {}]   ;;  %s3161_s4 = inlined_call_operand.vmem [shape: f32[2,1,128], index: 4, kind: input, shape index: {}]   ;;  %s3162_s5 = inlined_call_operand.hbm [shape: f32[2,128,128], index: 5, kind: input, shape index: {}]   ;;  %s3163_s6 = inlined_call_operand.hbm [shape: f32[2,128,128], index: 6, kind: input, shape index: {}]   ;;  %s3164_s7 = inlined_call_operand.hbm [shape: f32[2,128,128], index: 7, kind: output, shape index: {}]  }
   0x1   :  { %3182 = sst [smem:[#allocation30_spill]] %s3157_s0 }
   0x2   :  { %3183 = sst [smem:[#allocation31_spill]] %s3160_s3 }
   0x3   :  { %12 = sst [smem:[#allocation5]] %s3158_s1 }
   0x4   :  { %13 = vsyncpa [#allocation9], 0 }
   0x5   :  { %14 = vsyncpa [#allocation7], 0 }
   0x6   :  { %16 = vsyncpa [#allocation7 + $0x1], 0 }
   0x7   :  { %17 = vsyncpa [#allocation12], 0 }
   0x8   :  { %19 = vsyncpa [#allocation12 + $0x1], 0 }
   0x9   :  { %20 = vsyncpa [#allocation15], 0 }
   0xa   :  { %21 = vsyncpa [#allocation8], 0 }
   0xb   :  { %23 = vsyncpa [#allocation8 + $0x1], 0  ;;  %s2409_s26 = smov 0   ;;  %s2411_s27 = smov 0  }
   0xc   :  { %s2413_s28 = smov 0   ;;  %s2415_s29 = smov 0  }
   0xd   :  { %s2417_s30 = smov 0   ;;  %s2419_s8 = smov 0  }
   0xe   :  { %s2421_s1 = smov 0   ;;  %s2423_s9 = smov 0  }
   0xf LB: > { %3184 = sst [smem:[#allocation22_spill]] %s2324_s26  ;;  %s38_s10 = sadd.s32 1, %s2344_s8  ;;  %s2352_s9 = sphi %s2423_s9, %s29_s9   ;;  %s2348_s1 = sphi %s2421_s1, %s3222_s1   ;;  %s2344_s8 = sphi %s2419_s8, %s3221_s8   ;;  %s2340_s30 = sphi %s2417_s30, %s3220_s30   ;;  %s2336_s29 = sphi %s2415_s29, %s3219_s29   ;;  %s2332_s28 = sphi %s2413_s28, %s3225_s28   ;;  %s2328_s27 = sphi %s2411_s27, %s3224_s27   ;;  %s2324_s26 = sphi %s2409_s26, %s3223_s26  }
  0x10   : > { %3185 = sst [smem:[#allocation23_spill]] %s2344_s8  ;;  %s41_s11 = sadd.s32 1, %s2348_s1 }
  0x11   : > { %3186 = sst [smem:[#allocation24_spill]] %s2348_s1  ;;  %p39_p0 = scmp.ge.s32.totalorder %s38_s10, 2 }
  0x12   : > { %3187 = sst [smem:[#allocation25_spill]] %s2352_s9  ;;  %s90_s12 = sadd.s32 1, %s2332_s28 }
  0x13   : > { %p3167_p1 = scmp.ne.s32.totalorder %s2332_s28, %s2328_s27  ;;  %p98_p2 = scmp.eq.s32.totalorder %s2352_s9, 0 }
  0x14   : > { %s3227_s10 = smov (%p39_p0, %s38_s10), 0  ;;  %s3229_s11 = smov (!%p39_p0, %s41_s11), %s2348_s1 }
  0x15   : > { %3188 = sst [smem:[#allocation26_spill]] %s3227_s10  ;;  %p99_p3 = por %p98_p2, %p3167_p1 }
  0x16   : > { %p43_p4 = scmp.ge.s32.totalorder %s3229_s11, 2  ;;  %p2001_p5 = scmp.lt.s32.totalorder %s2352_s9, 4 }
  0x17   : > { %s3165_s13 = sand.u32 1, %s2332_s28   ;;  %s2466_s14 = sshll.u32 %s2348_s1, 11 }
  0x18   : > { %s3231_s11 = smov (%p43_p4, %s3229_s11), 0  ;;  %s2472_s16 = sshll.u32 %s3165_s13, 7 }
  0x19   : > { %3189 = sst [smem:[#allocation27_spill]] %s3231_s11  ;;  %s87_s15 = ssub.s32 %s2348_s1, %s3231_s11 }
  0x1a   : > { %p88_p6 = scmp.eq.s32.totalorder %s87_s15, 0  ;;  %p2474_p7 = pnand %p2001_p5, %p99_p3 }
  0x1b   : > { %s300_s18 = sand.u32 1, %s2352_s9   ;;  %s3192_s3 = sld [smem:[#allocation31_spill]] }
  0x1c   : > { %s2480_s19 = scalar_select %p88_p6, %s2332_s28, %s90_s12  }
  0x1d   : > { %s304_s23 = scalar_lea.vmem [#allocation11], %s2472_s16  ;;  %s2491_s25 = scalar_lea.sflag [#allocation12], %s300_s18 }
  0x1e   : > { %3191 = sst [smem:[#allocation28_spill]] %s2480_s19  ;;  %s311_s24 = sshll.u32 %s304_s23, 4  ;;  %s2489_s24 = int_to_ptr.vmem [resolvable:$true] %s311_s24 }
  0x1f   : > { %p2497_p9 = pneg %p2474_p7 }
  0x21   : > { %s2486_s22 = scalar_lea.hbm %s3192_s3, %s2466_s14  ;;  %s2114_s13 = scalar_lea.hbm %s3192_s3, 4096 }
  0x22   : > { %s2109_s15 = scalar_lea.hbm %s2486_s22, 2048  ;;  %p2115_p12 = scmp.lt.u32.totalorder %s2486_s22, %s3192_s3 }
  0x23   : > { %p2110_p8 = scmp.ne.s32.totalorder %s2486_s22, %s2109_s15  ;;  %p2116_p13 = scmp.lt.u32.totalorder %s2114_s13, %s2109_s15 }
  0x24   : > { %p2118_p2 = scmp.lt.u32.totalorder %s2109_s15, %s2486_s22 }
  0x25   : > { %p2112_p10 = pnand %p2497_p9, %p2110_p8  ;;  %p2117_p0 = por %p2116_p13, %p2115_p12 }
  0x27   : > { %p2113_p11 = pneg %p2112_p10  ;;  %p2119_p3 = por %p2118_p2, %p2117_p0 }
  0x29   : > { %p2120_p4 = pnand %p2119_p3, %p2113_p11 }
  0x2b   : > { %2123 = shalt.err (!%p2120_p4)
}
  0x2c   : > { %s2124_s18 = scalar_lea.vmem %s2489_s24, 2048  ;;  %s2354_s20 = smov [#allocation11]  }
  0x2d   : > { %p2125_p5 = scmp.ne.s32.totalorder %s2489_s24, %s2124_s18  ;;  %s2129_s21 = sshll.u32 %s2354_s20, 4  ;;  %s2130_s21 = int_to_ptr.vmem [resolvable:$false] %s2129_s21 }
  0x2e   : > { %s2131_s11 = scalar_lea.vmem %s2130_s21, 4096  ;;  %p2132_p10 = scmp.lt.s32.totalorder %s2489_s24, %s2130_s21 }
  0x2f   : > { %p2127_p6 = pnand %p2125_p5, %p2497_p9  ;;  %p2133_p1 = scmp.lt.s32.totalorder %s2131_s11, %s2124_s18 }
  0x31   : > { %p2128_p8 = pneg %p2127_p6  ;;  %p2134_p12 = por %p2133_p1, %p2132_p10 }
  0x33   : > { %p2135_p13 = pnand %p2134_p12, %p2128_p8 }
  0x35   : > { %2138 = shalt.err (!%p2135_p13)
}
  0x36   : > { %s3168_s13 = smov 128   ;;  %s3170_s15 = smov 8  }
  0x37   : > { %1991 = dma.hbm_to_vmem [thread:$0]  (!%p2474_p7), %s2486_s22, 2048, %s2489_s24, %s2491_s25, %s3168_s13, %s3168_s13, %s3170_s15  }
  0x38   : > { %s2525_s23 = sadd.s32 4294967295, %s2352_s9   ;;  %s1553_s18 = sadd.s32 4294967294, %s2352_s9  }
  0x39   : > { %p103_p1 = scmp.ne.s32.totalorder %s2328_s27, %s2324_s26  ;;  %p3174_p11 = scmp.eq.s32.totalorder %s2525_s23, 0 }
  0x3a   : > { %p226_p0 = scmp.eq.s32.totalorder %s2525_s23, 3  ;;  %p232_p2 = scmp.eq.s32.totalorder %s1553_s18, 3 }
  0x3b   : > { %p1554_p3 = scmp.ge.s32.totalorder %s2352_s9, 1  ;;  %p2535_p4 = por %p3174_p11, %p103_p1 }
  0x3c   : > { %p3195_p5 = scmp.ne.s32.totalorder %s2332_s28, %s2328_s27  ;;  %p2546_p8 = por %p232_p2, %p103_p1 }
  0x3d   : > { %s3194_s20 = scalar_select %p2535_p4, 1, 0 }
  0x3e   : > { %p2542_p6 = por %p226_p0, %p3195_p5  ;;  %p239_p10 = scmp.lt.s32.totalorder %s2352_s9, 5 }
  0x3f   : > { %s3197_s24 = scalar_select %p2546_p8, 1, 0 }
  0x40   : > { %s3196_s22 = scalar_select %p2542_p6, 1, 0 }
  0x41   : > { %3198 = sst [smem:[#allocation29_spill]] %s3197_s24  ;;  %s3199_s0 = sld [smem:[#allocation30_spill]] }
  0x42   : > { %p2554_p12 = pnand %p1554_p3, %p239_p10  ;;  %s2357_s15 = smov [#allocation14]  }
  0x43   : > { %s265_s3 = sshll.u32 %s2357_s15, 4  ;;  %s2572_s11 = scalar_lea.hbm %s3159_s2, %s2466_s14  ;;  %s2560_s3 = int_to_ptr.vmem [resolvable:$true] %s265_s3 }
  0x44   : > { %s3200_s13 = scalar_select %p2554_p12, 1, 0 }
  0x45   : > { %p1978_p13 = pneg %p2554_p12 }
  0x47   : > { %s252_s18 = sshll.u32 %s3199_s0, 4  ;;  %p2564_p1 = pnand %p1978_p13, %p3174_p11  ;;  %s253_s18 = int_to_ptr.vmem [resolvable:$true] %s252_s18 }
  0x48   : > { %s283_s0 = scalar_lea.vmem [#allocation10], %s2472_s16  ;;  %s2139_s19 = scalar_lea.vmem %s253_s18, 16 }
  0x49   : > { %s290_s8 = sshll.u32 %s283_s0, 4  ;;  %p2140_p0 = scmp.ne.s32.totalorder %s253_s18, %s2139_s19  ;;  %s2575_s8 = int_to_ptr.vmem [resolvable:$true] %s290_s8 }
  0x4a   : > { %p2141_p2 = pneg %p2564_p1  ;;  %p2147_p10 = scmp.lt.s32.totalorder %s253_s18, %s253_s18 }
  0x4b   : > { %p2148_p13 = scmp.lt.s32.totalorder %s2139_s19, %s2139_s19 }
  0x4c   : > { %p2142_p3 = pnand %p2141_p2, %p2140_p0 }
  0x4d   : > { %p2149_p11 = por %p2148_p13, %p2147_p10 }
  0x4e   : > { %p2143_p5 = pneg %p2142_p3 }
  0x50   : > { %p2150_p8 = pnand %p2149_p11, %p2143_p5 }
  0x52   : > { %2153 = shalt.err (!%p2150_p8)
}
  0x53   : > { %s2358_s1 = smov [#allocation6]   ;;  %s2154_s21 = scalar_lea.hbm %s3163_s6, 4096 }
  0x54   : > { %1981 = dma.vmem_to_smem (!%p2564_p1), %s253_s18, 16, %s2358_s1, [#allocation9]  }
  0x55   : > { %p2155_p6 = scmp.ne.s32.totalorder %s3163_s6, %s2154_s21  ;;  %p2161_p11 = scmp.lt.u32.totalorder %s2154_s21, %s3163_s6 }
  0x57   : > { %p2157_p0 = pnand %p2155_p6, %p2141_p2 }
  0x59   : > { %p2158_p3 = pneg %p2157_p0 }
  0x5b   : > { %p2163_p8 = pnand %p2161_p11, %p2158_p3 }
  0x5d   : > { %2166 = shalt.err (!%p2163_p8)
}
  0x5e   : > { %s2167_s18 = scalar_lea.vmem %s2560_s3, 4096  ;;  %p2175_p4 = scmp.lt.s32.totalorder %s2560_s3, %s2560_s3 }
  0x5f   : > { %p2168_p5 = scmp.ne.s32.totalorder %s2560_s3, %s2167_s18  ;;  %p2176_p6 = scmp.lt.s32.totalorder %s2167_s18, %s2167_s18 }
  0x61   : > { %p2170_p10 = pnand %p2168_p5, %p2141_p2  ;;  %p2177_p0 = por %p2176_p6, %p2175_p4 }
  0x63   : > { %p2171_p13 = pneg %p2170_p10 }
  0x65   : > { %p2178_p12 = pnand %p2177_p0, %p2171_p13 }
  0x67   : > { %2181 = shalt.err (!%p2178_p12)
}
  0x68   : > { %s3202_s26 = smov 8   ;;  %s3203_s9 = smov 128  }
  0x69   : > { %1984 = dma.hbm_to_vmem [thread:$0]  (!%p2564_p1), %s3163_s6, 4096, %s2560_s3, [#allocation15], %s3203_s9, %s3203_s9, %s3202_s26  }
  0x6a   : > { %s3204_s0 = sand.u32 1, %s2332_s28   ;;  %s2182_s21 = scalar_lea.hbm %s2572_s11, 2048 }
  0x6b   : > { %s2614_s15 = scalar_lea.sflag [#allocation7], %s3204_s0  ;;  %p2183_p4 = scmp.ne.s32.totalorder %s2572_s11, %s2182_s21 }
  0x6c   : > { %s2187_s18 = scalar_lea.hbm %s3159_s2, 4096  ;;  %p2188_p3 = scmp.lt.u32.totalorder %s2572_s11, %s3159_s2 }
  0x6d   : > { %p2185_p12 = pnand %p2183_p4, %p2497_p9  ;;  %p2189_p11 = scmp.lt.u32.totalorder %s2187_s18, %s2182_s21 }
  0x6e   : > { %p2191_p5 = scmp.lt.u32.totalorder %s2182_s21, %s2572_s11 }
  0x6f   : > { %p2186_p2 = pneg %p2185_p12  ;;  %p2190_p8 = por %p2189_p11, %p2188_p3 }
  0x71   : > { %p2192_p1 = por %p2191_p5, %p2190_p8 }
  0x73   : > { %p2193_p10 = pnand %p2192_p1, %p2186_p2 }
  0x75   : > { %2196 = shalt.err (!%p2193_p10)
}
  0x76   : > { %s2197_s3 = scalar_lea.vmem %s2575_s8, 2048  ;;  %s2359_s0 = smov [#allocation10]  }
  0x77   : > { %p2198_p13 = scmp.ne.s32.totalorder %s2575_s8, %s2197_s3  ;;  %s2202_s10 = sshll.u32 %s2359_s0, 4  ;;  %s2203_s10 = int_to_ptr.vmem [resolvable:$false] %s2202_s10 }
  0x78   : > { %s2204_s19 = scalar_lea.vmem %s2203_s10, 4096  ;;  %p2205_p4 = scmp.lt.s32.totalorder %s2575_s8, %s2203_s10 }
  0x79   : > { %p2200_p6 = pnand %p2198_p13, %p2497_p9  ;;  %p2206_p12 = scmp.lt.s32.totalorder %s2204_s19, %s2197_s3 }
  0x7b   : > { %p2201_p0 = pneg %p2200_p6  ;;  %p2207_p3 = por %p2206_p12, %p2205_p4 }
  0x7d   : > { %p2208_p11 = pnand %p2207_p3, %p2201_p0 }
  0x7f   : > { %2211 = shalt.err (!%p2208_p11)
}
  0x80   : > { %1988 = dma.hbm_to_vmem [thread:$0]  (!%p2474_p7), %s2572_s11, 2048, %s2575_s8, %s2614_s15, %s3203_s9, %s3203_s9, %s3202_s26  }
  0x81   : > { %s2645_s24 = scalar_lea.hbm %s3162_s5, %s2466_s14  ;;  %s331_s1 = scalar_lea.vmem [#allocation13], %s2472_s16 }
  0x82   : > { %s338_s3 = sshll.u32 %s331_s1, 4  ;;  %s2212_s0 = scalar_lea.hbm %s2645_s24, 2048  ;;  %s2648_s3 = int_to_ptr.vmem [resolvable:$true] %s338_s3 }
  0x83   : > { %p2213_p2 = scmp.ne.s32.totalorder %s2645_s24, %s2212_s0  ;;  %s2217_s11 = scalar_lea.hbm %s3162_s5, 4096 }
  0x84   : > { %p2218_p1 = scmp.lt.u32.totalorder %s2645_s24, %s3162_s5  ;;  %p2219_p10 = scmp.lt.u32.totalorder %s2217_s11, %s2212_s0 }
  0x85   : > { %p2215_p8 = pnand %p2213_p2, %p2497_p9  ;;  %p2221_p6 = scmp.lt.u32.totalorder %s2212_s0, %s2645_s24 }
  0x86   : > { %p2220_p13 = por %p2219_p10, %p2218_p1 }
  0x87   : > { %p2216_p5 = pneg %p2215_p8 }
  0x88   : > { %p2222_p0 = por %p2221_p6, %p2220_p13 }
  0x8a   : > { %p2223_p4 = pnand %p2222_p0, %p2216_p5 }
  0x8c   : > { %2226 = shalt.err (!%p2223_p4)
}
  0x8d   : > { %s2227_s16 = scalar_lea.vmem %s2648_s3, 2048  ;;  %s2360_s19 = smov [#allocation13]  }
  0x8e   : > { %p2228_p12 = scmp.ne.s32.totalorder %s2648_s3, %s2227_s16  ;;  %s2232_s21 = sshll.u32 %s2360_s19, 4  ;;  %s2233_s21 = int_to_ptr.vmem [resolvable:$false] %s2232_s21 }
  0x8f   : > { %s2234_s18 = scalar_lea.vmem %s2233_s21, 4096  ;;  %p2235_p2 = scmp.lt.s32.totalorder %s2648_s3, %s2233_s21 }
  0x90   : > { %p2230_p3 = pnand %p2228_p12, %p2497_p9  ;;  %p2236_p8 = scmp.lt.s32.totalorder %s2234_s18, %s2227_s16 }
  0x92   : > { %p2231_p11 = pneg %p2230_p3  ;;  %p2237_p1 = por %p2236_p8, %p2235_p2 }
  0x94   : > { %p2238_p10 = pnand %p2237_p1, %p2231_p11 }
  0x96   : > { %2241 = shalt.err (!%p2238_p10)
}
  0x97   : > { %1994 = dma.hbm_to_vmem [thread:$0]  (!%p2474_p7), %s2645_s24, 2048, %s2648_s3, %s2491_s25, %s3203_s9, %s3203_s9, %s3202_s26  }
  0x98   : > { %p3205_p9 = scmp.ne.s32.totalorder %s3200_s13, 0 }
  0x99   : > { %p3206_p5 = scmp.eq.s32.totalorder (!%p3205_p9), %s2525_s23, 0 }
  0x9a   : > { %350 = sbr.rel (%p3205_p9) target bundleno = 1004 (0x3ec), region = 48 }
  0xa1   : > { %2303 = dma.done.wait (%p3206_p5), [#allocation9], 16   ;;  %p3207_p13 = pmov %p3206_p5 }
  0xa2   : > { %s2682_s12 = sand.u32 1, %s2328_s27   ;;  %p3208_p7 = scmp.ne.s32.totalorder %s3194_s20, 0 }
  0xa3   : > { %2305 = vsyncadd (%p3207_p13), [#allocation9], 4294967280  ;;  %s1569_s17 = sshll.u32 %s2682_s12, 7  ;;  %s357_s1 = scalar_lea.sflag [#allocation7], %s2682_s12 }
  0xa4   : > { %s2686_s0 = scalar_lea.vmem [#allocation10], %s1569_s17 }
  0xa5   : > { %2307 = dma.done.wait (%p3208_p7), %s357_s1, 2048  }
  0xa6   : > { %2309 = vsyncadd (%p3208_p7), %s357_s1, 4294965248  ;;  %s365_s25 = sand.u32 1, %s2525_s23   ;;  %s2693_s26 = scalar_lea.vmem [#allocation11], %s1569_s17 }
  0xa7   : > { %s366_s13 = scalar_lea.sflag [#allocation12], %s365_s25 }
  0xa8   : > { %2311 = dma.done.wait (%p3208_p7), %s366_s13, 4096  }
  0xa9   : > { %2313 = vsyncadd (%p3208_p7), %s366_s13, 4294963200  ;;  %s2699_s9 = scalar_lea.vmem [#allocation13], %s1569_s17  ;;  %p3209_p6 = pmov %p3206_p5 }
  0xaa   : > { %p3210_p0 = pmov %p3206_p5 }
  0xab   : > { %2315 = dma.done.wait (%p3209_p6), [#allocation15], 4096  }
  0xac   : > { %2317 = vsyncadd (%p3210_p0), [#allocation15], 4294963200 }
  0xad   : > { %387 = sfence }
  0xae   : > { %p427_p4 = scmp.lt.s32.totalorder %s2340_s30, 1  ;;  %p430_p12 = scmp.eq.s32.totalorder %s2340_s30, 0 }
  0xaf   : > { %p431_p3 = scmp.eq.s32.totalorder %s2336_s29, 0  ;;  %s2715_s8 = scalar_lea.vmem [#allocation16], %s1569_s17 }
  0xb0   : > { %s2709_s24 = scalar_select %p427_p4, %s2340_s30, 1 }
  0xb1   : > { %p432_p11 = pnand %p431_p3, %p430_p12 }
  0xb2   : > { %s429_s10 = scalar_lea.vmem %s3161_s4, %s2709_s24  ;;  %v2361_v0 = vmov (!%p432_p11), 0.0  }
  0xb3   : > { %435 = sbr.rel (%p432_p11) target bundleno = 195 (0xc3), region = 72  ;;  %436 = vst [vmem:[#allocation4] sm:$0xff] (!%p432_p11), %v2361_v0  ;;  %437 = vst [vmem:[#allocation4 + $0x8] sm:$0xff] (!%p432_p11), %v2361_v0 }
  0xb4   : > { %438 = vst [vmem:[#allocation4 + $0x10] sm:$0xff] (!%p432_p11), %v2361_v0  ;;  %439 = vst [vmem:[#allocation4 + $0x18] sm:$0xff] (!%p432_p11), %v2361_v0 }
  0xb5   : > { %440 = vst [vmem:[#allocation4 + $0x20] sm:$0xff] (!%p432_p11), %v2361_v0  ;;  %441 = vst [vmem:[#allocation4 + $0x28] sm:$0xff] (!%p432_p11), %v2361_v0 }
  0xb6   : > { %442 = vst [vmem:[#allocation4 + $0x30] sm:$0xff] (!%p432_p11), %v2361_v0  ;;  %443 = vst [vmem:[#allocation4 + $0x38] sm:$0xff] (!%p432_p11), %v2361_v0 }
  0xb7   : > { %444 = vst [vmem:[#allocation4 + $0x40] sm:$0xff] (!%p432_p11), %v2361_v0  ;;  %445 = vst [vmem:[#allocation4 + $0x48] sm:$0xff] (!%p432_p11), %v2361_v0 }
  0xb8   : > { %446 = vst [vmem:[#allocation4 + $0x50] sm:$0xff] (!%p432_p11), %v2361_v0  ;;  %447 = vst [vmem:[#allocation4 + $0x58] sm:$0xff] (!%p432_p11), %v2361_v0 }
  0xb9   : > { %448 = vst [vmem:[#allocation4 + $0x60] sm:$0xff] (!%p432_p11), %v2361_v0  ;;  %449 = vst [vmem:[#allocation4 + $0x68] sm:$0xff] (!%p432_p11), %v2361_v0 }
  0xba   : > { %450 = vst [vmem:[#allocation4 + $0x70] sm:$0xff] %v2361_v0  ;;  %451 = vst [vmem:[#allocation4 + $0x78] sm:$0xff] %v2361_v0 }
  0xbb   : > { %452 = vst [vmem:[#allocation4 + $0x80] sm:$0xff] %v2361_v0  ;;  %453 = vst [vmem:[#allocation4 + $0x88] sm:$0xff] %v2361_v0 }
  0xbc   : > { %454 = vst [vmem:[#allocation4 + $0x90] sm:$0xff] %v2361_v0  ;;  %455 = vst [vmem:[#allocation4 + $0x98] sm:$0xff] %v2361_v0 }
  0xbd   : > { %456 = vst [vmem:[#allocation4 + $0xa0] sm:$0xff] %v2361_v0  ;;  %457 = vst [vmem:[#allocation4 + $0xa8] sm:$0xff] %v2361_v0 }
  0xbe   : > { %458 = vst [vmem:[#allocation4 + $0xb0] sm:$0xff] %v2361_v0  ;;  %459 = vst [vmem:[#allocation4 + $0xb8] sm:$0xff] %v2361_v0 }
  0xbf   : > { %460 = vst [vmem:[#allocation4 + $0xc0] sm:$0xff] %v2361_v0  ;;  %461 = vst [vmem:[#allocation4 + $0xc8] sm:$0xff] %v2361_v0 }
  0xc0   : > { %462 = vst [vmem:[#allocation4 + $0xd0] sm:$0xff] %v2361_v0  ;;  %463 = vst [vmem:[#allocation4 + $0xd8] sm:$0xff] %v2361_v0 }
  0xc1   : > { %464 = vst [vmem:[#allocation4 + $0xe0] sm:$0xff] %v2361_v0  ;;  %465 = vst [vmem:[#allocation4 + $0xe8] sm:$0xff] %v2361_v0 }
  0xc2   : > { %466 = vst [vmem:[#allocation4 + $0xf0] sm:$0xff] %v2361_v0  ;;  %467 = vst [vmem:[#allocation4 + $0xf8] sm:$0xff] %v2361_v0 }
  0xc3 PF: > { %p1574_p2 = scmp.ne.s32.totalorder %s2336_s29, 0 }
  0xc4   : > { %v487_v1 = vld [vmem:[%s2693_s26] sm:$0xff] (!%p1574_p2)  ;;  %v488_v2 = vld [vmem:[%s2693_s26 + $0x8] sm:$0xff] (!%p1574_p2)  ;;  %v489_v3 = vld [vmem:[%s2693_s26 + $0x10] sm:$0xff] (!%p1574_p2)  ;;  %v2362_v41 = vmov (!%p1574_p2), 0.0  }
  0xc5   : > { %470 = sbr.rel (%p1574_p2) target bundleno = 463 (0x1cf), region = 76  ;;  %v1850_v4 = vpack.c.bf16 (!%p1574_p2), %v488_v2, %v487_v1  ;;  %v490_v5 = vld [vmem:[%s2693_s26 + $0x18] sm:$0xff] (!%p1574_p2)  ;;  %v491_v7 = vld [vmem:[%s2693_s26 + $0x20] sm:$0xff] (!%p1574_p2)  ;;  %v492_v8 = vld [vmem:[%s2693_s26 + $0x28] sm:$0xff] (!%p1574_p2)  ;;  %703 = vst [vmem:[%s2715_s8] sm:$0xff] (!%p1574_p2), %v2362_v41 }
  0xc6   : > { %v1854_v6 = vpack.c.bf16 (!%p1574_p2), %v490_v5, %v489_v3  ;;  %v1858_v9 = vpack.c.bf16 (!%p1574_p2), %v492_v8, %v491_v7  ;;  %v471_v10 = vld [vmem:[%s2686_s0] sm:$0xff] (!%p1574_p2)  ;;  %v493_v12 = vld [vmem:[%s2693_s26 + $0x30] sm:$0xff] (!%p1574_p2)  ;;  %v494_v13 = vld [vmem:[%s2693_s26 + $0x38] sm:$0xff] (!%p1574_p2)  ;;  %704 = vst [vmem:[%s2715_s8 + $0x8] sm:$0xff] (!%p1574_p2), %v2362_v41 }
  0xc7   : > { %1851 = vmatprep.subr.bf16.mxu0 (!%p1574_p2), %v1850_v4  ;;  %1946 = vmatprep.subr.bf16.mxu1 (!%p1574_p2), %v1850_v4  ;;  %v479_v11 = vld [vmem:[%s2686_s0 + $0x40] sm:$0xff] (!%p1574_p2)  ;;  %v1862_v14 = vpack.c.bf16 (!%p1574_p2), %v494_v13, %v493_v12  ;;  %v496_v16 = vld [vmem:[%s2693_s26 + $0x48] sm:$0xff] (!%p1574_p2)  ;;  %v497_v18 = vld [vmem:[%s2693_s26 + $0x50] sm:$0xff] (!%p1574_p2)  ;;  %705 = vst [vmem:[%s2715_s8 + $0x10] sm:$0xff] (!%p1574_p2), %v2362_v41 }
  0xc8   : > { %1853 = vmatpush3.bf16.msra.mxu0 (!%p1574_p2), %v1850_v4  ;;  %1954 = vmatpush3.bf16.msra.mxu1 (!%p1574_p2), %v1850_v4  ;;  %v495_v15 = vld [vmem:[%s2693_s26 + $0x40] sm:$0xff] (!%p1574_p2)  ;;  %v498_v19 = vld [vmem:[%s2693_s26 + $0x58] sm:$0xff] (!%p1574_p2)  ;;  %v500_v22 = vld [vmem:[%s2693_s26 + $0x68] sm:$0xff] (!%p1574_p2)  ;;  %706 = vst [vmem:[%s2715_s8 + $0x18] sm:$0xff] (!%p1574_p2), %v2362_v41 }
  0xc9   : > { %1855 = vmatprep.subr.bf16.mxu0 (!%p1574_p2), %v1854_v6  ;;  %1947 = vmatprep.subr.bf16.mxu1 (!%p1574_p2), %v1854_v6  ;;  %v1866_v17 = vpack.c.bf16 (!%p1574_p2), %v496_v16, %v495_v15  ;;  %v1870_v20 = vpack.c.bf16 (!%p1574_p2), %v498_v19, %v497_v18  ;;  %v499_v21 = vld [vmem:[%s2693_s26 + $0x60] sm:$0xff] (!%p1574_p2)  ;;  %v501_v24 = vld [vmem:[%s2693_s26 + $0x70] sm:$0xff] (!%p1574_p2)  ;;  %v502_v25 = vld [vmem:[%s2693_s26 + $0x78] sm:$0xff] (!%p1574_p2)  ;;  %707 = vst [vmem:[%s2715_s8 + $0x20] sm:$0xff] (!%p1574_p2), %v2362_v41 }
  0xca   : > { %1714 = vmatprep.mubr.f32.mxu0 (!%p1574_p2), %v471_v10  ;;  %1726 = vmatprep.mubr.f32.mxu1 (!%p1574_p2), %v479_v11  ;;  %v1874_v23 = vpack.c.bf16 (!%p1574_p2), %v500_v22, %v499_v21  ;;  %v1878_v26 = vpack.c.bf16 (!%p1574_p2), %v502_v25, %v501_v24  ;;  %v472_v27 = vld [vmem:[%s2686_s0 + $0x8] sm:$0xff] (!%p1574_p2)  ;;  %v473_v29 = vld [vmem:[%s2686_s0 + $0x10] sm:$0xff] (!%p1574_p2)  ;;  %v474_v31 = vld [vmem:[%s2686_s0 + $0x18] sm:$0xff] (!%p1574_p2)  ;;  %708 = vst [vmem:[%s2715_s8 + $0x28] sm:$0xff] (!%p1574_p2), %v2362_v41 }
  0xcb   : > { %v480_v28 = vld [vmem:[%s2686_s0 + $0x48] sm:$0xff] (!%p1574_p2)  ;;  %v481_v30 = vld [vmem:[%s2686_s0 + $0x50] sm:$0xff] (!%p1574_p2)  ;;  %v482_v32 = vld [vmem:[%s2686_s0 + $0x58] sm:$0xff] (!%p1574_p2)  ;;  %709 = vst [vmem:[%s2715_s8 + $0x30] sm:$0xff] (!%p1574_p2), %v2362_v41 }
  0xcc   : > { %1857 = vmatpush3.bf16.msra.mxu0 %v1854_v6  ;;  %1955 = vmatpush3.bf16.msra.mxu1 %v1854_v6  ;;  %v475_v33 = vld [vmem:[%s2686_s0 + $0x20] sm:$0xff]  ;;  %v476_v35 = vld [vmem:[%s2686_s0 + $0x28] sm:$0xff]  ;;  %v477_v37 = vld [vmem:[%s2686_s0 + $0x30] sm:$0xff]  ;;  %710 = vst [vmem:[%s2715_s8 + $0x38] sm:$0xff] %v2362_v41 }
  0xcd   : > { %1859 = vmatprep.subr.bf16.mxu0 %v1858_v9  ;;  %1948 = vmatprep.subr.bf16.mxu1 %v1858_v9  ;;  %v483_v34 = vld [vmem:[%s2686_s0 + $0x60] sm:$0xff]  ;;  %v484_v36 = vld [vmem:[%s2686_s0 + $0x68] sm:$0xff]  ;;  %v485_v38 = vld [vmem:[%s2686_s0 + $0x70] sm:$0xff]  ;;  %711 = vst [vmem:[%s2715_s8 + $0x40] sm:$0xff] %v2362_v41 }
  0xce   : > { %v478_v39 = vld [vmem:[%s2686_s0 + $0x38] sm:$0xff]  ;;  %712 = vst [vmem:[%s2715_s8 + $0x48] sm:$0xff] %v2362_v41  ;;  %713 = vst [vmem:[%s2715_s8 + $0x50] sm:$0xff] %v2362_v41  ;;  %v2771_v42 = vld [vmem:[%s429_s10] ss:$0 sm:$0xff] }
  0xcf   : > { %v486_v40 = vld [vmem:[%s2686_s0 + $0x78] sm:$0xff]  ;;  %714 = vst [vmem:[%s2715_s8 + $0x58] sm:$0xff] %v2362_v41  ;;  %715 = vst [vmem:[%s2715_s8 + $0x60] sm:$0xff] %v2362_v41 }
  0xd0   : > { %1861 = vmatpush3.bf16.msra.mxu0 %v1858_v9  ;;  %1956 = vmatpush3.bf16.msra.mxu1 %v1858_v9  ;;  %716 = vst [vmem:[%s2715_s8 + $0x68] sm:$0xff] %v2362_v41  ;;  %717 = vst [vmem:[%s2715_s8 + $0x70] sm:$0xff] %v2362_v41 }
  0xd1   : > { %1863 = vmatprep.subr.bf16.mxu0 %v1862_v14  ;;  %1949 = vmatprep.subr.bf16.mxu1 %v1862_v14  ;;  %718 = vst [vmem:[%s2715_s8 + $0x78] sm:$0xff] %v2362_v41 }
  0xd4   : > { %1865 = vmatpush3.bf16.msra.mxu0 %v1862_v14  ;;  %1957 = vmatpush3.bf16.msra.mxu1 %v1862_v14 }
  0xd5   : > { %1867 = vmatprep.subr.bf16.mxu0 %v1866_v17  ;;  %1950 = vmatprep.subr.bf16.mxu1 %v1866_v17 }
  0xd8   : > { %1869 = vmatpush3.bf16.msra.mxu0 %v1866_v17  ;;  %1958 = vmatpush3.bf16.msra.mxu1 %v1866_v17 }
  0xd9   : > { %1871 = vmatprep.subr.bf16.mxu0 %v1870_v20  ;;  %1951 = vmatprep.subr.bf16.mxu1 %v1870_v20 }
  0xdc   : > { %1873 = vmatpush3.bf16.msra.mxu0 %v1870_v20  ;;  %1959 = vmatpush3.bf16.msra.mxu1 %v1870_v20 }
  0xdd   : > { %1875 = vmatprep.subr.bf16.mxu0 %v1874_v23  ;;  %1952 = vmatprep.subr.bf16.mxu1 %v1874_v23 }
  0xe0   : > { %1877 = vmatpush3.bf16.msra.mxu0 %v1874_v23  ;;  %1960 = vmatpush3.bf16.msra.mxu1 %v1874_v23 }
  0xe1   : > { %1879 = vmatprep.subr.bf16.mxu0 %v1878_v26  ;;  %1953 = vmatprep.subr.bf16.mxu1 %v1878_v26 }
  0xe4   : > { %1881 = vmatpush3.bf16.msra.mxu0 %v1878_v26  ;;  %1961 = vmatpush3.bf16.msra.mxu1 %v1878_v26 }
  0xe7   : > { %1715 = vmatmul.mubr.f32.vlgmr.msra.gmra.mrb[0].mxu0 %v472_v27  ;;  %1727 = vmatmul.mubr.f32.vlgmr.msra.gmra.mrb[0].mxu1 %v480_v28 }
  0xe8   : > { %1717 = vmatprep.mubr.f32.mxu0 %v473_v29  ;;  %1729 = vmatprep.mubr.f32.mxu1 %v481_v30 }
  0xeb   : > { %1718 = vmatmul.mubr.f32.gmra.mrb[2].mxu0 %v474_v31  ;;  %1730 = vmatmul.mubr.f32.gmra.mrb[2].mxu1 %v482_v32 }
  0xec   : > { %1720 = vmatprep.mubr.f32.mxu0 %v475_v33  ;;  %1732 = vmatprep.mubr.f32.mxu1 %v483_v34 }
  0xef   : > { %1721 = vmatmul.mubr.f32.gmra.mrb[4].mxu0 %v476_v35  ;;  %1733 = vmatmul.mubr.f32.gmra.mrb[4].mxu1 %v484_v36 }
  0xf0   : > { %1723 = vmatprep.mubr.f32.mxu0 %v477_v37  ;;  %1735 = vmatprep.mubr.f32.mxu1 %v485_v38 }
  0xf3   : > { %1724 = vmatmul.mubr.f32.gmra.mrb[6].mxu0 %v478_v39  ;;  %1736 = vmatmul.mubr.f32.gmra.mrb[6].mxu1 %v486_v40 }
 0x1ba   : > { %v1716_v43 = vpop.f32.mrb[0].mxu0  ;;  %v1728_v44 = vpop.f32.mrb[0].mxu1 }
 0x1bb   : > { %v582_v45 = vadd.f32 %v1716_v43, %v2771_v42  ;;  %v622_v46 = vadd.f32 %v1728_v44, %v2771_v42  ;;  %v576_v47 = vpop.f32.mrb[1].mxu0  ;;  %v616_v48 = vpop.f32.mrb[1].mxu1 }
 0x1bc   : > { %v577_v49 = vadd.f32 %v2771_v42, %v576_v47  ;;  %v617_v50 = vadd.f32 %v2771_v42, %v616_v48 }
 0x1bd   : > { %v656_v51 = vmax.f32 %v582_v45, 0.0  ;;  %v664_v52 = vmax.f32 %v622_v46, 0.0 }
 0x1be   : > { %v655_v53 = vmax.f32 %v577_v49, 0.0  ;;  %v663_v54 = vmax.f32 %v617_v50, 0.0  ;;  %v1719_v55 = vpop.f32.mrb[2].mxu0  ;;  %v1731_v56 = vpop.f32.mrb[2].mxu1 }
 0x1bf   : > { %672 = vst [vmem:[#allocation2 + $0x8] sm:$0xff] %v656_v51  ;;  %688 = vst [vmem:[#allocation3 + $0x8] sm:$0xff] %v656_v51  ;;  %v592_v57 = vadd.f32 %v1719_v55, %v2771_v42  ;;  %v632_v58 = vadd.f32 %v1731_v56, %v2771_v42  ;;  %v586_v59 = vpop.f32.mrb[3].mxu0  ;;  %v626_v60 = vpop.f32.mrb[3].mxu1 }
 0x1c0   : > { %680 = vst [vmem:[#allocation2 + $0x48] sm:$0xff] %v664_v52  ;;  %696 = vst [vmem:[#allocation3 + $0x48] sm:$0xff] %v664_v52  ;;  %v587_v61 = vadd.f32 %v2771_v42, %v586_v59  ;;  %v627_v62 = vadd.f32 %v2771_v42, %v626_v60 }
 0x1c1   : > { %671 = vst [vmem:[#allocation2] sm:$0xff] %v655_v53  ;;  %687 = vst [vmem:[#allocation3] sm:$0xff] %v655_v53  ;;  %v658_v63 = vmax.f32 %v592_v57, 0.0  ;;  %v666_v0 = vmax.f32 %v632_v58, 0.0 }
 0x1c2   : > { %679 = vst [vmem:[#allocation2 + $0x40] sm:$0xff] %v663_v54  ;;  %695 = vst [vmem:[#allocation3 + $0x40] sm:$0xff] %v663_v54  ;;  %v657_v1 = vmax.f32 %v587_v61, 0.0  ;;  %v665_v2 = vmax.f32 %v627_v62, 0.0  ;;  %v1722_v3 = vpop.f32.mrb[4].mxu0  ;;  %v1734_v4 = vpop.f32.mrb[4].mxu1 }
 0x1c3   : > { %674 = vst [vmem:[#allocation2 + $0x18] sm:$0xff] %v658_v63  ;;  %690 = vst [vmem:[#allocation3 + $0x18] sm:$0xff] %v658_v63  ;;  %v602_v5 = vadd.f32 %v1722_v3, %v2771_v42  ;;  %v642_v6 = vadd.f32 %v1734_v4, %v2771_v42  ;;  %v596_v7 = vpop.f32.mrb[5].mxu0  ;;  %v636_v8 = vpop.f32.mrb[5].mxu1 }
 0x1c4   : > { %682 = vst [vmem:[#allocation2 + $0x58] sm:$0xff] %v666_v0  ;;  %698 = vst [vmem:[#allocation3 + $0x58] sm:$0xff] %v666_v0  ;;  %v597_v9 = vadd.f32 %v2771_v42, %v596_v7  ;;  %v637_v10 = vadd.f32 %v2771_v42, %v636_v8 }
 0x1c5   : > { %673 = vst [vmem:[#allocation2 + $0x10] sm:$0xff] %v657_v1  ;;  %689 = vst [vmem:[#allocation3 + $0x10] sm:$0xff] %v657_v1  ;;  %v660_v11 = vmax.f32 %v602_v5, 0.0  ;;  %v668_v12 = vmax.f32 %v642_v6, 0.0 }
 0x1c6   : > { %681 = vst [vmem:[#allocation2 + $0x50] sm:$0xff] %v665_v2  ;;  %697 = vst [vmem:[#allocation3 + $0x50] sm:$0xff] %v665_v2  ;;  %v659_v13 = vmax.f32 %v597_v9, 0.0  ;;  %v667_v14 = vmax.f32 %v637_v10, 0.0  ;;  %v1725_v15 = vpop.f32.mrb[6].mxu0  ;;  %v1737_v16 = vpop.f32.mrb[6].mxu1 }
 0x1c7   : > { %676 = vst [vmem:[#allocation2 + $0x28] sm:$0xff] %v660_v11  ;;  %692 = vst [vmem:[#allocation3 + $0x28] sm:$0xff] %v660_v11  ;;  %v612_v17 = vadd.f32 %v1725_v15, %v2771_v42  ;;  %v652_v18 = vadd.f32 %v1737_v16, %v2771_v42  ;;  %v606_v19 = vpop.f32.mrb[7].mxu0  ;;  %v646_v20 = vpop.f32.mrb[7].mxu1 }
 0x1c8   : > { %684 = vst [vmem:[#allocation2 + $0x68] sm:$0xff] %v668_v12  ;;  %700 = vst [vmem:[#allocation3 + $0x68] sm:$0xff] %v668_v12  ;;  %v607_v21 = vadd.f32 %v2771_v42, %v606_v19  ;;  %v647_v22 = vadd.f32 %v2771_v42, %v646_v20 }
 0x1c9   : > { %675 = vst [vmem:[#allocation2 + $0x20] sm:$0xff] %v659_v13  ;;  %691 = vst [vmem:[#allocation3 + $0x20] sm:$0xff] %v659_v13  ;;  %v662_v23 = vmax.f32 %v612_v17, 0.0  ;;  %v670_v24 = vmax.f32 %v652_v18, 0.0 }
 0x1ca   : > { %683 = vst [vmem:[#allocation2 + $0x60] sm:$0xff] %v667_v14  ;;  %699 = vst [vmem:[#allocation3 + $0x60] sm:$0xff] %v667_v14  ;;  %v661_v25 = vmax.f32 %v607_v21, 0.0  ;;  %v669_v26 = vmax.f32 %v647_v22, 0.0 }
 0x1cb   : > { %678 = vst [vmem:[#allocation2 + $0x38] sm:$0xff] %v662_v23  ;;  %694 = vst [vmem:[#allocation3 + $0x38] sm:$0xff] %v662_v23 }
 0x1cc   : > { %686 = vst [vmem:[#allocation2 + $0x78] sm:$0xff] %v670_v24  ;;  %702 = vst [vmem:[#allocation3 + $0x78] sm:$0xff] %v670_v24 }
 0x1cd   : > { %677 = vst [vmem:[#allocation2 + $0x30] sm:$0xff] %v661_v25  ;;  %693 = vst [vmem:[#allocation3 + $0x30] sm:$0xff] %v661_v25 }
 0x1ce   : > { %685 = vst [vmem:[#allocation2 + $0x70] sm:$0xff] %v669_v26  ;;  %701 = vst [vmem:[#allocation3 + $0x70] sm:$0xff] %v669_v26 }
 0x1cf PF: > { %s735_s15 = sld [smem:[#allocation5]]  ;;  %s1576_s14 = sshll.u32 %s2336_s29, 7  ;;  %v719_v27 = vld [vmem:[#allocation3] sm:$0xff]  ;;  %v720_v28 = vld [vmem:[#allocation3 + $0x8] sm:$0xff]  ;;  %v721_v29 = vld [vmem:[#allocation3 + $0x10] sm:$0xff] }
 0x1d0   : > { %p805_p8 = scmp.ge.s32.totalorder %s2340_s30, 1  ;;  %v722_v30 = vld [vmem:[#allocation3 + $0x18] sm:$0xff]  ;;  %v2791_v31 = vld [vmem:[#allocation3 + $0x20] sm:$0xff]  ;;  %v2793_v32 = vld [vmem:[#allocation3 + $0x28] sm:$0xff]  ;;  %s2797_s19 = scalar_lea.vmem [#allocation4], %s1576_s14 }
 0x1d1   : > { %v756_v33 = vld [vmem:[%s2797_s19] sm:$0xff]  ;;  %v757_v34 = vld [vmem:[%s2797_s19 + $0x8] sm:$0xff]  ;;  %v758_v39 = vld [vmem:[%s2797_s19 + $0x10] sm:$0xff]  ;;  %s2885_s18 = scalar_lea.vmem [#allocation14], %s1576_s14  ;;  %s1050_s17 = sld [smem:[#allocation6 + %s2336_s29]] }
 0x1d2   : > { %s806_s16 = scalar_select %p805_p8, 1, 0  ;;  %v759_v40 = vld [vmem:[%s2797_s19 + $0x18] sm:$0xff]  ;;  %v760_v41 = vld [vmem:[%s2797_s19 + $0x20] sm:$0xff]  ;;  %v761_v46 = vld [vmem:[%s2797_s19 + $0x28] sm:$0xff] }
 0x1d3   : > { %v2817_v47 = vld [vmem:[#allocation3 + $0x38] sm:$0xff]  ;;  %v762_v48 = vld [vmem:[%s2797_s19 + $0x30] sm:$0xff]  ;;  %v825_v62 = vld [vmem:[%s2699_s9] sm:$0xff]  ;;  %s1585_s29 = sshll.u32 %s2340_s30, 11  ;;  %s1390_s0 = sshll.u32 %s2715_s8, 4  ;;  %s3100_s0 = int_to_ptr.vmem [resolvable:$true] %s1390_s0 }
 0x1d4   : > { %v807_v35 = vstv %s806_s16  ;;  %v2801_v36 = vld [vmem:[#allocation3 + $0x30] sm:$0xff]  ;;  %v763_v57 = vld [vmem:[%s2797_s19 + $0x38] sm:$0xff]  ;;  %1770 = vmatprep.mubr.f32.mxu0 %v825_v62  ;;  %v2840_v7 = vld [vmem:[#allocation3 + $0x40] sm:$0xff]  ;;  %s3098_s26 = scalar_lea.hbm %s3164_s7, %s1585_s29  ;;  %s1377_s30 = scalar_lea.sflag [#allocation8], %s2682_s12 }
 0x1d5   : > { %v2803_v37 = vstv %s735_s15  ;;  %s753_s21 = ssub.f32 1.0, %s735_s15  ;;  %vm2805_vm0 = vcmp.eq.s32.totalorder %v807_v35, 1  ;;  %v728_v8 = vld [vmem:[#allocation3 + $0x48] sm:$0xff]  ;;  %v764_v13 = vld [vmem:[%s2797_s19 + $0x40] sm:$0xff]  ;;  %v2852_v15 = vld [vmem:[#allocation3 + $0x50] sm:$0xff]  ;;  %p3213_p10 = scmp.ne.s32.totalorder %s3196_s22, 0 }
 0x1d6   : > { %v737_v42 = vmul.f32 %v2803_v37, %v719_v27  ;;  %v738_v43 = vmul.f32 %v2803_v37, %v720_v28  ;;  %v739_v44 = vmul.f32 %v2803_v37, %v721_v29  ;;  %v740_v45 = vmul.f32 %v2803_v37, %v722_v30  ;;  %v765_v14 = vld [vmem:[%s2797_s19 + $0x48] sm:$0xff]  ;;  %v2857_v19 = vld [vmem:[#allocation3 + $0x58] sm:$0xff]  ;;  %v766_v20 = vld [vmem:[%s2797_s19 + $0x50] sm:$0xff]  ;;  %s2363_s24 = smov [#allocation16]  }
 0x1d7   : > { %v2820_v49 = vstv %s753_s21  ;;  %v741_v50 = vmul.f32 %v2803_v37, %v2791_v31  ;;  %v742_v51 = vmul.f32 %v2803_v37, %v2793_v32  ;;  %v743_v52 = vmul.f32 %v2803_v37, %v2801_v36  ;;  %v767_v21 = vld [vmem:[%s2797_s19 + $0x58] sm:$0xff]  ;;  %s1230_s1 = ssub.f32 1.0, %s1050_s17  ;;  %s2246_s20 = sshll.u32 %s2363_s24, 4  ;;  %s2247_s20 = int_to_ptr.vmem [resolvable:$false] %s2246_s20 }
 0x1d8   : > { %v773_v53 = vmul.f32 %v2820_v49, %v756_v33  ;;  %v774_v54 = vmul.f32 %v2820_v49, %v757_v34  ;;  %v775_v55 = vmul.f32 %v2820_v49, %v758_v39  ;;  %v776_v56 = vmul.f32 %v2820_v49, %v759_v40  ;;  %v731_v39 = vld [vmem:[#allocation3 + $0x60] sm:$0xff]  ;;  %v732_v40 = vld [vmem:[#allocation3 + $0x68] sm:$0xff]  ;;  %v771_v62 = vld [vmem:[%s2797_s19 + $0x78] sm:$0xff]  ;;  %s2248_s3 = scalar_lea.vmem %s2247_s20, 4096  ;;  %p2249_p13 = scmp.lt.s32.totalorder %s3100_s0, %s2247_s20 }
 0x1d9   : > { %v777_v58 = vmul.f32 %v2820_v49, %v760_v41  ;;  %v778_v59 = vmul.f32 %v2820_v49, %v761_v46  ;;  %v744_v60 = vmul.f32 %v2803_v37, %v2817_v47  ;;  %v779_v61 = vmul.f32 %v2820_v49, %v762_v48  ;;  %v768_v41 = vld [vmem:[%s2797_s19 + $0x60] sm:$0xff]  ;;  %v1054_v46 = vld [vmem:[%s2885_s18 + $0x10] sm:$0xff] }
 0x1da   : > { %v789_v63 = vadd.f32 %v773_v53, %v737_v42  ;;  %v790_v0 = vadd.f32 %v774_v54, %v738_v43  ;;  %v791_v1 = vadd.f32 %v775_v55, %v739_v44  ;;  %v792_v2 = vadd.f32 %v776_v56, %v740_v45  ;;  %v769_v42 = vld [vmem:[%s2797_s19 + $0x68] sm:$0xff]  ;;  %v1052_v43 = vld [vmem:[%s2885_s18] sm:$0xff] }
 0x1db   : > { %v793_v3 = vadd.f32 %v777_v58, %v741_v50  ;;  %v794_v4 = vadd.f32 %v778_v59, %v742_v51  ;;  %v780_v5 = vmul.f32 %v2820_v49, %v763_v57  ;;  %v795_v6 = vadd.f32 %v779_v61, %v743_v52  ;;  %v1053_v45 = vld [vmem:[%s2885_s18 + $0x8] sm:$0xff]  ;;  %v733_v57 = vld [vmem:[#allocation3 + $0x70] sm:$0xff]  ;;  %v734_v58 = vld [vmem:[#allocation3 + $0x78] sm:$0xff] }
 0x1dc   : > { %v809_v9 = vsel %vm2805_vm0, %v789_v63, %v719_v27  ;;  %v810_v10 = vsel %vm2805_vm0, %v790_v0, %v720_v28  ;;  %v811_v11 = vsel %vm2805_vm0, %v791_v1, %v721_v29  ;;  %v812_v12 = vsel %vm2805_vm0, %v792_v2, %v722_v30  ;;  %v770_v59 = vld [vmem:[%s2797_s19 + $0x70] sm:$0xff]  ;;  %v1056_v63 = vld [vmem:[%s2885_s18 + $0x20] sm:$0xff]  ;;  %v1057_v0 = vld [vmem:[%s2885_s18 + $0x28] sm:$0xff] }
 0x1dd   : > { %v1882_v16 = vpack.c.bf16 %v810_v10, %v809_v9  ;;  %v1886_v17 = vpack.c.bf16 %v812_v12, %v811_v11  ;;  %v813_v18 = vsel %vm2805_vm0, %v793_v3, %v2791_v31  ;;  %v814_v22 = vsel %vm2805_vm0, %v794_v4, %v2793_v32  ;;  %v1058_v11 = vld [vmem:[%s2885_s18 + $0x30] sm:$0xff]  ;;  %v1059_v12 = vld [vmem:[%s2885_s18 + $0x38] sm:$0xff] }
 0x1de   : > { %v796_v23 = vadd.f32 %v780_v5, %v744_v60  ;;  %v815_v24 = vsel %vm2805_vm0, %v795_v6, %v2801_v36  ;;  %v745_v25 = vmul.f32 %v2803_v37, %v2840_v7  ;;  %v746_v26 = vmul.f32 %v2803_v37, %v728_v8 }
 0x1df   : > { %1883 = vmatprep.subr.bf16.mxu0 %v1882_v16  ;;  %v781_v27 = vmul.f32 %v2820_v49, %v764_v13  ;;  %v782_v28 = vmul.f32 %v2820_v49, %v765_v14  ;;  %v747_v29 = vmul.f32 %v2803_v37, %v2852_v15  ;;  %v748_v31 = vmul.f32 %v2803_v37, %v2857_v19 }
 0x1e0   : > { %1885 = vmatpush3.bf16.msra.mxu0 %v1882_v16  ;;  %v816_v30 = vsel %vm2805_vm0, %v796_v23, %v2817_v47  ;;  %v783_v32 = vmul.f32 %v2820_v49, %v766_v20  ;;  %v784_v33 = vmul.f32 %v2820_v49, %v767_v21  ;;  %v1890_v34 = vpack.c.bf16 %v814_v22, %v813_v18  ;;  %v1055_v47 = vld [vmem:[%s2885_s18 + $0x18] sm:$0xff]  ;;  %v1061_v18 = vld [vmem:[%s2885_s18 + $0x48] sm:$0xff]  ;;  %v1062_v23 = vld [vmem:[%s2885_s18 + $0x50] sm:$0xff] }
 0x1e1   : > { %1887 = vmatprep.subr.bf16.mxu0 %v1886_v17  ;;  %v797_v35 = vadd.f32 %v781_v27, %v745_v25  ;;  %v798_v36 = vadd.f32 %v782_v28, %v746_v26  ;;  %v1894_v44 = vpack.c.bf16 %v816_v30, %v815_v24  ;;  %v749_v51 = vmul.f32 %v2803_v37, %v731_v39  ;;  %v1063_v24 = vld [vmem:[%s2885_s18 + $0x58] sm:$0xff]  ;;  %v1064_v27 = vld [vmem:[%s2885_s18 + $0x60] sm:$0xff]  ;;  %v1065_v28 = vld [vmem:[%s2885_s18 + $0x68] sm:$0xff] }
 0x1e2   : > { %v799_v48 = vadd.f32 %v783_v32, %v747_v29  ;;  %v800_v50 = vadd.f32 %v784_v33, %v748_v31  ;;  %v750_v52 = vmul.f32 %v2803_v37, %v732_v40  ;;  %v785_v55 = vmul.f32 %v2820_v49, %v768_v41  ;;  %v826_v29 = vld [vmem:[%s2699_s9 + $0x8] sm:$0xff]  ;;  %v827_v30 = vld [vmem:[%s2699_s9 + $0x10] sm:$0xff]  ;;  %v828_v31 = vld [vmem:[%s2699_s9 + $0x18] sm:$0xff] }
 0x1e3   : > { %v817_v53 = vsel %vm2805_vm0, %v797_v35, %v2840_v7  ;;  %v818_v54 = vsel %vm2805_vm0, %v798_v36, %v728_v8  ;;  %v786_v56 = vmul.f32 %v2820_v49, %v769_v42  ;;  %v1914_v60 = vpack.c.bf16 %v1053_v45, %v1052_v43  ;;  %v829_v32 = vld [vmem:[%s2699_s9 + $0x20] sm:$0xff]  ;;  %v830_v33 = vld [vmem:[%s2699_s9 + $0x28] sm:$0xff]  ;;  %v832_v35 = vld [vmem:[%s2699_s9 + $0x38] sm:$0xff] }
 0x1e4   : > { %1889 = vmatpush3.bf16.msra.mxu0 %v1886_v17  ;;  %v1918_v61 = vpack.c.bf16 %v1055_v47, %v1054_v46  ;;  %v1898_v1 = vpack.c.bf16 %v818_v54, %v817_v53  ;;  %v819_v2 = vsel %vm2805_vm0, %v799_v48, %v2852_v15  ;;  %v751_v3 = vmul.f32 %v2803_v37, %v733_v57  ;;  %v1060_v17 = vld [vmem:[%s2885_s18 + $0x40] sm:$0xff]  ;;  %v836_v41 = vld [vmem:[%s2699_s9 + $0x58] sm:$0xff]  ;;  %v838_v43 = vld [vmem:[%s2699_s9 + $0x68] sm:$0xff] }
 0x1e5   : > { %1891 = vmatprep.subr.bf16.mxu0 %v1890_v34  ;;  %1915 = vmatprep.subr.bf16.mxu1 %v1914_v60  ;;  %v820_v4 = vsel %vm2805_vm0, %v800_v50, %v2857_v19  ;;  %v801_v5 = vadd.f32 %v785_v55, %v749_v51  ;;  %v802_v6 = vadd.f32 %v786_v56, %v750_v52  ;;  %v833_v36 = vld [vmem:[%s2699_s9 + $0x40] sm:$0xff]  ;;  %v840_v45 = vld [vmem:[%s2699_s9 + $0x78] sm:$0xff]  ;;  %v1066_v46 = vld [vmem:[%s2885_s18 + $0x70] sm:$0xff] }
 0x1e6   : > { %1917 = vmatpush3.bf16.msra.mxu1 %v1914_v60  ;;  %v752_v7 = vmul.f32 %v2803_v37, %v734_v58  ;;  %v787_v8 = vmul.f32 %v2820_v49, %v770_v59  ;;  %v788_v9 = vmul.f32 %v2820_v49, %v771_v62  ;;  %v1922_v10 = vpack.c.bf16 %v1057_v0, %v1056_v63  ;;  %v837_v42 = vld [vmem:[%s2699_s9 + $0x60] sm:$0xff]  ;;  %v1067_v47 = vld [vmem:[%s2885_s18 + $0x78] sm:$0xff]  ;;  %v1003_v51 = vld [vmem:[#allocation2 + $0x8] sm:$0xff] }
 0x1e7   : > { %1919 = vmatprep.subr.bf16.mxu1 %v1918_v61  ;;  %v1902_v13 = vpack.c.bf16 %v820_v4, %v819_v2  ;;  %v821_v14 = vsel %vm2805_vm0, %v801_v5, %v731_v39  ;;  %v822_v37 = vsel %vm2805_vm0, %v802_v6, %v732_v40  ;;  %v1926_v49 = vpack.c.bf16 %v1059_v12, %v1058_v11  ;;  %v834_v39 = vld [vmem:[%s2699_s9 + $0x48] sm:$0xff]  ;;  %v835_v40 = vld [vmem:[%s2699_s9 + $0x50] sm:$0xff]  ;;  %v1002_v50 = vld [vmem:[#allocation2] sm:$0xff] }
 0x1e8   : > { %1893 = vmatpush3.bf16.msra.mxu0 %v1890_v34  ;;  %v803_v15 = vadd.f32 %v787_v8, %v751_v3  ;;  %v804_v16 = vadd.f32 %v788_v9, %v752_v7  ;;  %v1906_v19 = vpack.c.bf16 %v822_v37, %v821_v14  ;;  %v1930_v22 = vpack.c.bf16 %v1061_v18, %v1060_v17  ;;  %v831_v34 = vld [vmem:[%s2699_s9 + $0x30] sm:$0xff]  ;;  %v1005_v59 = vld [vmem:[#allocation2 + $0x18] sm:$0xff]  ;;  %v1006_v3 = vld [vmem:[#allocation2 + $0x20] sm:$0xff] }
 0x1e9   : > { %1895 = vmatprep.subr.bf16.mxu0 %v1894_v44  ;;  %v1934_v26 = vpack.c.bf16 %v1063_v24, %v1062_v23  ;;  %v1938_v38 = vpack.c.bf16 %v1065_v28, %v1064_v27  ;;  %v1942_v48 = vpack.c.bf16 %v1067_v47, %v1066_v46  ;;  %v1018_v53 = vmul.f32 0.1, %v1002_v50  ;;  %v1007_v5 = vld [vmem:[#allocation2 + $0x28] sm:$0xff]  ;;  %v1009_v37 = vld [vmem:[#allocation2 + $0x38] sm:$0xff] }
 0x1ea   : > { %1921 = vmatpush3.bf16.msra.mxu1 %v1918_v61  ;;  %v823_v20 = vsel %vm2805_vm0, %v803_v15, %v733_v57  ;;  %v824_v21 = vsel %vm2805_vm0, %v804_v16, %v734_v58  ;;  %v1019_v55 = vmul.f32 0.1, %v1003_v51  ;;  %v1004_v57 = vld [vmem:[#allocation2 + $0x10] sm:$0xff]  ;;  %v1022_v8 = vmul.f32 0.1, %v1006_v3  ;;  %v1011_v23 = vld [vmem:[#allocation2 + $0x48] sm:$0xff] }
 0x1eb   : > { %1923 = vmatprep.subr.bf16.mxu1 %v1922_v10  ;;  %v1910_v25 = vpack.c.bf16 %v824_v21, %v823_v20  ;;  %v1020_v61 = vmul.f32 0.1, %v1004_v57  ;;  %v1023_v11 = vmul.f32 0.1, %v1007_v5  ;;  %v1010_v21 = vld [vmem:[#allocation2 + $0x40] sm:$0xff]  ;;  %v2998_v5 = vstv %s1050_s17 }
 0x1ec   : > { %1897 = vmatpush3.bf16.msra.mxu0 %v1894_v44  ;;  %v839_v44 = vld [vmem:[%s2699_s9 + $0x70] sm:$0xff]  ;;  %s2242_s9 = scalar_lea.vmem %s3100_s0, 2048 }
 0x1ed   : > { %1899 = vmatprep.subr.bf16.mxu0 %v1898_v1  ;;  %p2243_p1 = scmp.ne.s32.totalorder %s3100_s0, %s2242_s9  ;;  %p2250_p7 = scmp.lt.s32.totalorder %s2248_s3, %s2242_s9 }
 0x1ee   : > { %1925 = vmatpush3.bf16.msra.mxu1 %v1922_v10 }
 0x1ef   : > { %1927 = vmatprep.subr.bf16.mxu1 %v1926_v49  ;;  %p2244_p9 = pnand %p2243_p1, %p3213_p10  ;;  %p2251_p6 = por %p2250_p7, %p2249_p13 }
 0x1f0   : > { %1901 = vmatpush3.bf16.msra.mxu0 %v1898_v1  ;;  %v1021_v1 = vmul.f32 0.1, %v1005_v59 }
 0x1f1   : > { %1903 = vmatprep.subr.bf16.mxu0 %v1902_v13  ;;  %p2245_p5 = pneg %p2244_p9 }
 0x1f2   : > { %1929 = vmatpush3.bf16.msra.mxu1 %v1926_v49 }
 0x1f3   : > { %1931 = vmatprep.subr.bf16.mxu1 %v1930_v22  ;;  %p2252_p0 = pnand %p2251_p6, %p2245_p5 }
 0x1f4   : > { %1905 = vmatpush3.bf16.msra.mxu0 %v1902_v13  ;;  %v1008_v13 = vld [vmem:[#allocation2 + $0x30] sm:$0xff] }
 0x1f5   : > { %1907 = vmatprep.subr.bf16.mxu0 %v1906_v19  ;;  %v1024_v49 = vmul.f32 0.1, %v1008_v13 }
 0x1f6   : > { %1933 = vmatpush3.bf16.msra.mxu1 %v1930_v22 }
 0x1f7   : > { %1935 = vmatprep.subr.bf16.mxu1 %v1934_v26 }
 0x1f8   : > { %1909 = vmatpush3.bf16.msra.mxu0 %v1906_v19  ;;  %v1025_v19 = vmul.f32 0.1, %v1009_v37 }
 0x1f9   : > { %1911 = vmatprep.subr.bf16.mxu0 %v1910_v25 }
 0x1fa   : > { %1937 = vmatpush3.bf16.msra.mxu1 %v1934_v26  ;;  %v1026_v26 = vmul.f32 0.1, %v1010_v21 }
 0x1fb   : > { %1939 = vmatprep.subr.bf16.mxu1 %v1938_v38 }
 0x1fc   : > { %1913 = vmatpush3.bf16.msra.mxu0 %v1910_v25 }
 0x1fe   : > { %1941 = vmatpush3.bf16.msra.mxu1 %v1938_v38  ;;  %v1027_v38 = vmul.f32 0.1, %v1011_v23 }
 0x1ff   : > { %1771 = vmatmul.mubr.f32.vlgmr.msra.gmra.mrb[0].mxu0 %v826_v29  ;;  %1943 = vmatprep.subr.bf16.mxu1 %v1942_v48 }
 0x200   : > { %1773 = vmatprep.mubr.f32.mxu0 %v827_v30  ;;  %v1012_v30 = vld [vmem:[#allocation2 + $0x50] sm:$0xff] }
 0x202   : > { %1945 = vmatpush3.bf16.msra.mxu1 %v1942_v48 }
 0x203   : > { %1774 = vmatmul.mubr.f32.gmra.mrb[2].mxu0 %v828_v31 }
 0x204   : > { %1776 = vmatprep.mubr.f32.mxu0 %v829_v32  ;;  %v1013_v32 = vld [vmem:[#allocation2 + $0x58] sm:$0xff] }
 0x207   : > { %1777 = vmatmul.mubr.f32.gmra.mrb[4].mxu0 %v830_v33 }
 0x208   : > { %1779 = vmatprep.mubr.f32.mxu0 %v831_v34 }
 0x20b   : > { %1780 = vmatmul.mubr.f32.gmra.mrb[6].mxu0 %v832_v35  ;;  %v1028_v35 = vmul.f32 0.1, %v1012_v30 }
 0x20c   : > { %1782 = vmatprep.mubr.f32.mxu0 %v833_v36 }
 0x20f   : > { %1783 = vmatmul.mubr.f32.gmra.mrb[8].mxu0 %v834_v39 }
 0x210   : > { %1785 = vmatprep.mubr.f32.mxu0 %v835_v40  ;;  %v1029_v40 = vmul.f32 0.1, %v1013_v32 }
 0x213   : > { %1786 = vmatmul.mubr.f32.gmra.mrb[10].mxu0 %v836_v41 }
 0x214   : > { %1788 = vmatprep.mubr.f32.mxu0 %v837_v42  ;;  %v1014_v42 = vld [vmem:[#allocation2 + $0x60] sm:$0xff] }
 0x215   : > { %v1030_v47 = vmul.f32 0.1, %v1014_v42  ;;  %v1328_v42 = vld [vmem:[%s2715_s8] sm:$0xff] }
 0x217   : > { %1789 = vmatmul.mubr.f32.gmra.mrb[12].mxu0 %v838_v43 }
 0x218   : > { %1791 = vmatprep.mubr.f32.mxu0 %v839_v44  ;;  %v1015_v44 = vld [vmem:[#allocation2 + $0x68] sm:$0xff] }
 0x219   : > { %v1031_v51 = vmul.f32 0.1, %v1015_v44 }
 0x21b   : > { %1792 = vmatmul.mubr.f32.gmra.mrb[14].mxu0 %v840_v45 }
 0x2d2   : > { %v1772_v52 = vpop.f32.mrb[0].mxu0 }
 0x2d3   : > { %v987_v54 = vmul.f32 0.9, %v1772_v52  ;;  %v907_v56 = vpop.f32.mrb[1].mxu0 }
 0x2d4   : > { %v986_v58 = vmul.f32 0.9, %v907_v56 }
 0x2d5   : > { %v2949_v63 = vadd.f32 %v1019_v55, %v987_v54  ;;  %v1017_v55 = vld [vmem:[#allocation2 + $0x78] sm:$0xff] }
 0x2d6   : > { %v1775_v60 = vpop.f32.mrb[2].mxu0  ;;  %v2947_v62 = vadd.f32 %v1018_v53, %v986_v58  ;;  %v1016_v53 = vld [vmem:[#allocation2 + $0x70] sm:$0xff] }
 0x2d7   : > { %v989_v0 = vmul.f32 0.9, %v1775_v60  ;;  %v917_v2 = vpop.f32.mrb[3].mxu0  ;;  %v1032_v58 = vmul.f32 0.1, %v1016_v53 }
 0x2d8   : > { %v988_v4 = vmul.f32 0.9, %v917_v2  ;;  %1826 = vmatprep.mubr.f32.mxu1 %v2947_v62 }
 0x2d9   : > { %1827 = vmatmul.mubr.f32.vlgmr.msra.gmra.mrb[0].mxu1 %v2949_v63  ;;  %v2955_v9 = vadd.f32 %v1021_v1, %v989_v0 }
 0x2da   : > { %v2953_v6 = vadd.f32 %v1020_v61, %v988_v4  ;;  %v1778_v7 = vpop.f32.mrb[4].mxu0  ;;  %v1033_v61 = vmul.f32 0.1, %v1017_v55  ;;  %v2996_v4 = vstv %s1230_s1  ;;  %v1331_v55 = vld [vmem:[%s2715_s8 + $0x18] sm:$0xff] }
 0x2db   : > { %v991_v10 = vmul.f32 0.9, %v1778_v7  ;;  %v927_v12 = vpop.f32.mrb[5].mxu0 }
 0x2dc   : > { %v990_v14 = vmul.f32 0.9, %v927_v12  ;;  %1829 = vmatprep.mubr.f32.mxu1 %v2953_v6  ;;  %v1232_v12 = vmul.f32 %v2996_v4, %v2947_v62 }
 0x2dd   : > { %1830 = vmatmul.mubr.f32.gmra.mrb[2].mxu1 %v2955_v9  ;;  %v2961_v17 = vadd.f32 %v1023_v11, %v991_v10  ;;  %v1233_v10 = vmul.f32 %v2996_v4, %v2949_v63  ;;  %v1234_v63 = vmul.f32 %v2996_v4, %v2953_v6 }
 0x2de   : > { %v2959_v15 = vadd.f32 %v1022_v8, %v990_v14  ;;  %v1781_v16 = vpop.f32.mrb[6].mxu0 }
 0x2df   : > { %v993_v18 = vmul.f32 0.9, %v1781_v16  ;;  %v937_v20 = vpop.f32.mrb[7].mxu0 }
 0x2e0   : > { %v992_v22 = vmul.f32 0.9, %v937_v20  ;;  %1832 = vmatprep.mubr.f32.mxu1 %v2959_v15 }
 0x2e1   : > { %1833 = vmatmul.mubr.f32.gmra.mrb[4].mxu1 %v2961_v17  ;;  %v2967_v27 = vadd.f32 %v1025_v19, %v993_v18  ;;  %v1235_v18 = vmul.f32 %v2996_v4, %v2955_v9 }
 0x2e2   : > { %v2965_v24 = vadd.f32 %v1024_v49, %v992_v22  ;;  %v1784_v25 = vpop.f32.mrb[8].mxu0 }
 0x2e3   : > { %v995_v28 = vmul.f32 0.9, %v1784_v25  ;;  %v947_v29 = vpop.f32.mrb[9].mxu0  ;;  %v1237_v25 = vmul.f32 %v2996_v4, %v2961_v17 }
 0x2e4   : > { %v994_v31 = vmul.f32 0.9, %v947_v29  ;;  %1835 = vmatprep.mubr.f32.mxu1 %v2965_v24 }
 0x2e5   : > { %1836 = vmatmul.mubr.f32.gmra.mrb[6].mxu1 %v2967_v27  ;;  %v2973_v36 = vadd.f32 %v1027_v38, %v995_v28  ;;  %v1236_v28 = vmul.f32 %v2996_v4, %v2959_v15  ;;  %v1329_v15 = vld [vmem:[%s2715_s8 + $0x8] sm:$0xff] }
 0x2e6   : > { %v2971_v33 = vadd.f32 %v1026_v26, %v994_v31  ;;  %v1787_v34 = vpop.f32.mrb[10].mxu0  ;;  %v1239_v31 = vmul.f32 %v2996_v4, %v2967_v27 }
 0x2e7   : > { %v997_v39 = vmul.f32 0.9, %v1787_v34  ;;  %v957_v41 = vpop.f32.mrb[11].mxu0  ;;  %v1238_v34 = vmul.f32 %v2996_v4, %v2965_v24 }
 0x2e8   : > { %v996_v43 = vmul.f32 0.9, %v957_v41  ;;  %1838 = vmatprep.mubr.f32.mxu1 %v2971_v33 }
 0x2e9   : > { %1839 = vmatmul.mubr.f32.gmra.mrb[8].mxu1 %v2973_v36  ;;  %v2979_v48 = vadd.f32 %v1029_v40, %v997_v39 }
 0x2ea   : > { %v2977_v45 = vadd.f32 %v1028_v35, %v996_v43  ;;  %v1790_v46 = vpop.f32.mrb[12].mxu0 }
 0x2eb   : > { %v999_v50 = vmul.f32 0.9, %v1790_v46  ;;  %v967_v52 = vpop.f32.mrb[13].mxu0 }
 0x2ec   : > { %v998_v54 = vmul.f32 0.9, %v967_v52  ;;  %1841 = vmatprep.mubr.f32.mxu1 %v2977_v45  ;;  %v1240_v52 = vmul.f32 %v2996_v4, %v2971_v33 }
 0x2ed   : > { %1842 = vmatmul.mubr.f32.gmra.mrb[10].mxu1 %v2979_v48  ;;  %v2985_v59 = vadd.f32 %v1031_v51, %v999_v50 }
 0x2ee   : > { %v2983_v56 = vadd.f32 %v1030_v47, %v998_v54  ;;  %v1793_v57 = vpop.f32.mrb[14].mxu0  ;;  %v1241_v47 = vmul.f32 %v2996_v4, %v2973_v36 }
 0x2ef   : > { %v1001_v60 = vmul.f32 0.9, %v1793_v57  ;;  %v977_v0 = vpop.f32.mrb[15].mxu0 }
 0x2f0   : > { %v1000_v1 = vmul.f32 0.9, %v977_v0  ;;  %1844 = vmatprep.mubr.f32.mxu1 %v2983_v56 }
 0x2f1   : > { %1845 = vmatmul.mubr.f32.gmra.mrb[12].mxu1 %v2985_v59  ;;  %v2991_v3 = vadd.f32 %v1033_v61, %v1001_v60  ;;  %v1330_v60 = vld [vmem:[%s2715_s8 + $0x10] sm:$0xff] }
 0x2f2   : > { %v2989_v2 = vadd.f32 %v1032_v58, %v1000_v1 }
 0x2f4   : > { %1847 = vmatprep.mubr.f32.mxu1 %v2989_v2 }
 0x2f5   : > { %1848 = vmatmul.mubr.f32.gmra.mrb[14].mxu1 %v2991_v3 }
 0x3ac   : > { %v1828_v7 = vpop.f32.mrb[0].mxu1 }
 0x3ad   : > { %v1215_v8 = vmul.f32 %v1828_v7, %v2998_v5  ;;  %v1134_v11 = vpop.f32.mrb[1].mxu1  ;;  %v1243_v7 = vmul.f32 %v2996_v4, %v2979_v48 }
 0x3ae   : > { %v1214_v13 = vmul.f32 %v2998_v5, %v1134_v11 }
 0x3af   : > { %v1249_v14 = vadd.f32 %v1233_v10, %v1215_v8 }
 0x3b0   : > { %v1248_v37 = vadd.f32 %v1232_v12, %v1214_v13  ;;  %v1831_v16 = vpop.f32.mrb[2].mxu1  ;;  %v1242_v12 = vmul.f32 %v2996_v4, %v2977_v45 }
 0x3b1   : > { %2077 = vtanh.f32 %v1249_v14  ;;  %v1217_v49 = vmul.f32 %v1831_v16, %v2998_v5  ;;  %v1144_v19 = vpop.f32.mrb[3].mxu1 }
 0x3b2   : > { %2079 = vtanh.f32 %v1248_v37  ;;  %v1216_v20 = vmul.f32 %v2998_v5, %v1144_v19  ;;  %v1333_v37 = vld [vmem:[%s2715_s8 + $0x28] sm:$0xff] }
 0x3b3   : > { %v1251_v21 = vadd.f32 %v1235_v18, %v1217_v49  ;;  %v1332_v18 = vld [vmem:[%s2715_s8 + $0x20] sm:$0xff] }
 0x3b4   : > { %v1250_v62 = vadd.f32 %v1234_v63, %v1216_v20  ;;  %v1834_v22 = vpop.f32.mrb[4].mxu1 }
 0x3b5   : > { %2081 = vtanh.f32 %v1251_v21  ;;  %v1219_v23 = vmul.f32 %v1834_v22, %v2998_v5  ;;  %v1154_v26 = vpop.f32.mrb[5].mxu1  ;;  %v1245_v21 = vmul.f32 %v2996_v4, %v2985_v59 }
 0x3b6   : > { %2083 = vtanh.f32 %v1250_v62  ;;  %v1218_v9 = vmul.f32 %v2998_v5, %v1154_v26 }
 0x3b7   : > { %v1253_v38 = vadd.f32 %v1237_v25, %v1219_v23  ;;  %v1244_v25 = vmul.f32 %v2996_v4, %v2983_v56 }
 0x3b8   : > { %v1252_v6 = vadd.f32 %v1236_v28, %v1218_v9  ;;  %v1837_v29 = vpop.f32.mrb[6].mxu1  ;;  %v1335_v28 = vld [vmem:[%s2715_s8 + $0x38] sm:$0xff] }
 0x3b9   : > { %2085 = vtanh.f32 %v1253_v38  ;;  %v1221_v30 = vmul.f32 %v1837_v29, %v2998_v5  ;;  %v1164_v32 = vpop.f32.mrb[7].mxu1  ;;  %v1334_v29 = vld [vmem:[%s2715_s8 + $0x30] sm:$0xff] }
 0x3ba   : > { %2087 = vtanh.f32 %v1252_v6  ;;  %v1220_v17 = vmul.f32 %v2998_v5, %v1164_v32 }
 0x3bb   : > { %v2078_v35 = vpop.eup %2077  ;;  %v1255_v39 = vadd.f32 %v1239_v31, %v1221_v30 }
 0x3bc   : > { %v2080_v40 = vpop.eup %2079  ;;  %v1281_v41 = vmax.f32 %v2078_v35, 0.0  ;;  %v1254_v43 = vadd.f32 %v1238_v34, %v1220_v17  ;;  %v1840_v44 = vpop.f32.mrb[8].mxu1  ;;  %v1247_v17 = vmul.f32 %v2996_v4, %v2991_v3  ;;  %v1246_v35 = vmul.f32 %v2996_v4, %v2989_v2  ;;  %v1336_v2 = vld [vmem:[%s2715_s8 + $0x40] sm:$0xff] }
 0x3bd   : > { %v1280_v46 = vmax.f32 %v2080_v40, 0.0  ;;  %2089 = vtanh.f32 %v1255_v39  ;;  %v1223_v27 = vmul.f32 %v1840_v44, %v2998_v5  ;;  %v1174_v50 = vpop.f32.mrb[9].mxu1 }
 0x3be   : > { %1297 = vst [vmem:[#allocation3 + $0x8] sm:$0xff] %v1281_v41  ;;  %1313 = vst [vmem:[%s2797_s19 + $0x8] sm:$0xff] %v1281_v41  ;;  %v1345_v24 = vadd.f32 %v1329_v15, %v1281_v41  ;;  %2091 = vtanh.f32 %v1254_v43  ;;  %v1222_v51 = vmul.f32 %v2998_v5, %v1174_v50  ;;  %v1339_v50 = vld [vmem:[%s2715_s8 + $0x58] sm:$0xff] }
 0x3bf   : > { %v2082_v53 = vpop.eup %2081  ;;  %1296 = vst [vmem:[#allocation3] sm:$0xff] %v1280_v46  ;;  %1312 = vst [vmem:[%s2797_s19] sm:$0xff] %v1280_v46  ;;  %v1344_v54 = vadd.f32 %v1328_v42, %v1280_v46  ;;  %v1257_v57 = vadd.f32 %v1241_v47, %v1223_v27  ;;  %v1337_v42 = vld [vmem:[%s2715_s8 + $0x48] sm:$0xff] }
 0x3c0   : > { %v2084_v36 = vpop.eup %2083  ;;  %1361 = vst [vmem:[%s2715_s8 + $0x8] sm:$0xff] %v1345_v24  ;;  %v1283_v58 = vmax.f32 %v2082_v53, 0.0  ;;  %v1256_v61 = vadd.f32 %v1240_v52, %v1222_v51  ;;  %v1843_v0 = vpop.f32.mrb[10].mxu1  ;;  %v1338_v52 = vld [vmem:[%s2715_s8 + $0x50] sm:$0xff] }
 0x3c1   : > { %1360 = vst [vmem:[%s2715_s8] sm:$0xff] %v1344_v54  ;;  %v1282_v1 = vmax.f32 %v2084_v36, 0.0  ;;  %2093 = vtanh.f32 %v1257_v57  ;;  %v1225_v33 = vmul.f32 %v1843_v0, %v2998_v5  ;;  %v1184_v8 = vpop.f32.mrb[11].mxu1  ;;  %v1341_v36 = vld [vmem:[%s2715_s8 + $0x68] sm:$0xff] }
 0x3c2   : > { %1299 = vst [vmem:[#allocation3 + $0x18] sm:$0xff] %v1283_v58  ;;  %1315 = vst [vmem:[%s2797_s19 + $0x18] sm:$0xff] %v1283_v58  ;;  %v1347_v10 = vadd.f32 %v1331_v55, %v1283_v58  ;;  %2095 = vtanh.f32 %v1256_v61  ;;  %v1224_v11 = vmul.f32 %v2998_v5, %v1184_v8  ;;  %v1340_v61 = vld [vmem:[%s2715_s8 + $0x60] sm:$0xff]  ;;  %v1343_v8 = vld [vmem:[%s2715_s8 + $0x78] sm:$0xff] }
 0x3c3   : > { %v2086_v13 = vpop.eup %2085  ;;  %1298 = vst [vmem:[#allocation3 + $0x10] sm:$0xff] %v1282_v1  ;;  %1314 = vst [vmem:[%s2797_s19 + $0x10] sm:$0xff] %v1282_v1  ;;  %v1346_v14 = vadd.f32 %v1330_v60, %v1282_v1  ;;  %v1259_v16 = vadd.f32 %v1243_v7, %v1225_v33 }
 0x3c4   : > { %v2088_v48 = vpop.eup %2087  ;;  %1363 = vst [vmem:[%s2715_s8 + $0x18] sm:$0xff] %v1347_v10  ;;  %v1285_v49 = vmax.f32 %v2086_v13, 0.0  ;;  %v1258_v19 = vadd.f32 %v1242_v12, %v1224_v11  ;;  %v1846_v20 = vpop.f32.mrb[12].mxu1  ;;  %v1342_v12 = vld [vmem:[%s2715_s8 + $0x70] sm:$0xff] }
 0x3c5   : > { %1362 = vst [vmem:[%s2715_s8 + $0x10] sm:$0xff] %v1346_v14  ;;  %v1284_v63 = vmax.f32 %v2088_v48, 0.0  ;;  %2097 = vtanh.f32 %v1259_v16  ;;  %v1227_v45 = vmul.f32 %v1846_v20, %v2998_v5  ;;  %v1194_v62 = vpop.f32.mrb[13].mxu1 }
 0x3c6   : > { %1301 = vst [vmem:[#allocation3 + $0x28] sm:$0xff] %v1285_v49  ;;  %1317 = vst [vmem:[%s2797_s19 + $0x28] sm:$0xff] %v1285_v49  ;;  %v1349_v22 = vadd.f32 %v1333_v37, %v1285_v49  ;;  %2099 = vtanh.f32 %v1258_v19  ;;  %v1226_v23 = vmul.f32 %v2998_v5, %v1194_v62 }
 0x3c7   : > { %v2090_v26 = vpop.eup %2089  ;;  %1300 = vst [vmem:[#allocation3 + $0x20] sm:$0xff] %v1284_v63  ;;  %1316 = vst [vmem:[%s2797_s19 + $0x20] sm:$0xff] %v1284_v63  ;;  %v1348_v9 = vadd.f32 %v1332_v18, %v1284_v63  ;;  %v1261_v38 = vadd.f32 %v1245_v21, %v1227_v45 }
 0x3c8   : > { %v2092_v59 = vpop.eup %2091  ;;  %1365 = vst [vmem:[%s2715_s8 + $0x28] sm:$0xff] %v1349_v22  ;;  %v1287_v6 = vmax.f32 %v2090_v26, 0.0  ;;  %v1260_v30 = vadd.f32 %v1244_v25, %v1226_v23  ;;  %v1849_v31 = vpop.f32.mrb[14].mxu1 }
 0x3c9   : > { %1364 = vst [vmem:[%s2715_s8 + $0x20] sm:$0xff] %v1348_v9  ;;  %v1286_v32 = vmax.f32 %v2092_v59, 0.0  ;;  %2101 = vtanh.f32 %v1261_v38  ;;  %v1229_v56 = vmul.f32 %v1849_v31, %v2998_v5  ;;  %v1204_v34 = vpop.f32.mrb[15].mxu1 }
 0x3ca   : > { %1303 = vst [vmem:[#allocation3 + $0x38] sm:$0xff] %v1287_v6  ;;  %1319 = vst [vmem:[%s2797_s19 + $0x38] sm:$0xff] %v1287_v6  ;;  %v1351_v15 = vadd.f32 %v1335_v28, %v1287_v6  ;;  %2103 = vtanh.f32 %v1260_v30  ;;  %v1228_v39 = vmul.f32 %v2998_v5, %v1204_v34 }
 0x3cb   : > { %v2094_v40 = vpop.eup %2093  ;;  %1302 = vst [vmem:[#allocation3 + $0x30] sm:$0xff] %v1286_v32  ;;  %1318 = vst [vmem:[%s2797_s19 + $0x30] sm:$0xff] %v1286_v32  ;;  %v1350_v41 = vadd.f32 %v1334_v29, %v1286_v32  ;;  %v1263_v3 = vadd.f32 %v1247_v17, %v1229_v56 }
 0x3cc   : > { %v2096_v43 = vpop.eup %2095  ;;  %1367 = vst [vmem:[%s2715_s8 + $0x38] sm:$0xff] %v1351_v15  ;;  %v1289_v44 = vmax.f32 %v2094_v40, 0.0  ;;  %v1262_v4 = vadd.f32 %v1246_v35, %v1228_v39 }
 0x3cd   : > { %1366 = vst [vmem:[%s2715_s8 + $0x30] sm:$0xff] %v1350_v41  ;;  %v1288_v46 = vmax.f32 %v2096_v43, 0.0  ;;  %2105 = vtanh.f32 %v1263_v3 }
 0x3ce   : > { %1305 = vst [vmem:[#allocation3 + $0x48] sm:$0xff] %v1289_v44  ;;  %1321 = vst [vmem:[%s2797_s19 + $0x48] sm:$0xff] %v1289_v44  ;;  %v1353_v5 = vadd.f32 %v1337_v42, %v1289_v44  ;;  %2107 = vtanh.f32 %v1262_v4 }
 0x3cf   : > { %v2098_v27 = vpop.eup %2097  ;;  %1304 = vst [vmem:[#allocation3 + $0x40] sm:$0xff] %v1288_v46  ;;  %1320 = vst [vmem:[%s2797_s19 + $0x40] sm:$0xff] %v1288_v46  ;;  %v1352_v47 = vadd.f32 %v1336_v2, %v1288_v46 }
 0x3d0   : > { %v2100_v24 = vpop.eup %2099  ;;  %1369 = vst [vmem:[%s2715_s8 + $0x48] sm:$0xff] %v1353_v5  ;;  %v1291_v51 = vmax.f32 %v2098_v27, 0.0 }
 0x3d1   : > { %1368 = vst [vmem:[%s2715_s8 + $0x40] sm:$0xff] %v1352_v47  ;;  %v1290_v53 = vmax.f32 %v2100_v24, 0.0 }
 0x3d2   : > { %1307 = vst [vmem:[#allocation3 + $0x58] sm:$0xff] %v1291_v51  ;;  %1323 = vst [vmem:[%s2797_s19 + $0x58] sm:$0xff] %v1291_v51  ;;  %v1355_v54 = vadd.f32 %v1339_v50, %v1291_v51 }
 0x3d3   : > { %v2102_v55 = vpop.eup %2101  ;;  %1306 = vst [vmem:[#allocation3 + $0x50] sm:$0xff] %v1290_v53  ;;  %1322 = vst [vmem:[%s2797_s19 + $0x50] sm:$0xff] %v1290_v53  ;;  %v1354_v57 = vadd.f32 %v1338_v52, %v1290_v53 }
 0x3d4   : > { %v2104_v58 = vpop.eup %2103  ;;  %1371 = vst [vmem:[%s2715_s8 + $0x58] sm:$0xff] %v1355_v54  ;;  %v1293_v60 = vmax.f32 %v2102_v55, 0.0 }
 0x3d5   : > { %1370 = vst [vmem:[%s2715_s8 + $0x50] sm:$0xff] %v1354_v57  ;;  %v1292_v0 = vmax.f32 %v2104_v58, 0.0 }
 0x3d6   : > { %1309 = vst [vmem:[#allocation3 + $0x68] sm:$0xff] %v1293_v60  ;;  %1325 = vst [vmem:[%s2797_s19 + $0x68] sm:$0xff] %v1293_v60  ;;  %v1357_v1 = vadd.f32 %v1341_v36, %v1293_v60 }
 0x3d7   : > { %v2106_v33 = vpop.eup %2105  ;;  %1308 = vst [vmem:[#allocation3 + $0x60] sm:$0xff] %v1292_v0  ;;  %1324 = vst [vmem:[%s2797_s19 + $0x60] sm:$0xff] %v1292_v0  ;;  %v1356_v7 = vadd.f32 %v1340_v61, %v1292_v0 }
 0x3d8   : > { %v2108_v10 = vpop.eup %2107  ;;  %1373 = vst [vmem:[%s2715_s8 + $0x68] sm:$0xff] %v1357_v1  ;;  %v1295_v11 = vmax.f32 %v2106_v33, 0.0 }
 0x3d9   : > { %1372 = vst [vmem:[%s2715_s8 + $0x60] sm:$0xff] %v1356_v7  ;;  %v1294_v13 = vmax.f32 %v2108_v10, 0.0 }
 0x3da   : > { %1311 = vst [vmem:[#allocation3 + $0x78] sm:$0xff] %v1295_v11  ;;  %1327 = vst [vmem:[%s2797_s19 + $0x78] sm:$0xff] %v1295_v11  ;;  %v1359_v14 = vadd.f32 %v1343_v8, %v1295_v11 }
 0x3db   : > { %1310 = vst [vmem:[#allocation3 + $0x70] sm:$0xff] %v1294_v13  ;;  %1326 = vst [vmem:[%s2797_s19 + $0x70] sm:$0xff] %v1294_v13  ;;  %v1358_v37 = vadd.f32 %v1342_v12, %v1294_v13 }
 0x3dc   : > { %1375 = vst [vmem:[%s2715_s8 + $0x78] sm:$0xff] %v1359_v14 }
 0x3dd   : > { %1374 = vst [vmem:[%s2715_s8 + $0x70] sm:$0xff] %v1358_v37 }
 0x3de   : > { %2255 = shalt.err (!%p2252_p0)
}
 0x3df   : > { %s2256_s10 = scalar_lea.hbm %s3098_s26, 2048  ;;  %s2260_s11 = scalar_lea.hbm %s3164_s7, 4096 }
 0x3e0   : > { %p2257_p4 = scmp.ne.s32.totalorder %s3098_s26, %s2256_s10  ;;  %p2261_p11 = scmp.lt.u32.totalorder %s3098_s26, %s3164_s7 }
 0x3e1   : > { %p2262_p2 = scmp.lt.u32.totalorder %s2260_s11, %s2256_s10  ;;  %p2264_p1 = scmp.lt.u32.totalorder %s2256_s10, %s3098_s26 }
 0x3e2   : > { %p2258_p12 = pnand %p2257_p4, %p3213_p10 }
 0x3e3   : > { %p2263_p8 = por %p2262_p2, %p2261_p11 }
 0x3e4   : > { %p2259_p3 = pneg %p2258_p12 }
 0x3e5   : > { %p2265_p9 = por %p2264_p1, %p2263_p8 }
 0x3e7   : > { %p2266_p5 = pnand %p2265_p9, %p2259_p3 }
 0x3e9   : > { %2269 = shalt.err (!%p2266_p5)
}
 0x3ea   : > { %s2364_s16 = smov 128   ;;  %s2365_s19 = smov 8  }
 0x3eb   : > { %1976 = dma.vmem_to_hbm [thread:$0]  (%p3213_p10), %s3100_s0, 2048, %s3098_s26, %s1377_s30, %s2364_s16, %s2364_s16, %s2365_s19  }
 0x3ec PF: > { %s3214_s21 = sld [smem:[#allocation25_spill]]  ;;  %s3215_s18 = sld [smem:[#allocation22_spill]] }
 0x3ed   : > { %s3216_s17 = sld [smem:[#allocation29_spill]] }
 0x3f2   : > { %p2004_p13 = scmp.ge.s32.totalorder %s3214_s21, 2  ;;  %s1405_s1 = sand.u32 1, %s3215_s18  }
 0x3f3   : > { %p3217_p7 = scmp.ne.s32.totalorder %s3216_s17, 0  ;;  %s1406_s29 = scalar_lea.sflag [#allocation8], %s1405_s1 }
 0x3f5   : > { %p1996_p6 = pnand %p2004_p13, %p3217_p7 }
 0x3f7   : > { %2319 = dma.done.wait (!%p1996_p6), %s1406_s29, 2048  }
 0x3f8   : > { %2321 = vsyncadd (!%p1996_p6), %s1406_s29, 4294965248  ;;  %s29_s9 = sadd.s32 1, %s3214_s21   ;;  %s3218_s25 = sld [smem:[#allocation28_spill]] }
 0x3f9   : > { %p26_p0 = scmp.ge.s32.totalorder %s29_s9, 6   ;;  %s3219_s29 = sld [smem:[#allocation23_spill]] }
 0x3fa   : > { %s3220_s30 = sld [smem:[#allocation24_spill]]  ;;  %s3221_s8 = sld [smem:[#allocation26_spill]] }
 0x3fb   : > { %s3222_s1 = sld [smem:[#allocation27_spill]]  ;;  %s3223_s26 = smov %s2328_s27 }
 0x3fc   : > { %s3224_s27 = smov %s2332_s28  ;;  %28 = sbr.rel (!%p26_p0) target bundleno = 15 (0xf), region = 139 }
 0x3fe   : > { %s3225_s28 = smov %s3218_s25 }
 0x403   :  { %1411 = vsyncpa [#allocation7], 1 }
 0x404   :  { %1413 = vsyncpa [#allocation7 + $0x1], 1 }
 0x405   :  { %1414 = vsyncpa [#allocation12], 1 }
 0x406   :  { %1416 = vsyncpa [#allocation12 + $0x1], 1 }
 0x407   :  { %1417 = vsyncpa [#allocation15], 1 }
 0x408   :  { %1418 = vsyncpa [#allocation8], 1 }
 0x409   :  { %1420 = vsyncpa [#allocation8 + $0x1], 1 }
 0x40a   :  { %1421 = vsyncpa [#allocation9], 1 }
 0x40b   :  { %1423 = vsyncpa [#allocation9 + $0x1], 1 }

</bundles_post_ra>
